<compile_context>
chip_gen: v7x
topology: tpu7x:2x2x1
jax: 0.10.0
libtpu: 0.0.40
codegen_flags: <defaults>
</compile_context>

<pallas_src>
import functools

import numpy as np
import jax
import jax.numpy as jnp
from jax.experimental import pallas as pl
from jax.experimental.pallas import tpu as pltpu


_MXU_DTYPE = jnp.float32   # set to jnp.bfloat16 on v6e/v7x for cheaper matmuls


# ----------------------------------------------------------------------------
# In-kernel building blocks (pure functions on (C, H*W) values)
# ----------------------------------------------------------------------------
def _conv_bn_relu(x, w_mat, scale, bias, *, H, W, dilation):
    """3x3 conv (stride 1, padding=dilation, dilation) + folded BN + ReLU.

    x:      (Cin, H*W)   channel-major, flattened spatial on lanes.
    w_mat:  (Cout, 9*Cin) packed (ky, kx) row-major, Cin fastest.
    scale:  (Cout, 1)    folded BatchNorm scale   (inference mode).
    bias:   (Cout, 1)    folded conv-bias + BatchNorm shift.
    returns (Cout, H*W) float32.
    """
    Cin, P = x.shape
    d = dilation
    pad = d * W + d                               # covers all 9 tap offsets
    zpad = jnp.zeros((Cin, pad), jnp.float32)
    xp = jnp.concatenate([zpad, x, zpad], axis=1)  # (Cin, P + 2*pad), in-register

    # Lane masks killing the horizontally wrapped contributions of the
    # left / right kernel columns (vertical overflow lands in the zero pad).
    col = jax.lax.broadcasted_iota(jnp.int32, (1, P), 1) % W
    mask_l = (col >= d).astype(jnp.float32)        # kx == 0
    mask_r = (col < W - d).astype(jnp.float32)     # kx == 2

    taps = []
    for ky in range(3):
        for kx in range(3):
            off = ky * d * W + kx * d
            s = xp[:, off:off + P]                 # static lane slice
            if kx == 0:
                s = s * mask_l
            elif kx == 2:
                s = s * mask_r
            taps.append(s)
    patch = jnp.concatenate(taps, axis=0)          # (9*Cin, P)

    acc = jnp.dot(w_mat.astype(_MXU_DTYPE), patch.astype(_MXU_DTYPE),
                  preferred_element_type=jnp.float32)   # (Cout, P), one MXU op
    return jnp.maximum(acc * scale + bias, 0.0)


def _maxpool2x2(x, sel, *, H, W):
    """MaxPool2d(2,2) on (C, H*W): 4 lane-shifted maxima + 0/1 selection matmul."""
    C, P = x.shape
    xe = jnp.concatenate([x, jnp.zeros((C, W + 1), jnp.float32)], axis=1)
    m = jnp.maximum(jnp.maximum(xe[:, 0:P], xe[:, 1:P + 1]),
                    jnp.maximum(xe[:, W:W + P], xe[:, W + 1:W + 1 + P]))
    # sel: (P, P//4) one-hot picking the top-left lane of every 2x2 window.
    return jnp.dot(m, sel, preferred_element_type=jnp.float32)


def _upsample2x(x, up):
    """UpsamplingBilinear2d(scale=2, align_corners=True) as a (P_lo,P_hi) matmul."""
    return jnp.dot(x, up, preferred_element_type=jnp.float32)


# ----------------------------------------------------------------------------
# The fused UNet_Block3 kernel (one pallas_call, grid over batch)
# ----------------------------------------------------------------------------
def _unet_block3_kernel(x_ref,
                        w1, s1, b1, w2, s2, b2, w3, s3, b3,
                        w4, s4, b4, w5, s5, b5, w6, s6, b6,
                        sel0, sel1, sel2, up3, up2, up1,
                        o_ref, *, H, W):
    H0, W0 = H, W
    H1, W1 = H0 // 2, W0 // 2
    H2, W2 = H1 // 2, W1 // 2
    H3, W3 = H2 // 2, W2 // 2

    conv = _conv_bn_relu
    x = x_ref[0]                                            # (in_c, H*W)

    out1 = conv(x, w1[...], s1[...], b1[...], H=H0, W=W0, dilation=1)
    out2 = conv(out1, w2[...], s2[...], b2[...], H=H0, W=W0, dilation=1)
    out3 = conv(_maxpool2x2(out2, sel0[...], H=H0, W=W0),
                w3[...], s3[...], b3[...], H=H1, W=W1, dilation=1)
    out4 = conv(_maxpool2x2(out3, sel1[...], H=H1, W=W1),
                w3[...], s3[...], b3[...], H=H2, W=W2, dilation=1)
    out5 = conv(_maxpool2x2(out4, sel2[...], H=H2, W=W2),
                w3[...], s3[...], b3[...], H=H3, W=W3, dilation=1)
    out8 = conv(out5, w4[...], s4[...], b4[...], H=H3, W=W3, dilation=2)
    out9 = conv(jnp.concatenate([out5, out8], axis=0),
                w5[...], s5[...], b5[...], H=H3, W=W3, dilation=1)
    out10 = conv(jnp.concatenate([_upsample2x(out9, up3[...]), out4], axis=0),
                 w5[...], s5[...], b5[...], H=H2, W=W2, dilation=1)
    out11 = conv(jnp.concatenate([_upsample2x(out10, up2[...]), out3], axis=0),
                 w5[...], s5[...], b5[...], H=H1, W=W1, dilation=1)
    out12 = conv(jnp.concatenate([_upsample2x(out11, up1[...]), out2], axis=0),
                 w6[...], s6[...], b6[...], H=H0, W=W0, dilation=1)
    o_ref[0] = (out12 + out1).astype(o_ref.dtype)           # residual add fused


# ----------------------------------------------------------------------------
# Host-side constant matrices (tiny; built once at trace time)
# ----------------------------------------------------------------------------
def _pool_select(H, W):
    """(H*W, (H//2)*(W//2)) one-hot matrix selecting each 2x2 window's top-left."""
    Ho, Wo = H // 2, W // 2
    S = np.zeros((H * W, Ho * Wo), np.float32)
    for yo in range(Ho):
        for xo in range(Wo):
            S[(2 * yo) * W + 2 * xo, yo * Wo + xo] = 1.0
    return jnp.asarray(S)


def _bilinear_up2_matrix(H, W):
    """(H*W, 4*H*W) bilinear x2 interpolation matrix (align_corners=True)."""
    Ho, Wo = 2 * H, 2 * W

    def axis_coeffs(n_in, n_out):
        if n_in == 1:
            src = np.zeros(n_out, np.float64)
        else:
            src = np.arange(n_out, dtype=np.float64) * (n_in - 1) / (n_out - 1)
        i0 = np.clip(np.floor(src).astype(np.int64), 0, n_in - 1)
        i1 = np.minimum(i0 + 1, n_in - 1)
        w1 = src - i0
        return i0, i1, 1.0 - w1, w1

    ih0, ih1, wh0, wh1 = axis_coeffs(H, Ho)
    iw0, iw1, ww0, ww1 = axis_coeffs(W, Wo)
    U = np.zeros((H * W, Ho * Wo), np.float32)
    for yo in range(Ho):
        for xo in range(Wo):
            q = yo * Wo + xo
            U[ih0[yo] * W + iw0[xo], q] += wh0[yo] * ww0[xo]
            U[ih0[yo] * W + iw1[xo], q] += wh0[yo] * ww1[xo]
            U[ih1[yo] * W + iw0[xo], q] += wh1[yo] * ww0[xo]
            U[ih1[yo] * W + iw1[xo], q] += wh1[yo] * ww1[xo]
    return jnp.asarray(U)


# ----------------------------------------------------------------------------
# Forward wrapper (PyTorch NCHW in / NCHW out)
# ----------------------------------------------------------------------------
def unet_block3_forward(x_nchw, params):
    N, in_c, H, W = x_nchw.shape
    w1, s1, b1 = params["conv1"]
    w2, s2, b2 = params["conv2"]
    w3, s3, b3 = params["conv3"]
    w4, s4, b4 = params["conv4"]
    w5, s5, b5 = params["conv5"]
    w6, s6, b6 = params["conv6"]
    out_c = w6.shape[0]

    x = x_nchw.reshape(N, in_c, H * W)              # NCHW flattened = kernel layout

    sel0 = _pool_select(H, W)                       # 16x16 -> 8x8
    sel1 = _pool_select(H // 2, W // 2)             # 8x8  -> 4x4
    sel2 = _pool_select(H // 4, W // 4)             # 4x4  -> 2x2
    up3 = _bilinear_up2_matrix(H // 8, W // 8)      # 2x2  -> 4x4
    up2 = _bilinear_up2_matrix(H // 4, W // 4)      # 4x4  -> 8x8
    up1 = _bilinear_up2_matrix(H // 2, W // 2)      # 8x8  -> 16x16

    const_args = (w1, s1, b1, w2, s2, b2, w3, s3, b3,
                  w4, s4, b4, w5, s5, b5, w6, s6, b6,
                  sel0, sel1, sel2, up3, up2, up1)

    in_specs = [pl.BlockSpec((1, in_c, H * W), lambda n: (n, 0, 0))]
    in_specs += [pl.BlockSpec(a.shape, lambda n: (0, 0)) for a in const_args]

    out = pl.pallas_call(
        functools.partial(_unet_block3_kernel, H=H, W=W),
        grid=(N,),
        in_specs=in_specs,
        out_specs=pl.BlockSpec((1, out_c, H * W), lambda n: (n, 0, 0)),
        out_shape=jax.ShapeDtypeStruct((N, out_c, H * W), jnp.float32),
        compiler_params=pltpu.CompilerParams(dimension_semantics=("parallel",)),
    )(x, *const_args)
    return out.reshape(N, out_c, H, W)


# ----------------------------------------------------------------------------
# Deterministic parameter construction (Conv2d bias + inference BatchNorm folded)
# ----------------------------------------------------------------------------
def make_conv_block_params(key, cin, cout):
    k1, k2, k3, k4, k5, k6 = jax.random.split(key, 6)
    w = jax.random.normal(k1, (cout, cin, 3, 3), jnp.float32) / np.sqrt(9.0 * cin)
    b = 0.1 * jax.random.normal(k2, (cout,), jnp.float32)
    gamma = 1.0 + 0.1 * jax.random.normal(k3, (cout,), jnp.float32)
    beta = 0.1 * jax.random.normal(k4, (cout,), jnp.float32)
    run_mean = 0.1 * jax.random.normal(k5, (cout,), jnp.float32)
    run_var = jnp.abs(jax.random.normal(k6, (cout,), jnp.float32)) + 0.5
    eps = 1e-5
    s = gamma / jnp.sqrt(run_var + eps)
    # Pack (Cout, Cin, 3, 3) -> (Cout, 9*Cin), (ky, kx) row-major, Cin fastest,
    # matching the in-kernel patch layout.
    w_mat = jnp.transpose(w, (0, 2, 3, 1)).reshape(cout, 9 * cin)
    scale = s.reshape(cout, 1)
    bias = ((b - run_mean) * s + beta).reshape(cout, 1)
    return w_mat, scale, bias


if __name__ == "__main__":
    key = jax.random.PRNGKey(0)
    in_c, mid_c, out_c = 4, 8, 8
    N, H, W = 2, 16, 16

    kx, k1, k2, k3, k4, k5, k6 = jax.random.split(key, 7)
    params = {
        "conv1": make_conv_block_params(k1, in_c, out_c),
        "conv2": make_conv_block_params(k2, out_c, mid_c),
        "conv3": make_conv_block_params(k3, mid_c, mid_c),
        "conv4": make_conv_block_params(k4, mid_c, mid_c),
        "conv5": make_conv_block_params(k5, 2 * mid_c, mid_c),
        "conv6": make_conv_block_params(k6, 2 * mid_c, out_c),
    }

    x_nchw = jax.random.normal(kx, (N, in_c, H, W), jnp.float32)

    fwd = jax.jit(lambda xin: unet_block3_forward(xin, params))
    out = fwd(x_nchw)
    jax.block_until_ready(out)

    assert out.shape == (N, out_c, H, W)
    print("KERNEL_OK")
</pallas_src>

<mosaic_0001>
module attributes {stable_mosaic.version = 11 : i64} {
  func.func @_unet_block3_kernel(%arg0: i32, %arg1: memref<1x4x256xf32, #tpu.memory_space<vmem>>, %arg2: memref<8x36xf32, #tpu.memory_space<vmem>>, %arg3: memref<8x1xf32, #tpu.memory_space<vmem>>, %arg4: memref<8x1xf32, #tpu.memory_space<vmem>>, %arg5: memref<8x72xf32, #tpu.memory_space<vmem>>, %arg6: memref<8x1xf32, #tpu.memory_space<vmem>>, %arg7: memref<8x1xf32, #tpu.memory_space<vmem>>, %arg8: memref<8x72xf32, #tpu.memory_space<vmem>>, %arg9: memref<8x1xf32, #tpu.memory_space<vmem>>, %arg10: memref<8x1xf32, #tpu.memory_space<vmem>>, %arg11: memref<8x72xf32, #tpu.memory_space<vmem>>, %arg12: memref<8x1xf32, #tpu.memory_space<vmem>>, %arg13: memref<8x1xf32, #tpu.memory_space<vmem>>, %arg14: memref<8x144xf32, #tpu.memory_space<vmem>>, %arg15: memref<8x1xf32, #tpu.memory_space<vmem>>, %arg16: memref<8x1xf32, #tpu.memory_space<vmem>>, %arg17: memref<8x144xf32, #tpu.memory_space<vmem>>, %arg18: memref<8x1xf32, #tpu.memory_space<vmem>>, %arg19: memref<8x1xf32, #tpu.memory_space<vmem>>, %arg20: memref<256x64xf32, #tpu.memory_space<vmem>>, %arg21: memref<64x16xf32, #tpu.memory_space<vmem>>, %arg22: memref<16x4xf32, #tpu.memory_space<vmem>>, %arg23: memref<4x16xf32, #tpu.memory_space<vmem>>, %arg24: memref<16x64xf32, #tpu.memory_space<vmem>>, %arg25: memref<64x256xf32, #tpu.memory_space<vmem>>, %arg26: memref<1x8x256xf32, #tpu.memory_space<vmem>>) attributes {dimension_semantics = [#tpu.dimension_semantics<parallel>], iteration_bounds = array<i64: 2>, scalar_prefetch = 0 : i64, scratch_operands = 0 : i64, tpu.core_type = #tpu.core_type<tc>, window_params = [{transform_indices = @transform_0, window_bounds = array<i64: 1, 4, 256>}, {pipeline_mode = #tpu.pipeline_mode<synchronous>, transform_indices = @transform_1, window_bounds = array<i64: 8, 36>}, {pipeline_mode = #tpu.pipeline_mode<synchronous>, transform_indices = @transform_2, window_bounds = array<i64: 8, 1>}, {pipeline_mode = #tpu.pipeline_mode<synchronous>, transform_indices = @transform_3, window_bounds = array<i64: 8, 1>}, {pipeline_mode = #tpu.pipeline_mode<synchronous>, transform_indices = @transform_4, window_bounds = array<i64: 8, 72>}, {pipeline_mode = #tpu.pipeline_mode<synchronous>, transform_indices = @transform_5, window_bounds = array<i64: 8, 1>}, {pipeline_mode = #tpu.pipeline_mode<synchronous>, transform_indices = @transform_6, window_bounds = array<i64: 8, 1>}, {pipeline_mode = #tpu.pipeline_mode<synchronous>, transform_indices = @transform_7, window_bounds = array<i64: 8, 72>}, {pipeline_mode = #tpu.pipeline_mode<synchronous>, transform_indices = @transform_8, window_bounds = array<i64: 8, 1>}, {pipeline_mode = #tpu.pipeline_mode<synchronous>, transform_indices = @transform_9, window_bounds = array<i64: 8, 1>}, {pipeline_mode = #tpu.pipeline_mode<synchronous>, transform_indices = @transform_10, window_bounds = array<i64: 8, 72>}, {pipeline_mode = #tpu.pipeline_mode<synchronous>, transform_indices = @transform_11, window_bounds = array<i64: 8, 1>}, {pipeline_mode = #tpu.pipeline_mode<synchronous>, transform_indices = @transform_12, window_bounds = array<i64: 8, 1>}, {pipeline_mode = #tpu.pipeline_mode<synchronous>, transform_indices = @transform_13, window_bounds = array<i64: 8, 144>}, {pipeline_mode = #tpu.pipeline_mode<synchronous>, transform_indices = @transform_14, window_bounds = array<i64: 8, 1>}, {pipeline_mode = #tpu.pipeline_mode<synchronous>, transform_indices = @transform_15, window_bounds = array<i64: 8, 1>}, {pipeline_mode = #tpu.pipeline_mode<synchronous>, transform_indices = @transform_16, window_bounds = array<i64: 8, 144>}, {pipeline_mode = #tpu.pipeline_mode<synchronous>, transform_indices = @transform_17, window_bounds = array<i64: 8, 1>}, {pipeline_mode = #tpu.pipeline_mode<synchronous>, transform_indices = @transform_18, window_bounds = array<i64: 8, 1>}, {pipeline_mode = #tpu.pipeline_mode<synchronous>, transform_indices = @transform_19, window_bounds = array<i64: 256, 64>}, {pipeline_mode = #tpu.pipeline_mode<synchronous>, transform_indices = @transform_20, window_bounds = array<i64: 64, 16>}, {pipeline_mode = #tpu.pipeline_mode<synchronous>, transform_indices = @transform_21, window_bounds = array<i64: 16, 4>}, {pipeline_mode = #tpu.pipeline_mode<synchronous>, transform_indices = @transform_22, window_bounds = array<i64: 4, 16>}, {pipeline_mode = #tpu.pipeline_mode<synchronous>, transform_indices = @transform_23, window_bounds = array<i64: 16, 64>}, {pipeline_mode = #tpu.pipeline_mode<synchronous>, transform_indices = @transform_24, window_bounds = array<i64: 64, 256>}, {transform_indices = @transform_25, window_bounds = array<i64: 1, 8, 256>}]} {
    %c0 = arith.constant 0 : index
    %c0_0 = arith.constant 0 : index
    %c0_1 = arith.constant 0 : index
    %0 = vector.load %arg1[%c0, %c0_0, %c0_1] : memref<1x4x256xf32, #tpu.memory_space<vmem>>, vector<1x4x256xf32>
    %1 = vector.shape_cast %0 : vector<1x4x256xf32> to vector<4x256xf32>
    %c0_2 = arith.constant 0 : index
    %c0_3 = arith.constant 0 : index
    %2 = vector.load %arg2[%c0_2, %c0_3] : memref<8x36xf32, #tpu.memory_space<vmem>>, vector<8x36xf32>
    %c0_4 = arith.constant 0 : index
    %c0_5 = arith.constant 0 : index
    %3 = vector.load %arg3[%c0_4, %c0_5] : memref<8x1xf32, #tpu.memory_space<vmem>>, vector<8x1xf32>
    %c0_6 = arith.constant 0 : index
    %c0_7 = arith.constant 0 : index
    %4 = vector.load %arg4[%c0_6, %c0_7] : memref<8x1xf32, #tpu.memory_space<vmem>>, vector<8x1xf32>
    %cst = arith.constant 0.000000e+00 : f32
    %5 = vector.broadcast %cst : f32 to vector<4x17xf32>
    %6 = tpu.concatenate %5, %1, %5 in 1 : vector<4x17xf32>, vector<4x256xf32>, vector<4x17xf32> -> vector<4x290xf32>
    %7 = tpu.iota {dimensions = array<i32: 1>} : vector<1x256xi32>
    %c16_i32 = arith.constant 16 : i32
    %c0_i32 = arith.constant 0 : i32
    %8 = arith.cmpi eq, %c16_i32, %c0_i32 : i32
    %c1_i32 = arith.constant 1 : i32
    %9 = arith.select %8, %c1_i32, %c16_i32 : i32
    %10 = vector.broadcast %9 : i32 to vector<1x256xi32>
    %11 = arith.remsi %7, %10 : vector<1x256xi32>
    %c0_i32_8 = arith.constant 0 : i32
    %12 = vector.broadcast %c0_i32_8 : i32 to vector<1x256xi32>
    %13 = arith.cmpi ne, %11, %12 : vector<1x256xi32>
    %c0_i32_9 = arith.constant 0 : i32
    %14 = vector.broadcast %c0_i32_9 : i32 to vector<1x256xi32>
    %15 = arith.cmpi slt, %11, %14 : vector<1x256xi32>
    %c0_i32_10 = arith.constant 0 : i32
    %16 = arith.cmpi slt, %9, %c0_i32_10 : i32
    %17 = vector.broadcast %16 : i1 to vector<1x256xi1>
    %18 = vector.broadcast %17 : vector<1x256xi1> to vector<1x256xi1>
    %19 = arith.xori %15, %18 : vector<1x256xi1>
    %20 = arith.andi %19, %13 : vector<1x256xi1>
    %21 = vector.broadcast %9 : i32 to vector<1x256xi32>
    %22 = arith.addi %11, %21 : vector<1x256xi32>
    %23 = arith.select %20, %22, %11 : vector<1x256xi1>, vector<1x256xi32>
    %c1_i32_11 = arith.constant 1 : i32
    %24 = vector.broadcast %c1_i32_11 : i32 to vector<1x256xi32>
    %25 = arith.cmpi sge, %23, %24 : vector<1x256xi32>
    %26 = arith.extui %25 : vector<1x256xi1> to vector<1x256xi32>
    %27 = arith.sitofp %26 : vector<1x256xi32> to vector<1x256xf32>
    %c15_i32 = arith.constant 15 : i32
    %28 = vector.broadcast %c15_i32 : i32 to vector<1x256xi32>
    %29 = arith.cmpi slt, %23, %28 : vector<1x256xi32>
    %30 = arith.extui %29 : vector<1x256xi1> to vector<1x256xi32>
    %31 = arith.sitofp %30 : vector<1x256xi32> to vector<1x256xf32>
    %32 = vector.extract_strided_slice %6 {offsets = [0, 0], sizes = [4, 256], strides = [1, 1]} : vector<4x290xf32> to vector<4x256xf32>
    %33 = vector.broadcast %27 : vector<1x256xf32> to vector<4x256xf32>
    %34 = arith.mulf %32, %33 : vector<4x256xf32>
    %35 = vector.extract_strided_slice %6 {offsets = [0, 1], sizes = [4, 256], strides = [1, 1]} : vector<4x290xf32> to vector<4x256xf32>
    %36 = vector.extract_strided_slice %6 {offsets = [0, 2], sizes = [4, 256], strides = [1, 1]} : vector<4x290xf32> to vector<4x256xf32>
    %37 = vector.broadcast %31 : vector<1x256xf32> to vector<4x256xf32>
    %38 = arith.mulf %36, %37 : vector<4x256xf32>
    %39 = vector.extract_strided_slice %6 {offsets = [0, 16], sizes = [4, 256], strides = [1, 1]} : vector<4x290xf32> to vector<4x256xf32>
    %40 = vector.broadcast %27 : vector<1x256xf32> to vector<4x256xf32>
    %41 = arith.mulf %39, %40 : vector<4x256xf32>
    %42 = vector.extract_strided_slice %6 {offsets = [0, 17], sizes = [4, 256], strides = [1, 1]} : vector<4x290xf32> to vector<4x256xf32>
    %43 = vector.extract_strided_slice %6 {offsets = [0, 18], sizes = [4, 256], strides = [1, 1]} : vector<4x290xf32> to vector<4x256xf32>
    %44 = vector.broadcast %31 : vector<1x256xf32> to vector<4x256xf32>
    %45 = arith.mulf %43, %44 : vector<4x256xf32>
    %46 = vector.extract_strided_slice %6 {offsets = [0, 32], sizes = [4, 256], strides = [1, 1]} : vector<4x290xf32> to vector<4x256xf32>
    %47 = vector.broadcast %27 : vector<1x256xf32> to vector<4x256xf32>
    %48 = arith.mulf %46, %47 : vector<4x256xf32>
    %49 = vector.extract_strided_slice %6 {offsets = [0, 33], sizes = [4, 256], strides = [1, 1]} : vector<4x290xf32> to vector<4x256xf32>
    %50 = vector.extract_strided_slice %6 {offsets = [0, 34], sizes = [4, 256], strides = [1, 1]} : vector<4x290xf32> to vector<4x256xf32>
    %51 = vector.broadcast %31 : vector<1x256xf32> to vector<4x256xf32>
    %52 = arith.mulf %50, %51 : vector<4x256xf32>
    %53 = tpu.concatenate %34, %35, %38, %41, %42, %45, %48, %49, %52 in 0 : vector<4x256xf32>, vector<4x256xf32>, vector<4x256xf32>, vector<4x256xf32>, vector<4x256xf32>, vector<4x256xf32>, vector<4x256xf32>, vector<4x256xf32>, vector<4x256xf32> -> vector<36x256xf32>
    %cst_12 = arith.constant dense<0.000000e+00> : vector<8x256xf32>
    %54 = tpu.matmul %2, %53, %cst_12 {dimension_numbers = #tpu.dot_dimension_numbers<[1], [0], [0], [1], [0, 0, 1, 1], [], []>} : vector<8x36xf32>, vector<36x256xf32>, vector<8x256xf32> -> vector<8x256xf32>
    %55 = vector.broadcast %3 : vector<8x1xf32> to vector<8x256xf32>
    %56 = arith.mulf %54, %55 : vector<8x256xf32>
    %57 = vector.broadcast %4 : vector<8x1xf32> to vector<8x256xf32>
    %58 = arith.addf %56, %57 : vector<8x256xf32>
    %cst_13 = arith.constant 0.000000e+00 : f32
    %59 = vector.broadcast %cst_13 : f32 to vector<8x256xf32>
    %60 = arith.maximumf %58, %59 : vector<8x256xf32>
    %c0_14 = arith.constant 0 : index
    %c0_15 = arith.constant 0 : index
    %61 = vector.load %arg5[%c0_14, %c0_15] : memref<8x72xf32, #tpu.memory_space<vmem>>, vector<8x72xf32>
    %c0_16 = arith.constant 0 : index
    %c0_17 = arith.constant 0 : index
    %62 = vector.load %arg6[%c0_16, %c0_17] : memref<8x1xf32, #tpu.memory_space<vmem>>, vector<8x1xf32>
    %c0_18 = arith.constant 0 : index
    %c0_19 = arith.constant 0 : index
    %63 = vector.load %arg7[%c0_18, %c0_19] : memref<8x1xf32, #tpu.memory_space<vmem>>, vector<8x1xf32>
    %cst_20 = arith.constant 0.000000e+00 : f32
    %64 = vector.broadcast %cst_20 : f32 to vector<8x17xf32>
    %65 = tpu.concatenate %64, %60, %64 in 1 : vector<8x17xf32>, vector<8x256xf32>, vector<8x17xf32> -> vector<8x290xf32>
    %66 = tpu.iota {dimensions = array<i32: 1>} : vector<1x256xi32>
    %c16_i32_21 = arith.constant 16 : i32
    %c0_i32_22 = arith.constant 0 : i32
    %67 = arith.cmpi eq, %c16_i32_21, %c0_i32_22 : i32
    %c1_i32_23 = arith.constant 1 : i32
    %68 = arith.select %67, %c1_i32_23, %c16_i32_21 : i32
    %69 = vector.broadcast %68 : i32 to vector<1x256xi32>
    %70 = arith.remsi %66, %69 : vector<1x256xi32>
    %c0_i32_24 = arith.constant 0 : i32
    %71 = vector.broadcast %c0_i32_24 : i32 to vector<1x256xi32>
    %72 = arith.cmpi ne, %70, %71 : vector<1x256xi32>
    %c0_i32_25 = arith.constant 0 : i32
    %73 = vector.broadcast %c0_i32_25 : i32 to vector<1x256xi32>
    %74 = arith.cmpi slt, %70, %73 : vector<1x256xi32>
    %c0_i32_26 = arith.constant 0 : i32
    %75 = arith.cmpi slt, %68, %c0_i32_26 : i32
    %76 = vector.broadcast %75 : i1 to vector<1x256xi1>
    %77 = vector.broadcast %76 : vector<1x256xi1> to vector<1x256xi1>
    %78 = arith.xori %74, %77 : vector<1x256xi1>
    %79 = arith.andi %78, %72 : vector<1x256xi1>
    %80 = vector.broadcast %68 : i32 to vector<1x256xi32>
    %81 = arith.addi %70, %80 : vector<1x256xi32>
    %82 = arith.select %79, %81, %70 : vector<1x256xi1>, vector<1x256xi32>
    %c1_i32_27 = arith.constant 1 : i32
    %83 = vector.broadcast %c1_i32_27 : i32 to vector<1x256xi32>
    %84 = arith.cmpi sge, %82, %83 : vector<1x256xi32>
    %85 = arith.extui %84 : vector<1x256xi1> to vector<1x256xi32>
    %86 = arith.sitofp %85 : vector<1x256xi32> to vector<1x256xf32>
    %c15_i32_28 = arith.constant 15 : i32
    %87 = vector.broadcast %c15_i32_28 : i32 to vector<1x256xi32>
    %88 = arith.cmpi slt, %82, %87 : vector<1x256xi32>
    %89 = arith.extui %88 : vector<1x256xi1> to vector<1x256xi32>
    %90 = arith.sitofp %89 : vector<1x256xi32> to vector<1x256xf32>
    %91 = vector.extract_strided_slice %65 {offsets = [0, 0], sizes = [8, 256], strides = [1, 1]} : vector<8x290xf32> to vector<8x256xf32>
    %92 = vector.broadcast %86 : vector<1x256xf32> to vector<8x256xf32>
    %93 = arith.mulf %91, %92 : vector<8x256xf32>
    %94 = vector.extract_strided_slice %65 {offsets = [0, 1], sizes = [8, 256], strides = [1, 1]} : vector<8x290xf32> to vector<8x256xf32>
    %95 = vector.extract_strided_slice %65 {offsets = [0, 2], sizes = [8, 256], strides = [1, 1]} : vector<8x290xf32> to vector<8x256xf32>
    %96 = vector.broadcast %90 : vector<1x256xf32> to vector<8x256xf32>
    %97 = arith.mulf %95, %96 : vector<8x256xf32>
    %98 = vector.extract_strided_slice %65 {offsets = [0, 16], sizes = [8, 256], strides = [1, 1]} : vector<8x290xf32> to vector<8x256xf32>
    %99 = vector.broadcast %86 : vector<1x256xf32> to vector<8x256xf32>
    %100 = arith.mulf %98, %99 : vector<8x256xf32>
    %101 = vector.extract_strided_slice %65 {offsets = [0, 17], sizes = [8, 256], strides = [1, 1]} : vector<8x290xf32> to vector<8x256xf32>
    %102 = vector.extract_strided_slice %65 {offsets = [0, 18], sizes = [8, 256], strides = [1, 1]} : vector<8x290xf32> to vector<8x256xf32>
    %103 = vector.broadcast %90 : vector<1x256xf32> to vector<8x256xf32>
    %104 = arith.mulf %102, %103 : vector<8x256xf32>
    %105 = vector.extract_strided_slice %65 {offsets = [0, 32], sizes = [8, 256], strides = [1, 1]} : vector<8x290xf32> to vector<8x256xf32>
    %106 = vector.broadcast %86 : vector<1x256xf32> to vector<8x256xf32>
    %107 = arith.mulf %105, %106 : vector<8x256xf32>
    %108 = vector.extract_strided_slice %65 {offsets = [0, 33], sizes = [8, 256], strides = [1, 1]} : vector<8x290xf32> to vector<8x256xf32>
    %109 = vector.extract_strided_slice %65 {offsets = [0, 34], sizes = [8, 256], strides = [1, 1]} : vector<8x290xf32> to vector<8x256xf32>
    %110 = vector.broadcast %90 : vector<1x256xf32> to vector<8x256xf32>
    %111 = arith.mulf %109, %110 : vector<8x256xf32>
    %112 = tpu.concatenate %93, %94, %97, %100, %101, %104, %107, %108, %111 in 0 : vector<8x256xf32>, vector<8x256xf32>, vector<8x256xf32>, vector<8x256xf32>, vector<8x256xf32>, vector<8x256xf32>, vector<8x256xf32>, vector<8x256xf32>, vector<8x256xf32> -> vector<72x256xf32>
    %cst_29 = arith.constant dense<0.000000e+00> : vector<8x256xf32>
    %113 = tpu.matmul %61, %112, %cst_29 {dimension_numbers = #tpu.dot_dimension_numbers<[1], [0], [0], [1], [0, 0, 1, 1], [], []>} : vector<8x72xf32>, vector<72x256xf32>, vector<8x256xf32> -> vector<8x256xf32>
    %114 = vector.broadcast %62 : vector<8x1xf32> to vector<8x256xf32>
    %115 = arith.mulf %113, %114 : vector<8x256xf32>
    %116 = vector.broadcast %63 : vector<8x1xf32> to vector<8x256xf32>
    %117 = arith.addf %115, %116 : vector<8x256xf32>
    %cst_30 = arith.constant 0.000000e+00 : f32
    %118 = vector.broadcast %cst_30 : f32 to vector<8x256xf32>
    %119 = arith.maximumf %117, %118 : vector<8x256xf32>
    %c0_31 = arith.constant 0 : index
    %c0_32 = arith.constant 0 : index
    %120 = vector.load %arg20[%c0_31, %c0_32] : memref<256x64xf32, #tpu.memory_space<vmem>>, vector<256x64xf32>
    %cst_33 = arith.constant 0.000000e+00 : f32
    %121 = vector.broadcast %cst_33 : f32 to vector<8x17xf32>
    %122 = tpu.concatenate %119, %121 in 1 : vector<8x256xf32>, vector<8x17xf32> -> vector<8x273xf32>
    %123 = vector.extract_strided_slice %122 {offsets = [0, 0], sizes = [8, 256], strides = [1, 1]} : vector<8x273xf32> to vector<8x256xf32>
    %124 = vector.extract_strided_slice %122 {offsets = [0, 1], sizes = [8, 256], strides = [1, 1]} : vector<8x273xf32> to vector<8x256xf32>
    %125 = arith.maximumf %123, %124 : vector<8x256xf32>
    %126 = vector.extract_strided_slice %122 {offsets = [0, 16], sizes = [8, 256], strides = [1, 1]} : vector<8x273xf32> to vector<8x256xf32>
    %127 = vector.extract_strided_slice %122 {offsets = [0, 17], sizes = [8, 256], strides = [1, 1]} : vector<8x273xf32> to vector<8x256xf32>
    %128 = arith.maximumf %126, %127 : vector<8x256xf32>
    %129 = arith.maximumf %125, %128 : vector<8x256xf32>
    %cst_34 = arith.constant dense<0.000000e+00> : vector<8x64xf32>
    %130 = tpu.matmul %129, %120, %cst_34 {dimension_numbers = #tpu.dot_dimension_numbers<[1], [0], [0], [1], [0, 0, 1, 1], [], []>} : vector<8x256xf32>, vector<256x64xf32>, vector<8x64xf32> -> vector<8x64xf32>
    %c0_35 = arith.constant 0 : index
    %c0_36 = arith.constant 0 : index
    %131 = vector.load %arg8[%c0_35, %c0_36] : memref<8x72xf32, #tpu.memory_space<vmem>>, vector<8x72xf32>
    %c0_37 = arith.constant 0 : index
    %c0_38 = arith.constant 0 : index
    %132 = vector.load %arg9[%c0_37, %c0_38] : memref<8x1xf32, #tpu.memory_space<vmem>>, vector<8x1xf32>
    %c0_39 = arith.constant 0 : index
    %c0_40 = arith.constant 0 : index
    %133 = vector.load %arg10[%c0_39, %c0_40] : memref<8x1xf32, #tpu.memory_space<vmem>>, vector<8x1xf32>
    %cst_41 = arith.constant 0.000000e+00 : f32
    %134 = vector.broadcast %cst_41 : f32 to vector<8x9xf32>
    %135 = tpu.concatenate %134, %130, %134 in 1 : vector<8x9xf32>, vector<8x64xf32>, vector<8x9xf32> -> vector<8x82xf32>
    %136 = tpu.iota {dimensions = array<i32: 1>} : vector<1x64xi32>
    %c8_i32 = arith.constant 8 : i32
    %c0_i32_42 = arith.constant 0 : i32
    %137 = arith.cmpi eq, %c8_i32, %c0_i32_42 : i32
    %c1_i32_43 = arith.constant 1 : i32
    %138 = arith.select %137, %c1_i32_43, %c8_i32 : i32
    %139 = vector.broadcast %138 : i32 to vector<1x64xi32>
    %140 = arith.remsi %136, %139 : vector<1x64xi32>
    %c0_i32_44 = arith.constant 0 : i32
    %141 = vector.broadcast %c0_i32_44 : i32 to vector<1x64xi32>
    %142 = arith.cmpi ne, %140, %141 : vector<1x64xi32>
    %c0_i32_45 = arith.constant 0 : i32
    %143 = vector.broadcast %c0_i32_45 : i32 to vector<1x64xi32>
    %144 = arith.cmpi slt, %140, %143 : vector<1x64xi32>
    %c0_i32_46 = arith.constant 0 : i32
    %145 = arith.cmpi slt, %138, %c0_i32_46 : i32
    %146 = vector.broadcast %145 : i1 to vector<1x64xi1>
    %147 = vector.broadcast %146 : vector<1x64xi1> to vector<1x64xi1>
    %148 = arith.xori %144, %147 : vector<1x64xi1>
    %149 = arith.andi %148, %142 : vector<1x64xi1>
    %150 = vector.broadcast %138 : i32 to vector<1x64xi32>
    %151 = arith.addi %140, %150 : vector<1x64xi32>
    %152 = arith.select %149, %151, %140 : vector<1x64xi1>, vector<1x64xi32>
    %c1_i32_47 = arith.constant 1 : i32
    %153 = vector.broadcast %c1_i32_47 : i32 to vector<1x64xi32>
    %154 = arith.cmpi sge, %152, %153 : vector<1x64xi32>
    %155 = arith.extui %154 : vector<1x64xi1> to vector<1x64xi32>
    %156 = arith.sitofp %155 : vector<1x64xi32> to vector<1x64xf32>
    %c7_i32 = arith.constant 7 : i32
    %157 = vector.broadcast %c7_i32 : i32 to vector<1x64xi32>
    %158 = arith.cmpi slt, %152, %157 : vector<1x64xi32>
    %159 = arith.extui %158 : vector<1x64xi1> to vector<1x64xi32>
    %160 = arith.sitofp %159 : vector<1x64xi32> to vector<1x64xf32>
    %161 = vector.extract_strided_slice %135 {offsets = [0, 0], sizes = [8, 64], strides = [1, 1]} : vector<8x82xf32> to vector<8x64xf32>
    %162 = vector.broadcast %156 : vector<1x64xf32> to vector<8x64xf32>
    %163 = arith.mulf %161, %162 : vector<8x64xf32>
    %164 = vector.extract_strided_slice %135 {offsets = [0, 1], sizes = [8, 64], strides = [1, 1]} : vector<8x82xf32> to vector<8x64xf32>
    %165 = vector.extract_strided_slice %135 {offsets = [0, 2], sizes = [8, 64], strides = [1, 1]} : vector<8x82xf32> to vector<8x64xf32>
    %166 = vector.broadcast %160 : vector<1x64xf32> to vector<8x64xf32>
    %167 = arith.mulf %165, %166 : vector<8x64xf32>
    %168 = vector.extract_strided_slice %135 {offsets = [0, 8], sizes = [8, 64], strides = [1, 1]} : vector<8x82xf32> to vector<8x64xf32>
    %169 = vector.broadcast %156 : vector<1x64xf32> to vector<8x64xf32>
    %170 = arith.mulf %168, %169 : vector<8x64xf32>
    %171 = vector.extract_strided_slice %135 {offsets = [0, 9], sizes = [8, 64], strides = [1, 1]} : vector<8x82xf32> to vector<8x64xf32>
    %172 = vector.extract_strided_slice %135 {offsets = [0, 10], sizes = [8, 64], strides = [1, 1]} : vector<8x82xf32> to vector<8x64xf32>
    %173 = vector.broadcast %160 : vector<1x64xf32> to vector<8x64xf32>
    %174 = arith.mulf %172, %173 : vector<8x64xf32>
    %175 = vector.extract_strided_slice %135 {offsets = [0, 16], sizes = [8, 64], strides = [1, 1]} : vector<8x82xf32> to vector<8x64xf32>
    %176 = vector.broadcast %156 : vector<1x64xf32> to vector<8x64xf32>
    %177 = arith.mulf %175, %176 : vector<8x64xf32>
    %178 = vector.extract_strided_slice %135 {offsets = [0, 17], sizes = [8, 64], strides = [1, 1]} : vector<8x82xf32> to vector<8x64xf32>
    %179 = vector.extract_strided_slice %135 {offsets = [0, 18], sizes = [8, 64], strides = [1, 1]} : vector<8x82xf32> to vector<8x64xf32>
    %180 = vector.broadcast %160 : vector<1x64xf32> to vector<8x64xf32>
    %181 = arith.mulf %179, %180 : vector<8x64xf32>
    %182 = tpu.concatenate %163, %164, %167, %170, %171, %174, %177, %178, %181 in 0 : vector<8x64xf32>, vector<8x64xf32>, vector<8x64xf32>, vector<8x64xf32>, vector<8x64xf32>, vector<8x64xf32>, vector<8x64xf32>, vector<8x64xf32>, vector<8x64xf32> -> vector<72x64xf32>
    %cst_48 = arith.constant dense<0.000000e+00> : vector<8x64xf32>
    %183 = tpu.matmul %131, %182, %cst_48 {dimension_numbers = #tpu.dot_dimension_numbers<[1], [0], [0], [1], [0, 0, 1, 1], [], []>} : vector<8x72xf32>, vector<72x64xf32>, vector<8x64xf32> -> vector<8x64xf32>
    %184 = vector.broadcast %132 : vector<8x1xf32> to vector<8x64xf32>
    %185 = arith.mulf %183, %184 : vector<8x64xf32>
    %186 = vector.broadcast %133 : vector<8x1xf32> to vector<8x64xf32>
    %187 = arith.addf %185, %186 : vector<8x64xf32>
    %cst_49 = arith.constant 0.000000e+00 : f32
    %188 = vector.broadcast %cst_49 : f32 to vector<8x64xf32>
    %189 = arith.maximumf %187, %188 : vector<8x64xf32>
    %c0_50 = arith.constant 0 : index
    %c0_51 = arith.constant 0 : index
    %190 = vector.load %arg21[%c0_50, %c0_51] : memref<64x16xf32, #tpu.memory_space<vmem>>, vector<64x16xf32>
    %cst_52 = arith.constant 0.000000e+00 : f32
    %191 = vector.broadcast %cst_52 : f32 to vector<8x9xf32>
    %192 = tpu.concatenate %189, %191 in 1 : vector<8x64xf32>, vector<8x9xf32> -> vector<8x73xf32>
    %193 = vector.extract_strided_slice %192 {offsets = [0, 0], sizes = [8, 64], strides = [1, 1]} : vector<8x73xf32> to vector<8x64xf32>
    %194 = vector.extract_strided_slice %192 {offsets = [0, 1], sizes = [8, 64], strides = [1, 1]} : vector<8x73xf32> to vector<8x64xf32>
    %195 = arith.maximumf %193, %194 : vector<8x64xf32>
    %196 = vector.extract_strided_slice %192 {offsets = [0, 8], sizes = [8, 64], strides = [1, 1]} : vector<8x73xf32> to vector<8x64xf32>
    %197 = vector.extract_strided_slice %192 {offsets = [0, 9], sizes = [8, 64], strides = [1, 1]} : vector<8x73xf32> to vector<8x64xf32>
    %198 = arith.maximumf %196, %197 : vector<8x64xf32>
    %199 = arith.maximumf %195, %198 : vector<8x64xf32>
    %cst_53 = arith.constant dense<0.000000e+00> : vector<8x16xf32>
    %200 = tpu.matmul %199, %190, %cst_53 {dimension_numbers = #tpu.dot_dimension_numbers<[1], [0], [0], [1], [0, 0, 1, 1], [], []>} : vector<8x64xf32>, vector<64x16xf32>, vector<8x16xf32> -> vector<8x16xf32>
    %c0_54 = arith.constant 0 : index
    %c0_55 = arith.constant 0 : index
    %201 = vector.load %arg8[%c0_54, %c0_55] : memref<8x72xf32, #tpu.memory_space<vmem>>, vector<8x72xf32>
    %c0_56 = arith.constant 0 : index
    %c0_57 = arith.constant 0 : index
    %202 = vector.load %arg9[%c0_56, %c0_57] : memref<8x1xf32, #tpu.memory_space<vmem>>, vector<8x1xf32>
    %c0_58 = arith.constant 0 : index
    %c0_59 = arith.constant 0 : index
    %203 = vector.load %arg10[%c0_58, %c0_59] : memref<8x1xf32, #tpu.memory_space<vmem>>, vector<8x1xf32>
    %cst_60 = arith.constant 0.000000e+00 : f32
    %204 = vector.broadcast %cst_60 : f32 to vector<8x5xf32>
    %205 = tpu.concatenate %204, %200, %204 in 1 : vector<8x5xf32>, vector<8x16xf32>, vector<8x5xf32> -> vector<8x26xf32>
    %206 = tpu.iota {dimensions = array<i32: 1>} : vector<1x16xi32>
    %c4_i32 = arith.constant 4 : i32
    %c0_i32_61 = arith.constant 0 : i32
    %207 = arith.cmpi eq, %c4_i32, %c0_i32_61 : i32
    %c1_i32_62 = arith.constant 1 : i32
    %208 = arith.select %207, %c1_i32_62, %c4_i32 : i32
    %209 = vector.broadcast %208 : i32 to vector<1x16xi32>
    %210 = arith.remsi %206, %209 : vector<1x16xi32>
    %c0_i32_63 = arith.constant 0 : i32
    %211 = vector.broadcast %c0_i32_63 : i32 to vector<1x16xi32>
    %212 = arith.cmpi ne, %210, %211 : vector<1x16xi32>
    %c0_i32_64 = arith.constant 0 : i32
    %213 = vector.broadcast %c0_i32_64 : i32 to vector<1x16xi32>
    %214 = arith.cmpi slt, %210, %213 : vector<1x16xi32>
    %c0_i32_65 = arith.constant 0 : i32
    %215 = arith.cmpi slt, %208, %c0_i32_65 : i32
    %216 = vector.broadcast %215 : i1 to vector<1x16xi1>
    %217 = vector.broadcast %216 : vector<1x16xi1> to vector<1x16xi1>
    %218 = arith.xori %214, %217 : vector<1x16xi1>
    %219 = arith.andi %218, %212 : vector<1x16xi1>
    %220 = vector.broadcast %208 : i32 to vector<1x16xi32>
    %221 = arith.addi %210, %220 : vector<1x16xi32>
    %222 = arith.select %219, %221, %210 : vector<1x16xi1>, vector<1x16xi32>
    %c1_i32_66 = arith.constant 1 : i32
    %223 = vector.broadcast %c1_i32_66 : i32 to vector<1x16xi32>
    %224 = arith.cmpi sge, %222, %223 : vector<1x16xi32>
    %225 = arith.extui %224 : vector<1x16xi1> to vector<1x16xi32>
    %226 = arith.sitofp %225 : vector<1x16xi32> to vector<1x16xf32>
    %c3_i32 = arith.constant 3 : i32
    %227 = vector.broadcast %c3_i32 : i32 to vector<1x16xi32>
    %228 = arith.cmpi slt, %222, %227 : vector<1x16xi32>
    %229 = arith.extui %228 : vector<1x16xi1> to vector<1x16xi32>
    %230 = arith.sitofp %229 : vector<1x16xi32> to vector<1x16xf32>
    %231 = vector.extract_strided_slice %205 {offsets = [0, 0], sizes = [8, 16], strides = [1, 1]} : vector<8x26xf32> to vector<8x16xf32>
    %232 = vector.broadcast %226 : vector<1x16xf32> to vector<8x16xf32>
    %233 = arith.mulf %231, %232 : vector<8x16xf32>
    %234 = vector.extract_strided_slice %205 {offsets = [0, 1], sizes = [8, 16], strides = [1, 1]} : vector<8x26xf32> to vector<8x16xf32>
    %235 = vector.extract_strided_slice %205 {offsets = [0, 2], sizes = [8, 16], strides = [1, 1]} : vector<8x26xf32> to vector<8x16xf32>
    %236 = vector.broadcast %230 : vector<1x16xf32> to vector<8x16xf32>
    %237 = arith.mulf %235, %236 : vector<8x16xf32>
    %238 = vector.extract_strided_slice %205 {offsets = [0, 4], sizes = [8, 16], strides = [1, 1]} : vector<8x26xf32> to vector<8x16xf32>
    %239 = vector.broadcast %226 : vector<1x16xf32> to vector<8x16xf32>
    %240 = arith.mulf %238, %239 : vector<8x16xf32>
    %241 = vector.extract_strided_slice %205 {offsets = [0, 5], sizes = [8, 16], strides = [1, 1]} : vector<8x26xf32> to vector<8x16xf32>
    %242 = vector.extract_strided_slice %205 {offsets = [0, 6], sizes = [8, 16], strides = [1, 1]} : vector<8x26xf32> to vector<8x16xf32>
    %243 = vector.broadcast %230 : vector<1x16xf32> to vector<8x16xf32>
    %244 = arith.mulf %242, %243 : vector<8x16xf32>
    %245 = vector.extract_strided_slice %205 {offsets = [0, 8], sizes = [8, 16], strides = [1, 1]} : vector<8x26xf32> to vector<8x16xf32>
    %246 = vector.broadcast %226 : vector<1x16xf32> to vector<8x16xf32>
    %247 = arith.mulf %245, %246 : vector<8x16xf32>
    %248 = vector.extract_strided_slice %205 {offsets = [0, 9], sizes = [8, 16], strides = [1, 1]} : vector<8x26xf32> to vector<8x16xf32>
    %249 = vector.extract_strided_slice %205 {offsets = [0, 10], sizes = [8, 16], strides = [1, 1]} : vector<8x26xf32> to vector<8x16xf32>
    %250 = vector.broadcast %230 : vector<1x16xf32> to vector<8x16xf32>
    %251 = arith.mulf %249, %250 : vector<8x16xf32>
    %252 = tpu.concatenate %233, %234, %237, %240, %241, %244, %247, %248, %251 in 0 : vector<8x16xf32>, vector<8x16xf32>, vector<8x16xf32>, vector<8x16xf32>, vector<8x16xf32>, vector<8x16xf32>, vector<8x16xf32>, vector<8x16xf32>, vector<8x16xf32> -> vector<72x16xf32>
    %cst_67 = arith.constant dense<0.000000e+00> : vector<8x16xf32>
    %253 = tpu.matmul %201, %252, %cst_67 {dimension_numbers = #tpu.dot_dimension_numbers<[1], [0], [0], [1], [0, 0, 1, 1], [], []>} : vector<8x72xf32>, vector<72x16xf32>, vector<8x16xf32> -> vector<8x16xf32>
    %254 = vector.broadcast %202 : vector<8x1xf32> to vector<8x16xf32>
    %255 = arith.mulf %253, %254 : vector<8x16xf32>
    %256 = vector.broadcast %203 : vector<8x1xf32> to vector<8x16xf32>
    %257 = arith.addf %255, %256 : vector<8x16xf32>
    %cst_68 = arith.constant 0.000000e+00 : f32
    %258 = vector.broadcast %cst_68 : f32 to vector<8x16xf32>
    %259 = arith.maximumf %257, %258 : vector<8x16xf32>
    %c0_69 = arith.constant 0 : index
    %c0_70 = arith.constant 0 : index
    %260 = vector.load %arg22[%c0_69, %c0_70] : memref<16x4xf32, #tpu.memory_space<vmem>>, vector<16x4xf32>
    %cst_71 = arith.constant 0.000000e+00 : f32
    %261 = vector.broadcast %cst_71 : f32 to vector<8x5xf32>
    %262 = tpu.concatenate %259, %261 in 1 : vector<8x16xf32>, vector<8x5xf32> -> vector<8x21xf32>
    %263 = vector.extract_strided_slice %262 {offsets = [0, 0], sizes = [8, 16], strides = [1, 1]} : vector<8x21xf32> to vector<8x16xf32>
    %264 = vector.extract_strided_slice %262 {offsets = [0, 1], sizes = [8, 16], strides = [1, 1]} : vector<8x21xf32> to vector<8x16xf32>
    %265 = arith.maximumf %263, %264 : vector<8x16xf32>
    %266 = vector.extract_strided_slice %262 {offsets = [0, 4], sizes = [8, 16], strides = [1, 1]} : vector<8x21xf32> to vector<8x16xf32>
    %267 = vector.extract_strided_slice %262 {offsets = [0, 5], sizes = [8, 16], strides = [1, 1]} : vector<8x21xf32> to vector<8x16xf32>
    %268 = arith.maximumf %266, %267 : vector<8x16xf32>
    %269 = arith.maximumf %265, %268 : vector<8x16xf32>
    %cst_72 = arith.constant dense<0.000000e+00> : vector<8x4xf32>
    %270 = tpu.matmul %269, %260, %cst_72 {dimension_numbers = #tpu.dot_dimension_numbers<[1], [0], [0], [1], [0, 0, 1, 1], [], []>} : vector<8x16xf32>, vector<16x4xf32>, vector<8x4xf32> -> vector<8x4xf32>
    %c0_73 = arith.constant 0 : index
    %c0_74 = arith.constant 0 : index
    %271 = vector.load %arg8[%c0_73, %c0_74] : memref<8x72xf32, #tpu.memory_space<vmem>>, vector<8x72xf32>
    %c0_75 = arith.constant 0 : index
    %c0_76 = arith.constant 0 : index
    %272 = vector.load %arg9[%c0_75, %c0_76] : memref<8x1xf32, #tpu.memory_space<vmem>>, vector<8x1xf32>
    %c0_77 = arith.constant 0 : index
    %c0_78 = arith.constant 0 : index
    %273 = vector.load %arg10[%c0_77, %c0_78] : memref<8x1xf32, #tpu.memory_space<vmem>>, vector<8x1xf32>
    %cst_79 = arith.constant 0.000000e+00 : f32
    %274 = vector.broadcast %cst_79 : f32 to vector<8x3xf32>
    %275 = tpu.concatenate %274, %270, %274 in 1 : vector<8x3xf32>, vector<8x4xf32>, vector<8x3xf32> -> vector<8x10xf32>
    %276 = tpu.iota {dimensions = array<i32: 1>} : vector<1x4xi32>
    %c2_i32 = arith.constant 2 : i32
    %c0_i32_80 = arith.constant 0 : i32
    %277 = arith.cmpi eq, %c2_i32, %c0_i32_80 : i32
    %c1_i32_81 = arith.constant 1 : i32
    %278 = arith.select %277, %c1_i32_81, %c2_i32 : i32
    %279 = vector.broadcast %278 : i32 to vector<1x4xi32>
    %280 = arith.remsi %276, %279 : vector<1x4xi32>
    %c0_i32_82 = arith.constant 0 : i32
    %281 = vector.broadcast %c0_i32_82 : i32 to vector<1x4xi32>
    %282 = arith.cmpi ne, %280, %281 : vector<1x4xi32>
    %c0_i32_83 = arith.constant 0 : i32
    %283 = vector.broadcast %c0_i32_83 : i32 to vector<1x4xi32>
    %284 = arith.cmpi slt, %280, %283 : vector<1x4xi32>
    %c0_i32_84 = arith.constant 0 : i32
    %285 = arith.cmpi slt, %278, %c0_i32_84 : i32
    %286 = vector.broadcast %285 : i1 to vector<1x4xi1>
    %287 = vector.broadcast %286 : vector<1x4xi1> to vector<1x4xi1>
    %288 = arith.xori %284, %287 : vector<1x4xi1>
    %289 = arith.andi %288, %282 : vector<1x4xi1>
    %290 = vector.broadcast %278 : i32 to vector<1x4xi32>
    %291 = arith.addi %280, %290 : vector<1x4xi32>
    %292 = arith.select %289, %291, %280 : vector<1x4xi1>, vector<1x4xi32>
    %c1_i32_85 = arith.constant 1 : i32
    %293 = vector.broadcast %c1_i32_85 : i32 to vector<1x4xi32>
    %294 = arith.cmpi sge, %292, %293 : vector<1x4xi32>
    %295 = arith.extui %294 : vector<1x4xi1> to vector<1x4xi32>
    %296 = arith.sitofp %295 : vector<1x4xi32> to vector<1x4xf32>
    %c1_i32_86 = arith.constant 1 : i32
    %297 = vector.broadcast %c1_i32_86 : i32 to vector<1x4xi32>
    %298 = arith.cmpi slt, %292, %297 : vector<1x4xi32>
    %299 = arith.extui %298 : vector<1x4xi1> to vector<1x4xi32>
    %300 = arith.sitofp %299 : vector<1x4xi32> to vector<1x4xf32>
    %301 = vector.extract_strided_slice %275 {offsets = [0, 0], sizes = [8, 4], strides = [1, 1]} : vector<8x10xf32> to vector<8x4xf32>
    %302 = vector.broadcast %296 : vector<1x4xf32> to vector<8x4xf32>
    %303 = arith.mulf %301, %302 : vector<8x4xf32>
    %304 = vector.extract_strided_slice %275 {offsets = [0, 1], sizes = [8, 4], strides = [1, 1]} : vector<8x10xf32> to vector<8x4xf32>
    %305 = vector.extract_strided_slice %275 {offsets = [0, 2], sizes = [8, 4], strides = [1, 1]} : vector<8x10xf32> to vector<8x4xf32>
    %306 = vector.broadcast %300 : vector<1x4xf32> to vector<8x4xf32>
    %307 = arith.mulf %305, %306 : vector<8x4xf32>
    %308 = vector.extract_strided_slice %275 {offsets = [0, 2], sizes = [8, 4], strides = [1, 1]} : vector<8x10xf32> to vector<8x4xf32>
    %309 = vector.broadcast %296 : vector<1x4xf32> to vector<8x4xf32>
    %310 = arith.mulf %308, %309 : vector<8x4xf32>
    %311 = vector.extract_strided_slice %275 {offsets = [0, 3], sizes = [8, 4], strides = [1, 1]} : vector<8x10xf32> to vector<8x4xf32>
    %312 = vector.extract_strided_slice %275 {offsets = [0, 4], sizes = [8, 4], strides = [1, 1]} : vector<8x10xf32> to vector<8x4xf32>
    %313 = vector.broadcast %300 : vector<1x4xf32> to vector<8x4xf32>
    %314 = arith.mulf %312, %313 : vector<8x4xf32>
    %315 = vector.extract_strided_slice %275 {offsets = [0, 4], sizes = [8, 4], strides = [1, 1]} : vector<8x10xf32> to vector<8x4xf32>
    %316 = vector.broadcast %296 : vector<1x4xf32> to vector<8x4xf32>
    %317 = arith.mulf %315, %316 : vector<8x4xf32>
    %318 = vector.extract_strided_slice %275 {offsets = [0, 5], sizes = [8, 4], strides = [1, 1]} : vector<8x10xf32> to vector<8x4xf32>
    %319 = vector.extract_strided_slice %275 {offsets = [0, 6], sizes = [8, 4], strides = [1, 1]} : vector<8x10xf32> to vector<8x4xf32>
    %320 = vector.broadcast %300 : vector<1x4xf32> to vector<8x4xf32>
    %321 = arith.mulf %319, %320 : vector<8x4xf32>
    %322 = tpu.concatenate %303, %304, %307, %310, %311, %314, %317, %318, %321 in 0 : vector<8x4xf32>, vector<8x4xf32>, vector<8x4xf32>, vector<8x4xf32>, vector<8x4xf32>, vector<8x4xf32>, vector<8x4xf32>, vector<8x4xf32>, vector<8x4xf32> -> vector<72x4xf32>
    %cst_87 = arith.constant dense<0.000000e+00> : vector<8x4xf32>
    %323 = tpu.matmul %271, %322, %cst_87 {dimension_numbers = #tpu.dot_dimension_numbers<[1], [0], [0], [1], [0, 0, 1, 1], [], []>} : vector<8x72xf32>, vector<72x4xf32>, vector<8x4xf32> -> vector<8x4xf32>
    %324 = vector.broadcast %272 : vector<8x1xf32> to vector<8x4xf32>
    %325 = arith.mulf %323, %324 : vector<8x4xf32>
    %326 = vector.broadcast %273 : vector<8x1xf32> to vector<8x4xf32>
    %327 = arith.addf %325, %326 : vector<8x4xf32>
    %cst_88 = arith.constant 0.000000e+00 : f32
    %328 = vector.broadcast %cst_88 : f32 to vector<8x4xf32>
    %329 = arith.maximumf %327, %328 : vector<8x4xf32>
    %c0_89 = arith.constant 0 : index
    %c0_90 = arith.constant 0 : index
    %330 = vector.load %arg11[%c0_89, %c0_90] : memref<8x72xf32, #tpu.memory_space<vmem>>, vector<8x72xf32>
    %c0_91 = arith.constant 0 : index
    %c0_92 = arith.constant 0 : index
    %331 = vector.load %arg12[%c0_91, %c0_92] : memref<8x1xf32, #tpu.memory_space<vmem>>, vector<8x1xf32>
    %c0_93 = arith.constant 0 : index
    %c0_94 = arith.constant 0 : index
    %332 = vector.load %arg13[%c0_93, %c0_94] : memref<8x1xf32, #tpu.memory_space<vmem>>, vector<8x1xf32>
    %cst_95 = arith.constant 0.000000e+00 : f32
    %333 = vector.broadcast %cst_95 : f32 to vector<8x6xf32>
    %334 = tpu.concatenate %333, %329, %333 in 1 : vector<8x6xf32>, vector<8x4xf32>, vector<8x6xf32> -> vector<8x16xf32>
    %335 = tpu.iota {dimensions = array<i32: 1>} : vector<1x4xi32>
    %c2_i32_96 = arith.constant 2 : i32
    %c0_i32_97 = arith.constant 0 : i32
    %336 = arith.cmpi eq, %c2_i32_96, %c0_i32_97 : i32
    %c1_i32_98 = arith.constant 1 : i32
    %337 = arith.select %336, %c1_i32_98, %c2_i32_96 : i32
    %338 = vector.broadcast %337 : i32 to vector<1x4xi32>
    %339 = arith.remsi %335, %338 : vector<1x4xi32>
    %c0_i32_99 = arith.constant 0 : i32
    %340 = vector.broadcast %c0_i32_99 : i32 to vector<1x4xi32>
    %341 = arith.cmpi ne, %339, %340 : vector<1x4xi32>
    %c0_i32_100 = arith.constant 0 : i32
    %342 = vector.broadcast %c0_i32_100 : i32 to vector<1x4xi32>
    %343 = arith.cmpi slt, %339, %342 : vector<1x4xi32>
    %c0_i32_101 = arith.constant 0 : i32
    %344 = arith.cmpi slt, %337, %c0_i32_101 : i32
    %345 = vector.broadcast %344 : i1 to vector<1x4xi1>
    %346 = vector.broadcast %345 : vector<1x4xi1> to vector<1x4xi1>
    %347 = arith.xori %343, %346 : vector<1x4xi1>
    %348 = arith.andi %347, %341 : vector<1x4xi1>
    %349 = vector.broadcast %337 : i32 to vector<1x4xi32>
    %350 = arith.addi %339, %349 : vector<1x4xi32>
    %351 = arith.select %348, %350, %339 : vector<1x4xi1>, vector<1x4xi32>
    %c2_i32_102 = arith.constant 2 : i32
    %352 = vector.broadcast %c2_i32_102 : i32 to vector<1x4xi32>
    %353 = arith.cmpi sge, %351, %352 : vector<1x4xi32>
    %354 = arith.extui %353 : vector<1x4xi1> to vector<1x4xi32>
    %355 = arith.sitofp %354 : vector<1x4xi32> to vector<1x4xf32>
    %c0_i32_103 = arith.constant 0 : i32
    %356 = vector.broadcast %c0_i32_103 : i32 to vector<1x4xi32>
    %357 = arith.cmpi slt, %351, %356 : vector<1x4xi32>
    %358 = arith.extui %357 : vector<1x4xi1> to vector<1x4xi32>
    %359 = arith.sitofp %358 : vector<1x4xi32> to vector<1x4xf32>
    %360 = vector.extract_strided_slice %334 {offsets = [0, 0], sizes = [8, 4], strides = [1, 1]} : vector<8x16xf32> to vector<8x4xf32>
    %361 = vector.broadcast %355 : vector<1x4xf32> to vector<8x4xf32>
    %362 = arith.mulf %360, %361 : vector<8x4xf32>
    %363 = vector.extract_strided_slice %334 {offsets = [0, 2], sizes = [8, 4], strides = [1, 1]} : vector<8x16xf32> to vector<8x4xf32>
    %364 = vector.extract_strided_slice %334 {offsets = [0, 4], sizes = [8, 4], strides = [1, 1]} : vector<8x16xf32> to vector<8x4xf32>
    %365 = vector.broadcast %359 : vector<1x4xf32> to vector<8x4xf32>
    %366 = arith.mulf %364, %365 : vector<8x4xf32>
    %367 = vector.extract_strided_slice %334 {offsets = [0, 4], sizes = [8, 4], strides = [1, 1]} : vector<8x16xf32> to vector<8x4xf32>
    %368 = vector.broadcast %355 : vector<1x4xf32> to vector<8x4xf32>
    %369 = arith.mulf %367, %368 : vector<8x4xf32>
    %370 = vector.extract_strided_slice %334 {offsets = [0, 6], sizes = [8, 4], strides = [1, 1]} : vector<8x16xf32> to vector<8x4xf32>
    %371 = vector.extract_strided_slice %334 {offsets = [0, 8], sizes = [8, 4], strides = [1, 1]} : vector<8x16xf32> to vector<8x4xf32>
    %372 = vector.broadcast %359 : vector<1x4xf32> to vector<8x4xf32>
    %373 = arith.mulf %371, %372 : vector<8x4xf32>
    %374 = vector.extract_strided_slice %334 {offsets = [0, 8], sizes = [8, 4], strides = [1, 1]} : vector<8x16xf32> to vector<8x4xf32>
    %375 = vector.broadcast %355 : vector<1x4xf32> to vector<8x4xf32>
    %376 = arith.mulf %374, %375 : vector<8x4xf32>
    %377 = vector.extract_strided_slice %334 {offsets = [0, 10], sizes = [8, 4], strides = [1, 1]} : vector<8x16xf32> to vector<8x4xf32>
    %378 = vector.extract_strided_slice %334 {offsets = [0, 12], sizes = [8, 4], strides = [1, 1]} : vector<8x16xf32> to vector<8x4xf32>
    %379 = vector.broadcast %359 : vector<1x4xf32> to vector<8x4xf32>
    %380 = arith.mulf %378, %379 : vector<8x4xf32>
    %381 = tpu.concatenate %362, %363, %366, %369, %370, %373, %376, %377, %380 in 0 : vector<8x4xf32>, vector<8x4xf32>, vector<8x4xf32>, vector<8x4xf32>, vector<8x4xf32>, vector<8x4xf32>, vector<8x4xf32>, vector<8x4xf32>, vector<8x4xf32> -> vector<72x4xf32>
    %cst_104 = arith.constant dense<0.000000e+00> : vector<8x4xf32>
    %382 = tpu.matmul %330, %381, %cst_104 {dimension_numbers = #tpu.dot_dimension_numbers<[1], [0], [0], [1], [0, 0, 1, 1], [], []>} : vector<8x72xf32>, vector<72x4xf32>, vector<8x4xf32> -> vector<8x4xf32>
    %383 = vector.broadcast %331 : vector<8x1xf32> to vector<8x4xf32>
    %384 = arith.mulf %382, %383 : vector<8x4xf32>
    %385 = vector.broadcast %332 : vector<8x1xf32> to vector<8x4xf32>
    %386 = arith.addf %384, %385 : vector<8x4xf32>
    %cst_105 = arith.constant 0.000000e+00 : f32
    %387 = vector.broadcast %cst_105 : f32 to vector<8x4xf32>
    %388 = arith.maximumf %386, %387 : vector<8x4xf32>
    %389 = tpu.concatenate %329, %388 in 0 : vector<8x4xf32>, vector<8x4xf32> -> vector<16x4xf32>
    %c0_106 = arith.constant 0 : index
    %c0_107 = arith.constant 0 : index
    %390 = vector.load %arg14[%c0_106, %c0_107] : memref<8x144xf32, #tpu.memory_space<vmem>>, vector<8x144xf32>
    %c0_108 = arith.constant 0 : index
    %c0_109 = arith.constant 0 : index
    %391 = vector.load %arg15[%c0_108, %c0_109] : memref<8x1xf32, #tpu.memory_space<vmem>>, vector<8x1xf32>
    %c0_110 = arith.constant 0 : index
    %c0_111 = arith.constant 0 : index
    %392 = vector.load %arg16[%c0_110, %c0_111] : memref<8x1xf32, #tpu.memory_space<vmem>>, vector<8x1xf32>
    %cst_112 = arith.constant 0.000000e+00 : f32
    %393 = vector.broadcast %cst_112 : f32 to vector<16x3xf32>
    %394 = tpu.concatenate %393, %389, %393 in 1 : vector<16x3xf32>, vector<16x4xf32>, vector<16x3xf32> -> vector<16x10xf32>
    %395 = tpu.iota {dimensions = array<i32: 1>} : vector<1x4xi32>
    %c2_i32_113 = arith.constant 2 : i32
    %c0_i32_114 = arith.constant 0 : i32
    %396 = arith.cmpi eq, %c2_i32_113, %c0_i32_114 : i32
    %c1_i32_115 = arith.constant 1 : i32
    %397 = arith.select %396, %c1_i32_115, %c2_i32_113 : i32
    %398 = vector.broadcast %397 : i32 to vector<1x4xi32>
    %399 = arith.remsi %395, %398 : vector<1x4xi32>
    %c0_i32_116 = arith.constant 0 : i32
    %400 = vector.broadcast %c0_i32_116 : i32 to vector<1x4xi32>
    %401 = arith.cmpi ne, %399, %400 : vector<1x4xi32>
    %c0_i32_117 = arith.constant 0 : i32
    %402 = vector.broadcast %c0_i32_117 : i32 to vector<1x4xi32>
    %403 = arith.cmpi slt, %399, %402 : vector<1x4xi32>
    %c0_i32_118 = arith.constant 0 : i32
    %404 = arith.cmpi slt, %397, %c0_i32_118 : i32
    %405 = vector.broadcast %404 : i1 to vector<1x4xi1>
    %406 = vector.broadcast %405 : vector<1x4xi1> to vector<1x4xi1>
    %407 = arith.xori %403, %406 : vector<1x4xi1>
    %408 = arith.andi %407, %401 : vector<1x4xi1>
    %409 = vector.broadcast %397 : i32 to vector<1x4xi32>
    %410 = arith.addi %399, %409 : vector<1x4xi32>
    %411 = arith.select %408, %410, %399 : vector<1x4xi1>, vector<1x4xi32>
    %c1_i32_119 = arith.constant 1 : i32
    %412 = vector.broadcast %c1_i32_119 : i32 to vector<1x4xi32>
    %413 = arith.cmpi sge, %411, %412 : vector<1x4xi32>
    %414 = arith.extui %413 : vector<1x4xi1> to vector<1x4xi32>
    %415 = arith.sitofp %414 : vector<1x4xi32> to vector<1x4xf32>
    %c1_i32_120 = arith.constant 1 : i32
    %416 = vector.broadcast %c1_i32_120 : i32 to vector<1x4xi32>
    %417 = arith.cmpi slt, %411, %416 : vector<1x4xi32>
    %418 = arith.extui %417 : vector<1x4xi1> to vector<1x4xi32>
    %419 = arith.sitofp %418 : vector<1x4xi32> to vector<1x4xf32>
    %420 = vector.extract_strided_slice %394 {offsets = [0, 0], sizes = [16, 4], strides = [1, 1]} : vector<16x10xf32> to vector<16x4xf32>
    %421 = vector.broadcast %415 : vector<1x4xf32> to vector<16x4xf32>
    %422 = arith.mulf %420, %421 : vector<16x4xf32>
    %423 = vector.extract_strided_slice %394 {offsets = [0, 1], sizes = [16, 4], strides = [1, 1]} : vector<16x10xf32> to vector<16x4xf32>
    %424 = vector.extract_strided_slice %394 {offsets = [0, 2], sizes = [16, 4], strides = [1, 1]} : vector<16x10xf32> to vector<16x4xf32>
    %425 = vector.broadcast %419 : vector<1x4xf32> to vector<16x4xf32>
    %426 = arith.mulf %424, %425 : vector<16x4xf32>
    %427 = vector.extract_strided_slice %394 {offsets = [0, 2], sizes = [16, 4], strides = [1, 1]} : vector<16x10xf32> to vector<16x4xf32>
    %428 = vector.broadcast %415 : vector<1x4xf32> to vector<16x4xf32>
    %429 = arith.mulf %427, %428 : vector<16x4xf32>
    %430 = vector.extract_strided_slice %394 {offsets = [0, 3], sizes = [16, 4], strides = [1, 1]} : vector<16x10xf32> to vector<16x4xf32>
    %431 = vector.extract_strided_slice %394 {offsets = [0, 4], sizes = [16, 4], strides = [1, 1]} : vector<16x10xf32> to vector<16x4xf32>
    %432 = vector.broadcast %419 : vector<1x4xf32> to vector<16x4xf32>
    %433 = arith.mulf %431, %432 : vector<16x4xf32>
    %434 = vector.extract_strided_slice %394 {offsets = [0, 4], sizes = [16, 4], strides = [1, 1]} : vector<16x10xf32> to vector<16x4xf32>
    %435 = vector.broadcast %415 : vector<1x4xf32> to vector<16x4xf32>
    %436 = arith.mulf %434, %435 : vector<16x4xf32>
    %437 = vector.extract_strided_slice %394 {offsets = [0, 5], sizes = [16, 4], strides = [1, 1]} : vector<16x10xf32> to vector<16x4xf32>
    %438 = vector.extract_strided_slice %394 {offsets = [0, 6], sizes = [16, 4], strides = [1, 1]} : vector<16x10xf32> to vector<16x4xf32>
    %439 = vector.broadcast %419 : vector<1x4xf32> to vector<16x4xf32>
    %440 = arith.mulf %438, %439 : vector<16x4xf32>
    %441 = tpu.concatenate %422, %423, %426, %429, %430, %433, %436, %437, %440 in 0 : vector<16x4xf32>, vector<16x4xf32>, vector<16x4xf32>, vector<16x4xf32>, vector<16x4xf32>, vector<16x4xf32>, vector<16x4xf32>, vector<16x4xf32>, vector<16x4xf32> -> vector<144x4xf32>
    %cst_121 = arith.constant dense<0.000000e+00> : vector<8x4xf32>
    %442 = tpu.matmul %390, %441, %cst_121 {dimension_numbers = #tpu.dot_dimension_numbers<[1], [0], [0], [1], [0, 0, 1, 1], [], []>} : vector<8x144xf32>, vector<144x4xf32>, vector<8x4xf32> -> vector<8x4xf32>
    %443 = vector.broadcast %391 : vector<8x1xf32> to vector<8x4xf32>
    %444 = arith.mulf %442, %443 : vector<8x4xf32>
    %445 = vector.broadcast %392 : vector<8x1xf32> to vector<8x4xf32>
    %446 = arith.addf %444, %445 : vector<8x4xf32>
    %cst_122 = arith.constant 0.000000e+00 : f32
    %447 = vector.broadcast %cst_122 : f32 to vector<8x4xf32>
    %448 = arith.maximumf %446, %447 : vector<8x4xf32>
    %c0_123 = arith.constant 0 : index
    %c0_124 = arith.constant 0 : index
    %449 = vector.load %arg23[%c0_123, %c0_124] : memref<4x16xf32, #tpu.memory_space<vmem>>, vector<4x16xf32>
    %cst_125 = arith.constant dense<0.000000e+00> : vector<8x16xf32>
    %450 = tpu.matmul %448, %449, %cst_125 {dimension_numbers = #tpu.dot_dimension_numbers<[1], [0], [0], [1], [0, 0, 1, 1], [], []>} : vector<8x4xf32>, vector<4x16xf32>, vector<8x16xf32> -> vector<8x16xf32>
    %451 = tpu.concatenate %450, %259 in 0 : vector<8x16xf32>, vector<8x16xf32> -> vector<16x16xf32>
    %c0_126 = arith.constant 0 : index
    %c0_127 = arith.constant 0 : index
    %452 = vector.load %arg14[%c0_126, %c0_127] : memref<8x144xf32, #tpu.memory_space<vmem>>, vector<8x144xf32>
    %c0_128 = arith.constant 0 : index
    %c0_129 = arith.constant 0 : index
    %453 = vector.load %arg15[%c0_128, %c0_129] : memref<8x1xf32, #tpu.memory_space<vmem>>, vector<8x1xf32>
    %c0_130 = arith.constant 0 : index
    %c0_131 = arith.constant 0 : index
    %454 = vector.load %arg16[%c0_130, %c0_131] : memref<8x1xf32, #tpu.memory_space<vmem>>, vector<8x1xf32>
    %cst_132 = arith.constant 0.000000e+00 : f32
    %455 = vector.broadcast %cst_132 : f32 to vector<16x5xf32>
    %456 = tpu.concatenate %455, %451, %455 in 1 : vector<16x5xf32>, vector<16x16xf32>, vector<16x5xf32> -> vector<16x26xf32>
    %457 = tpu.iota {dimensions = array<i32: 1>} : vector<1x16xi32>
    %c4_i32_133 = arith.constant 4 : i32
    %c0_i32_134 = arith.constant 0 : i32
    %458 = arith.cmpi eq, %c4_i32_133, %c0_i32_134 : i32
    %c1_i32_135 = arith.constant 1 : i32
    %459 = arith.select %458, %c1_i32_135, %c4_i32_133 : i32
    %460 = vector.broadcast %459 : i32 to vector<1x16xi32>
    %461 = arith.remsi %457, %460 : vector<1x16xi32>
    %c0_i32_136 = arith.constant 0 : i32
    %462 = vector.broadcast %c0_i32_136 : i32 to vector<1x16xi32>
    %463 = arith.cmpi ne, %461, %462 : vector<1x16xi32>
    %c0_i32_137 = arith.constant 0 : i32
    %464 = vector.broadcast %c0_i32_137 : i32 to vector<1x16xi32>
    %465 = arith.cmpi slt, %461, %464 : vector<1x16xi32>
    %c0_i32_138 = arith.constant 0 : i32
    %466 = arith.cmpi slt, %459, %c0_i32_138 : i32
    %467 = vector.broadcast %466 : i1 to vector<1x16xi1>
    %468 = vector.broadcast %467 : vector<1x16xi1> to vector<1x16xi1>
    %469 = arith.xori %465, %468 : vector<1x16xi1>
    %470 = arith.andi %469, %463 : vector<1x16xi1>
    %471 = vector.broadcast %459 : i32 to vector<1x16xi32>
    %472 = arith.addi %461, %471 : vector<1x16xi32>
    %473 = arith.select %470, %472, %461 : vector<1x16xi1>, vector<1x16xi32>
    %c1_i32_139 = arith.constant 1 : i32
    %474 = vector.broadcast %c1_i32_139 : i32 to vector<1x16xi32>
    %475 = arith.cmpi sge, %473, %474 : vector<1x16xi32>
    %476 = arith.extui %475 : vector<1x16xi1> to vector<1x16xi32>
    %477 = arith.sitofp %476 : vector<1x16xi32> to vector<1x16xf32>
    %c3_i32_140 = arith.constant 3 : i32
    %478 = vector.broadcast %c3_i32_140 : i32 to vector<1x16xi32>
    %479 = arith.cmpi slt, %473, %478 : vector<1x16xi32>
    %480 = arith.extui %479 : vector<1x16xi1> to vector<1x16xi32>
    %481 = arith.sitofp %480 : vector<1x16xi32> to vector<1x16xf32>
    %482 = vector.extract_strided_slice %456 {offsets = [0, 0], sizes = [16, 16], strides = [1, 1]} : vector<16x26xf32> to vector<16x16xf32>
    %483 = vector.broadcast %477 : vector<1x16xf32> to vector<16x16xf32>
    %484 = arith.mulf %482, %483 : vector<16x16xf32>
    %485 = vector.extract_strided_slice %456 {offsets = [0, 1], sizes = [16, 16], strides = [1, 1]} : vector<16x26xf32> to vector<16x16xf32>
    %486 = vector.extract_strided_slice %456 {offsets = [0, 2], sizes = [16, 16], strides = [1, 1]} : vector<16x26xf32> to vector<16x16xf32>
    %487 = vector.broadcast %481 : vector<1x16xf32> to vector<16x16xf32>
    %488 = arith.mulf %486, %487 : vector<16x16xf32>
    %489 = vector.extract_strided_slice %456 {offsets = [0, 4], sizes = [16, 16], strides = [1, 1]} : vector<16x26xf32> to vector<16x16xf32>
    %490 = vector.broadcast %477 : vector<1x16xf32> to vector<16x16xf32>
    %491 = arith.mulf %489, %490 : vector<16x16xf32>
    %492 = vector.extract_strided_slice %456 {offsets = [0, 5], sizes = [16, 16], strides = [1, 1]} : vector<16x26xf32> to vector<16x16xf32>
    %493 = vector.extract_strided_slice %456 {offsets = [0, 6], sizes = [16, 16], strides = [1, 1]} : vector<16x26xf32> to vector<16x16xf32>
    %494 = vector.broadcast %481 : vector<1x16xf32> to vector<16x16xf32>
    %495 = arith.mulf %493, %494 : vector<16x16xf32>
    %496 = vector.extract_strided_slice %456 {offsets = [0, 8], sizes = [16, 16], strides = [1, 1]} : vector<16x26xf32> to vector<16x16xf32>
    %497 = vector.broadcast %477 : vector<1x16xf32> to vector<16x16xf32>
    %498 = arith.mulf %496, %497 : vector<16x16xf32>
    %499 = vector.extract_strided_slice %456 {offsets = [0, 9], sizes = [16, 16], strides = [1, 1]} : vector<16x26xf32> to vector<16x16xf32>
    %500 = vector.extract_strided_slice %456 {offsets = [0, 10], sizes = [16, 16], strides = [1, 1]} : vector<16x26xf32> to vector<16x16xf32>
    %501 = vector.broadcast %481 : vector<1x16xf32> to vector<16x16xf32>
    %502 = arith.mulf %500, %501 : vector<16x16xf32>
    %503 = tpu.concatenate %484, %485, %488, %491, %492, %495, %498, %499, %502 in 0 : vector<16x16xf32>, vector<16x16xf32>, vector<16x16xf32>, vector<16x16xf32>, vector<16x16xf32>, vector<16x16xf32>, vector<16x16xf32>, vector<16x16xf32>, vector<16x16xf32> -> vector<144x16xf32>
    %cst_141 = arith.constant dense<0.000000e+00> : vector<8x16xf32>
    %504 = tpu.matmul %452, %503, %cst_141 {dimension_numbers = #tpu.dot_dimension_numbers<[1], [0], [0], [1], [0, 0, 1, 1], [], []>} : vector<8x144xf32>, vector<144x16xf32>, vector<8x16xf32> -> vector<8x16xf32>
    %505 = vector.broadcast %453 : vector<8x1xf32> to vector<8x16xf32>
    %506 = arith.mulf %504, %505 : vector<8x16xf32>
    %507 = vector.broadcast %454 : vector<8x1xf32> to vector<8x16xf32>
    %508 = arith.addf %506, %507 : vector<8x16xf32>
    %cst_142 = arith.constant 0.000000e+00 : f32
    %509 = vector.broadcast %cst_142 : f32 to vector<8x16xf32>
    %510 = arith.maximumf %508, %509 : vector<8x16xf32>
    %c0_143 = arith.constant 0 : index
    %c0_144 = arith.constant 0 : index
    %511 = vector.load %arg24[%c0_143, %c0_144] : memref<16x64xf32, #tpu.memory_space<vmem>>, vector<16x64xf32>
    %cst_145 = arith.constant dense<0.000000e+00> : vector<8x64xf32>
    %512 = tpu.matmul %510, %511, %cst_145 {dimension_numbers = #tpu.dot_dimension_numbers<[1], [0], [0], [1], [0, 0, 1, 1], [], []>} : vector<8x16xf32>, vector<16x64xf32>, vector<8x64xf32> -> vector<8x64xf32>
    %513 = tpu.concatenate %512, %189 in 0 : vector<8x64xf32>, vector<8x64xf32> -> vector<16x64xf32>
    %c0_146 = arith.constant 0 : index
    %c0_147 = arith.constant 0 : index
    %514 = vector.load %arg14[%c0_146, %c0_147] : memref<8x144xf32, #tpu.memory_space<vmem>>, vector<8x144xf32>
    %c0_148 = arith.constant 0 : index
    %c0_149 = arith.constant 0 : index
    %515 = vector.load %arg15[%c0_148, %c0_149] : memref<8x1xf32, #tpu.memory_space<vmem>>, vector<8x1xf32>
    %c0_150 = arith.constant 0 : index
    %c0_151 = arith.constant 0 : index
    %516 = vector.load %arg16[%c0_150, %c0_151] : memref<8x1xf32, #tpu.memory_space<vmem>>, vector<8x1xf32>
    %cst_152 = arith.constant 0.000000e+00 : f32
    %517 = vector.broadcast %cst_152 : f32 to vector<16x9xf32>
    %518 = tpu.concatenate %517, %513, %517 in 1 : vector<16x9xf32>, vector<16x64xf32>, vector<16x9xf32> -> vector<16x82xf32>
    %519 = tpu.iota {dimensions = array<i32: 1>} : vector<1x64xi32>
    %c8_i32_153 = arith.constant 8 : i32
    %c0_i32_154 = arith.constant 0 : i32
    %520 = arith.cmpi eq, %c8_i32_153, %c0_i32_154 : i32
    %c1_i32_155 = arith.constant 1 : i32
    %521 = arith.select %520, %c1_i32_155, %c8_i32_153 : i32
    %522 = vector.broadcast %521 : i32 to vector<1x64xi32>
    %523 = arith.remsi %519, %522 : vector<1x64xi32>
    %c0_i32_156 = arith.constant 0 : i32
    %524 = vector.broadcast %c0_i32_156 : i32 to vector<1x64xi32>
    %525 = arith.cmpi ne, %523, %524 : vector<1x64xi32>
    %c0_i32_157 = arith.constant 0 : i32
    %526 = vector.broadcast %c0_i32_157 : i32 to vector<1x64xi32>
    %527 = arith.cmpi slt, %523, %526 : vector<1x64xi32>
    %c0_i32_158 = arith.constant 0 : i32
    %528 = arith.cmpi slt, %521, %c0_i32_158 : i32
    %529 = vector.broadcast %528 : i1 to vector<1x64xi1>
    %530 = vector.broadcast %529 : vector<1x64xi1> to vector<1x64xi1>
    %531 = arith.xori %527, %530 : vector<1x64xi1>
    %532 = arith.andi %531, %525 : vector<1x64xi1>
    %533 = vector.broadcast %521 : i32 to vector<1x64xi32>
    %534 = arith.addi %523, %533 : vector<1x64xi32>
    %535 = arith.select %532, %534, %523 : vector<1x64xi1>, vector<1x64xi32>
    %c1_i32_159 = arith.constant 1 : i32
    %536 = vector.broadcast %c1_i32_159 : i32 to vector<1x64xi32>
    %537 = arith.cmpi sge, %535, %536 : vector<1x64xi32>
    %538 = arith.extui %537 : vector<1x64xi1> to vector<1x64xi32>
    %539 = arith.sitofp %538 : vector<1x64xi32> to vector<1x64xf32>
    %c7_i32_160 = arith.constant 7 : i32
    %540 = vector.broadcast %c7_i32_160 : i32 to vector<1x64xi32>
    %541 = arith.cmpi slt, %535, %540 : vector<1x64xi32>
    %542 = arith.extui %541 : vector<1x64xi1> to vector<1x64xi32>
    %543 = arith.sitofp %542 : vector<1x64xi32> to vector<1x64xf32>
    %544 = vector.extract_strided_slice %518 {offsets = [0, 0], sizes = [16, 64], strides = [1, 1]} : vector<16x82xf32> to vector<16x64xf32>
    %545 = vector.broadcast %539 : vector<1x64xf32> to vector<16x64xf32>
    %546 = arith.mulf %544, %545 : vector<16x64xf32>
    %547 = vector.extract_strided_slice %518 {offsets = [0, 1], sizes = [16, 64], strides = [1, 1]} : vector<16x82xf32> to vector<16x64xf32>
    %548 = vector.extract_strided_slice %518 {offsets = [0, 2], sizes = [16, 64], strides = [1, 1]} : vector<16x82xf32> to vector<16x64xf32>
    %549 = vector.broadcast %543 : vector<1x64xf32> to vector<16x64xf32>
    %550 = arith.mulf %548, %549 : vector<16x64xf32>
    %551 = vector.extract_strided_slice %518 {offsets = [0, 8], sizes = [16, 64], strides = [1, 1]} : vector<16x82xf32> to vector<16x64xf32>
    %552 = vector.broadcast %539 : vector<1x64xf32> to vector<16x64xf32>
    %553 = arith.mulf %551, %552 : vector<16x64xf32>
    %554 = vector.extract_strided_slice %518 {offsets = [0, 9], sizes = [16, 64], strides = [1, 1]} : vector<16x82xf32> to vector<16x64xf32>
    %555 = vector.extract_strided_slice %518 {offsets = [0, 10], sizes = [16, 64], strides = [1, 1]} : vector<16x82xf32> to vector<16x64xf32>
    %556 = vector.broadcast %543 : vector<1x64xf32> to vector<16x64xf32>
    %557 = arith.mulf %555, %556 : vector<16x64xf32>
    %558 = vector.extract_strided_slice %518 {offsets = [0, 16], sizes = [16, 64], strides = [1, 1]} : vector<16x82xf32> to vector<16x64xf32>
    %559 = vector.broadcast %539 : vector<1x64xf32> to vector<16x64xf32>
    %560 = arith.mulf %558, %559 : vector<16x64xf32>
    %561 = vector.extract_strided_slice %518 {offsets = [0, 17], sizes = [16, 64], strides = [1, 1]} : vector<16x82xf32> to vector<16x64xf32>
    %562 = vector.extract_strided_slice %518 {offsets = [0, 18], sizes = [16, 64], strides = [1, 1]} : vector<16x82xf32> to vector<16x64xf32>
    %563 = vector.broadcast %543 : vector<1x64xf32> to vector<16x64xf32>
    %564 = arith.mulf %562, %563 : vector<16x64xf32>
    %565 = tpu.concatenate %546, %547, %550, %553, %554, %557, %560, %561, %564 in 0 : vector<16x64xf32>, vector<16x64xf32>, vector<16x64xf32>, vector<16x64xf32>, vector<16x64xf32>, vector<16x64xf32>, vector<16x64xf32>, vector<16x64xf32>, vector<16x64xf32> -> vector<144x64xf32>
    %cst_161 = arith.constant dense<0.000000e+00> : vector<8x64xf32>
    %566 = tpu.matmul %514, %565, %cst_161 {dimension_numbers = #tpu.dot_dimension_numbers<[1], [0], [0], [1], [0, 0, 1, 1], [], []>} : vector<8x144xf32>, vector<144x64xf32>, vector<8x64xf32> -> vector<8x64xf32>
    %567 = vector.broadcast %515 : vector<8x1xf32> to vector<8x64xf32>
    %568 = arith.mulf %566, %567 : vector<8x64xf32>
    %569 = vector.broadcast %516 : vector<8x1xf32> to vector<8x64xf32>
    %570 = arith.addf %568, %569 : vector<8x64xf32>
    %cst_162 = arith.constant 0.000000e+00 : f32
    %571 = vector.broadcast %cst_162 : f32 to vector<8x64xf32>
    %572 = arith.maximumf %570, %571 : vector<8x64xf32>
    %c0_163 = arith.constant 0 : index
    %c0_164 = arith.constant 0 : index
    %573 = vector.load %arg25[%c0_163, %c0_164] : memref<64x256xf32, #tpu.memory_space<vmem>>, vector<64x256xf32>
    %cst_165 = arith.constant dense<0.000000e+00> : vector<8x256xf32>
    %574 = tpu.matmul %572, %573, %cst_165 {dimension_numbers = #tpu.dot_dimension_numbers<[1], [0], [0], [1], [0, 0, 1, 1], [], []>} : vector<8x64xf32>, vector<64x256xf32>, vector<8x256xf32> -> vector<8x256xf32>
    %575 = tpu.concatenate %574, %119 in 0 : vector<8x256xf32>, vector<8x256xf32> -> vector<16x256xf32>
    %c0_166 = arith.constant 0 : index
    %c0_167 = arith.constant 0 : index
    %576 = vector.load %arg17[%c0_166, %c0_167] : memref<8x144xf32, #tpu.memory_space<vmem>>, vector<8x144xf32>
    %c0_168 = arith.constant 0 : index
    %c0_169 = arith.constant 0 : index
    %577 = vector.load %arg18[%c0_168, %c0_169] : memref<8x1xf32, #tpu.memory_space<vmem>>, vector<8x1xf32>
    %c0_170 = arith.constant 0 : index
    %c0_171 = arith.constant 0 : index
    %578 = vector.load %arg19[%c0_170, %c0_171] : memref<8x1xf32, #tpu.memory_space<vmem>>, vector<8x1xf32>
    %cst_172 = arith.constant 0.000000e+00 : f32
    %579 = vector.broadcast %cst_172 : f32 to vector<16x17xf32>
    %580 = tpu.concatenate %579, %575, %579 in 1 : vector<16x17xf32>, vector<16x256xf32>, vector<16x17xf32> -> vector<16x290xf32>
    %581 = tpu.iota {dimensions = array<i32: 1>} : vector<1x256xi32>
    %c16_i32_173 = arith.constant 16 : i32
    %c0_i32_174 = arith.constant 0 : i32
    %582 = arith.cmpi eq, %c16_i32_173, %c0_i32_174 : i32
    %c1_i32_175 = arith.constant 1 : i32
    %583 = arith.select %582, %c1_i32_175, %c16_i32_173 : i32
    %584 = vector.broadcast %583 : i32 to vector<1x256xi32>
    %585 = arith.remsi %581, %584 : vector<1x256xi32>
    %c0_i32_176 = arith.constant 0 : i32
    %586 = vector.broadcast %c0_i32_176 : i32 to vector<1x256xi32>
    %587 = arith.cmpi ne, %585, %586 : vector<1x256xi32>
    %c0_i32_177 = arith.constant 0 : i32
    %588 = vector.broadcast %c0_i32_177 : i32 to vector<1x256xi32>
    %589 = arith.cmpi slt, %585, %588 : vector<1x256xi32>
    %c0_i32_178 = arith.constant 0 : i32
    %590 = arith.cmpi slt, %583, %c0_i32_178 : i32
    %591 = vector.broadcast %590 : i1 to vector<1x256xi1>
    %592 = vector.broadcast %591 : vector<1x256xi1> to vector<1x256xi1>
    %593 = arith.xori %589, %592 : vector<1x256xi1>
    %594 = arith.andi %593, %587 : vector<1x256xi1>
    %595 = vector.broadcast %583 : i32 to vector<1x256xi32>
    %596 = arith.addi %585, %595 : vector<1x256xi32>
    %597 = arith.select %594, %596, %585 : vector<1x256xi1>, vector<1x256xi32>
    %c1_i32_179 = arith.constant 1 : i32
    %598 = vector.broadcast %c1_i32_179 : i32 to vector<1x256xi32>
    %599 = arith.cmpi sge, %597, %598 : vector<1x256xi32>
    %600 = arith.extui %599 : vector<1x256xi1> to vector<1x256xi32>
    %601 = arith.sitofp %600 : vector<1x256xi32> to vector<1x256xf32>
    %c15_i32_180 = arith.constant 15 : i32
    %602 = vector.broadcast %c15_i32_180 : i32 to vector<1x256xi32>
    %603 = arith.cmpi slt, %597, %602 : vector<1x256xi32>
    %604 = arith.extui %603 : vector<1x256xi1> to vector<1x256xi32>
    %605 = arith.sitofp %604 : vector<1x256xi32> to vector<1x256xf32>
    %606 = vector.extract_strided_slice %580 {offsets = [0, 0], sizes = [16, 256], strides = [1, 1]} : vector<16x290xf32> to vector<16x256xf32>
    %607 = vector.broadcast %601 : vector<1x256xf32> to vector<16x256xf32>
    %608 = arith.mulf %606, %607 : vector<16x256xf32>
    %609 = vector.extract_strided_slice %580 {offsets = [0, 1], sizes = [16, 256], strides = [1, 1]} : vector<16x290xf32> to vector<16x256xf32>
    %610 = vector.extract_strided_slice %580 {offsets = [0, 2], sizes = [16, 256], strides = [1, 1]} : vector<16x290xf32> to vector<16x256xf32>
    %611 = vector.broadcast %605 : vector<1x256xf32> to vector<16x256xf32>
    %612 = arith.mulf %610, %611 : vector<16x256xf32>
    %613 = vector.extract_strided_slice %580 {offsets = [0, 16], sizes = [16, 256], strides = [1, 1]} : vector<16x290xf32> to vector<16x256xf32>
    %614 = vector.broadcast %601 : vector<1x256xf32> to vector<16x256xf32>
    %615 = arith.mulf %613, %614 : vector<16x256xf32>
    %616 = vector.extract_strided_slice %580 {offsets = [0, 17], sizes = [16, 256], strides = [1, 1]} : vector<16x290xf32> to vector<16x256xf32>
    %617 = vector.extract_strided_slice %580 {offsets = [0, 18], sizes = [16, 256], strides = [1, 1]} : vector<16x290xf32> to vector<16x256xf32>
    %618 = vector.broadcast %605 : vector<1x256xf32> to vector<16x256xf32>
    %619 = arith.mulf %617, %618 : vector<16x256xf32>
    %620 = vector.extract_strided_slice %580 {offsets = [0, 32], sizes = [16, 256], strides = [1, 1]} : vector<16x290xf32> to vector<16x256xf32>
    %621 = vector.broadcast %601 : vector<1x256xf32> to vector<16x256xf32>
    %622 = arith.mulf %620, %621 : vector<16x256xf32>
    %623 = vector.extract_strided_slice %580 {offsets = [0, 33], sizes = [16, 256], strides = [1, 1]} : vector<16x290xf32> to vector<16x256xf32>
    %624 = vector.extract_strided_slice %580 {offsets = [0, 34], sizes = [16, 256], strides = [1, 1]} : vector<16x290xf32> to vector<16x256xf32>
    %625 = vector.broadcast %605 : vector<1x256xf32> to vector<16x256xf32>
    %626 = arith.mulf %624, %625 : vector<16x256xf32>
    %627 = tpu.concatenate %608, %609, %612, %615, %616, %619, %622, %623, %626 in 0 : vector<16x256xf32>, vector<16x256xf32>, vector<16x256xf32>, vector<16x256xf32>, vector<16x256xf32>, vector<16x256xf32>, vector<16x256xf32>, vector<16x256xf32>, vector<16x256xf32> -> vector<144x256xf32>
    %cst_181 = arith.constant dense<0.000000e+00> : vector<8x256xf32>
    %628 = tpu.matmul %576, %627, %cst_181 {dimension_numbers = #tpu.dot_dimension_numbers<[1], [0], [0], [1], [0, 0, 1, 1], [], []>} : vector<8x144xf32>, vector<144x256xf32>, vector<8x256xf32> -> vector<8x256xf32>
    %629 = vector.broadcast %577 : vector<8x1xf32> to vector<8x256xf32>
    %630 = arith.mulf %628, %629 : vector<8x256xf32>
    %631 = vector.broadcast %578 : vector<8x1xf32> to vector<8x256xf32>
    %632 = arith.addf %630, %631 : vector<8x256xf32>
    %cst_182 = arith.constant 0.000000e+00 : f32
    %633 = vector.broadcast %cst_182 : f32 to vector<8x256xf32>
    %634 = arith.maximumf %632, %633 : vector<8x256xf32>
    %635 = arith.addf %634, %60 : vector<8x256xf32>
    %c0_183 = arith.constant 0 : index
    %c0_184 = arith.constant 0 : index
    %c0_185 = arith.constant 0 : index
    %636 = vector.load %arg26[%c0_183, %c0_184, %c0_185] : memref<1x8x256xf32, #tpu.memory_space<vmem>>, vector<1x8x256xf32>
    %637 = vector.shape_cast %636 : vector<1x8x256xf32> to vector<8x256xf32>
    %638 = vector.shape_cast %635 : vector<8x256xf32> to vector<1x8x256xf32>
    tpu.vector_store %arg26[%c0_183, %c0_184, %c0_185], %638 {strides = array<i32>} : memref<1x8x256xf32, #tpu.memory_space<vmem>>, vector<1x8x256xf32>,
    return
  }
  func.func @transform_0(%arg0: i32) -> (i32, i32, i32) {
    %c0_i32 = arith.constant 0 : i32
    %c0_i32_0 = arith.constant 0 : i32
    %c0_i32_1 = arith.constant 0 : i32
    return %arg0, %c0_i32, %c0_i32_0 : i32, i32, i32
  }
  func.func @transform_1(%arg0: i32) -> (i32, i32) {
    %c0_i32 = arith.constant 0 : i32
    %c0_i32_0 = arith.constant 0 : i32
    %c0_i32_1 = arith.constant 0 : i32
    return %c0_i32, %c0_i32_0 : i32, i32
  }
  func.func @transform_2(%arg0: i32) -> (i32, i32) {
    %c0_i32 = arith.constant 0 : i32
    %c0_i32_0 = arith.constant 0 : i32
    %c0_i32_1 = arith.constant 0 : i32
    return %c0_i32, %c0_i32_0 : i32, i32
  }
  func.func @transform_3(%arg0: i32) -> (i32, i32) {
    %c0_i32 = arith.constant 0 : i32
    %c0_i32_0 = arith.constant 0 : i32
    %c0_i32_1 = arith.constant 0 : i32
    return %c0_i32, %c0_i32_0 : i32, i32
  }
  func.func @transform_4(%arg0: i32) -> (i32, i32) {
    %c0_i32 = arith.constant 0 : i32
    %c0_i32_0 = arith.constant 0 : i32
    %c0_i32_1 = arith.constant 0 : i32
    return %c0_i32, %c0_i32_0 : i32, i32
  }
  func.func @transform_5(%arg0: i32) -> (i32, i32) {
    %c0_i32 = arith.constant 0 : i32
    %c0_i32_0 = arith.constant 0 : i32
    %c0_i32_1 = arith.constant 0 : i32
    return %c0_i32, %c0_i32_0 : i32, i32
  }
  func.func @transform_6(%arg0: i32) -> (i32, i32) {
    %c0_i32 = arith.constant 0 : i32
    %c0_i32_0 = arith.constant 0 : i32
    %c0_i32_1 = arith.constant 0 : i32
    return %c0_i32, %c0_i32_0 : i32, i32
  }
  func.func @transform_7(%arg0: i32) -> (i32, i32) {
    %c0_i32 = arith.constant 0 : i32
    %c0_i32_0 = arith.constant 0 : i32
    %c0_i32_1 = arith.constant 0 : i32
    return %c0_i32, %c0_i32_0 : i32, i32
  }
  func.func @transform_8(%arg0: i32) -> (i32, i32) {
    %c0_i32 = arith.constant 0 : i32
    %c0_i32_0 = arith.constant 0 : i32
    %c0_i32_1 = arith.constant 0 : i32
    return %c0_i32, %c0_i32_0 : i32, i32
  }
  func.func @transform_9(%arg0: i32) -> (i32, i32) {
    %c0_i32 = arith.constant 0 : i32
    %c0_i32_0 = arith.constant 0 : i32
    %c0_i32_1 = arith.constant 0 : i32
    return %c0_i32, %c0_i32_0 : i32, i32
  }
  func.func @transform_10(%arg0: i32) -> (i32, i32) {
    %c0_i32 = arith.constant 0 : i32
    %c0_i32_0 = arith.constant 0 : i32
    %c0_i32_1 = arith.constant 0 : i32
    return %c0_i32, %c0_i32_0 : i32, i32
  }
  func.func @transform_11(%arg0: i32) -> (i32, i32) {
    %c0_i32 = arith.constant 0 : i32
    %c0_i32_0 = arith.constant 0 : i32
    %c0_i32_1 = arith.constant 0 : i32
    return %c0_i32, %c0_i32_0 : i32, i32
  }
  func.func @transform_12(%arg0: i32) -> (i32, i32) {
    %c0_i32 = arith.constant 0 : i32
    %c0_i32_0 = arith.constant 0 : i32
    %c0_i32_1 = arith.constant 0 : i32
    return %c0_i32, %c0_i32_0 : i32, i32
  }
  func.func @transform_13(%arg0: i32) -> (i32, i32) {
    %c0_i32 = arith.constant 0 : i32
    %c0_i32_0 = arith.constant 0 : i32
    %c0_i32_1 = arith.constant 0 : i32
    return %c0_i32, %c0_i32_0 : i32, i32
  }
  func.func @transform_14(%arg0: i32) -> (i32, i32) {
    %c0_i32 = arith.constant 0 : i32
    %c0_i32_0 = arith.constant 0 : i32
    %c0_i32_1 = arith.constant 0 : i32
    return %c0_i32, %c0_i32_0 : i32, i32
  }
  func.func @transform_15(%arg0: i32) -> (i32, i32) {
    %c0_i32 = arith.constant 0 : i32
    %c0_i32_0 = arith.constant 0 : i32
    %c0_i32_1 = arith.constant 0 : i32
    return %c0_i32, %c0_i32_0 : i32, i32
  }
  func.func @transform_16(%arg0: i32) -> (i32, i32) {
    %c0_i32 = arith.constant 0 : i32
    %c0_i32_0 = arith.constant 0 : i32
    %c0_i32_1 = arith.constant 0 : i32
    return %c0_i32, %c0_i32_0 : i32, i32
  }
  func.func @transform_17(%arg0: i32) -> (i32, i32) {
    %c0_i32 = arith.constant 0 : i32
    %c0_i32_0 = arith.constant 0 : i32
    %c0_i32_1 = arith.constant 0 : i32
    return %c0_i32, %c0_i32_0 : i32, i32
  }
  func.func @transform_18(%arg0: i32) -> (i32, i32) {
    %c0_i32 = arith.constant 0 : i32
    %c0_i32_0 = arith.constant 0 : i32
    %c0_i32_1 = arith.constant 0 : i32
    return %c0_i32, %c0_i32_0 : i32, i32
  }
  func.func @transform_19(%arg0: i32) -> (i32, i32) {
    %c0_i32 = arith.constant 0 : i32
    %c0_i32_0 = arith.constant 0 : i32
    %c0_i32_1 = arith.constant 0 : i32
    return %c0_i32, %c0_i32_0 : i32, i32
  }
  func.func @transform_20(%arg0: i32) -> (i32, i32) {
    %c0_i32 = arith.constant 0 : i32
    %c0_i32_0 = arith.constant 0 : i32
    %c0_i32_1 = arith.constant 0 : i32
    return %c0_i32, %c0_i32_0 : i32, i32
  }
  func.func @transform_21(%arg0: i32) -> (i32, i32) {
    %c0_i32 = arith.constant 0 : i32
    %c0_i32_0 = arith.constant 0 : i32
    %c0_i32_1 = arith.constant 0 : i32
    return %c0_i32, %c0_i32_0 : i32, i32
  }
  func.func @transform_22(%arg0: i32) -> (i32, i32) {
    %c0_i32 = arith.constant 0 : i32
    %c0_i32_0 = arith.constant 0 : i32
    %c0_i32_1 = arith.constant 0 : i32
    return %c0_i32, %c0_i32_0 : i32, i32
  }
  func.func @transform_23(%arg0: i32) -> (i32, i32) {
    %c0_i32 = arith.constant 0 : i32
    %c0_i32_0 = arith.constant 0 : i32
    %c0_i32_1 = arith.constant 0 : i32
    return %c0_i32, %c0_i32_0 : i32, i32
  }
  func.func @transform_24(%arg0: i32) -> (i32, i32) {
    %c0_i32 = arith.constant 0 : i32
    %c0_i32_0 = arith.constant 0 : i32
    %c0_i32_1 = arith.constant 0 : i32
    return %c0_i32, %c0_i32_0 : i32, i32
  }
  func.func @transform_25(%arg0: i32) -> (i32, i32, i32) {
    %c0_i32 = arith.constant 0 : i32
    %c0_i32_0 = arith.constant 0 : i32
    %c0_i32_1 = arith.constant 0 : i32
    return %arg0, %c0_i32, %c0_i32_0 : i32, i32, i32
  }
}

</mosaic_0001>

<bundles_post_ra>
// kernel: _lambda_.1
= control target key start
LH: loop header
LB: loop body
LE: loop exit
PB: predicated region body
PF: predicated region fallthrough
CT: control target
= control target key end

     0   :  { %s6732_s0 = inlined_call_operand.vmem [shape: f32[2,4,256], index: 0, kind: input, shape index: {}]   ;;  %s6733_s1 = inlined_call_operand.hbm [shape: f32[8,36], index: 1, kind: input, shape index: {}]   ;;  %s6734_s2 = inlined_call_operand.hbm [shape: f32[8,1], index: 2, kind: input, shape index: {}]   ;;  %s6735_s3 = inlined_call_operand.hbm [shape: f32[8,1], index: 3, kind: input, shape index: {}]   ;;  %s6736_s4 = inlined_call_operand.hbm [shape: f32[8,72], index: 4, kind: input, shape index: {}]   ;;  %s6737_s5 = inlined_call_operand.hbm [shape: f32[8,1], index: 5, kind: input, shape index: {}]   ;;  %s6738_s6 = inlined_call_operand.hbm [shape: f32[8,1], index: 6, kind: input, shape index: {}]   ;;  %s6739_s7 = inlined_call_operand.hbm [shape: f32[8,72], index: 7, kind: input, shape index: {}]   ;;  %s6740_s8 = inlined_call_operand.hbm [shape: f32[8,1], index: 8, kind: input, shape index: {}]   ;;  %s6741_s9 = inlined_call_operand.hbm [shape: f32[8,1], index: 9, kind: input, shape index: {}]   ;;  %s6742_s10 = inlined_call_operand.hbm [shape: f32[8,72], index: 10, kind: input, shape index: {}]   ;;  %s6743_s11 = inlined_call_operand.vmem [shape: f32[8,1], index: 11, kind: input, shape index: {}]   ;;  %s6744_s12 = inlined_call_operand.vmem [shape: f32[8,1], index: 12, kind: input, shape index: {}]   ;;  %s6745_s13 = inlined_call_operand.vmem [shape: f32[8,144], index: 13, kind: input, shape index: {}]   ;;  %s6746_s14 = inlined_call_operand.vmem [shape: f32[8,1], index: 14, kind: input, shape index: {}]   ;;  %s6747_s15 = inlined_call_operand.vmem [shape: f32[8,1], index: 15, kind: input, shape index: {}]   ;;  %s6748_s16 = inlined_call_operand.vmem [shape: f32[8,144], index: 16, kind: input, shape index: {}]   ;;  %s6749_s17 = inlined_call_operand.vmem [shape: f32[8,1], index: 17, kind: input, shape index: {}]   ;;  %s6750_s18 = inlined_call_operand.vmem [shape: f32[8,1], index: 18, kind: input, shape index: {}]   ;;  %s6751_s19 = inlined_call_operand.hbm [shape: f32[256,64], index: 19, kind: input, shape index: {}]   ;;  %s6752_s20 = inlined_call_operand.hbm [shape: f32[64,16], index: 20, kind: input, shape index: {}]   ;;  %s6753_s21 = inlined_call_operand.hbm [shape: f32[16,4], index: 21, kind: input, shape index: {}]   ;;  %s6754_s22 = inlined_call_operand.hbm [shape: f32[4,16], index: 22, kind: input, shape index: {}]   ;;  %s6755_s23 = inlined_call_operand.hbm [shape: f32[16,64], index: 23, kind: input, shape index: {}]   ;;  %s6756_s24 = inlined_call_operand.vmem [shape: f32[64,256], index: 24, kind: input, shape index: {}]   ;;  %s6757_s25 = inlined_call_operand.vmem [shape: f32[2,8,256], index: 25, kind: output, shape index: {}]  }
   0x1   :  { %6802 = sst [smem:[#allocation34_spill]] %s6732_s0 }
   0x2   :  { %6803 = sst [smem:[#allocation35_spill]] %s6733_s1 }
   0x3   :  { %6804 = sst [smem:[#allocation36_spill]] %s6734_s2 }
   0x4   :  { %6805 = sst [smem:[#allocation37_spill]] %s6735_s3 }
   0x5   :  { %6806 = sst [smem:[#allocation38_spill]] %s6736_s4 }
   0x6   :  { %6807 = sst [smem:[#allocation39_spill]] %s6737_s5 }
   0x7   :  { %6808 = sst [smem:[#allocation40_spill]] %s6738_s6 }
   0x8   :  { %6809 = sst [smem:[#allocation41_spill]] %s6739_s7 }
   0x9   :  { %6810 = sst [smem:[#allocation42_spill]] %s6740_s8 }
   0xa   :  { %6811 = sst [smem:[#allocation43_spill]] %s6741_s9 }
   0xb   :  { %6812 = sst [smem:[#allocation44_spill]] %s6742_s10 }
   0xc   :  { %6813 = sst [smem:[#allocation45_spill]] %s6748_s16 }
   0xd   :  { %6814 = sst [smem:[#allocation46_spill]] %s6749_s17 }
   0xe   :  { %6815 = sst [smem:[#allocation47_spill]] %s6750_s18 }
   0xf   :  { %6816 = sst [smem:[#allocation48_spill]] %s6757_s25 }
  0x10   :  { %30 = vsyncpa [#allocation3], 0 }
  0x11   :  { %31 = vsyncpa [#allocation5], 0 }
  0x12   :  { %32 = vsyncpa [#allocation8], 0 }
  0x13   :  { %33 = vsyncpa [#allocation11], 0 }
  0x14   :  { %34 = vsyncpa [#allocation14], 0 }
  0x15   :  { %35 = vsyncpa [#allocation17], 0 }
  0x16   :  { %36 = vsyncpa [#allocation20], 0 }
  0x17   :  { %37 = vsyncpa [#allocation23], 0  ;;  %s5482_s29 = smov 0  }
  0x18 LB: > { %6817 = sst [smem:[#allocation33_spill]] %s5299_s29  ;;  %s5301_s2 = smov [#allocation4]   ;;  %s5299_s29 = sphi %s5482_s29, %s43_s29  }
  0x19   : > { %s628_s6 = sshll.u32 %s5301_s2, 4  ;;  %s5488_s30 = sadd.s32 4294967295, %s5299_s29   ;;  %s5493_s6 = int_to_ptr.vmem [resolvable:$true] %s628_s6 }
  0x1a   : > { %p3740_p0 = scmp.ge.s32.totalorder %s5299_s29, 1  ;;  %p604_p1 = scmp.lt.s32.totalorder %s5299_s29, 3 }
  0x1b   : > { %p6770_p2 = scmp.eq.s32.totalorder %s5488_s30, 0  ;;  %s5302_s3 = smov [#allocation7]  }
  0x1c   : > { %p5495_p3 = pnand %p3740_p0, %p604_p1  ;;  %s650_s26 = sshll.u32 %s5302_s3, 4  ;;  %s5501_s26 = int_to_ptr.vmem [resolvable:$true] %s650_s26 }
  0x1d   : > { %s5303_s1 = smov [#allocation10]   ;;  %s5304_s4 = smov [#allocation13]  }
  0x1e   : > { %s6818_s7 = scalar_select %p5495_p3, 1, 0 }
  0x1f   : > { %p4338_p4 = pneg %p5495_p3  ;;  %s672_s8 = sshll.u32 %s5303_s1, 4  ;;  %s5509_s8 = int_to_ptr.vmem [resolvable:$true] %s672_s8 }
  0x20   : > { %s694_s28 = sshll.u32 %s5304_s4, 4  ;;  %s6820_s0 = sld [smem:[#allocation36_spill]]  ;;  %s5511_s28 = int_to_ptr.vmem [resolvable:$true] %s694_s28 }
  0x21   : > { %p5505_p5 = pnand %p6770_p2, %p4338_p4 }
  0x23   : > { %p5521_p7 = pneg %p5505_p5 }
  0x26   : > { %s4841_s2 = scalar_lea.hbm %s6820_s0, 128 }
  0x27   : > { %p4842_p6 = scmp.ne.s32.totalorder %s6820_s0, %s4841_s2  ;;  %p4848_p10 = scmp.lt.u32.totalorder %s4841_s2, %s6820_s0 }
  0x29   : > { %p4844_p8 = pnand %p5521_p7, %p4842_p6 }
  0x2b   : > { %p4845_p9 = pneg %p4844_p8 }
  0x2d   : > { %p4850_p11 = pnand %p4848_p10, %p4845_p9 }
  0x2f   : > { %4853 = shalt.err (!%p4850_p11)
}
  0x30   : > { %s4854_s29 = scalar_lea.vmem %s5493_s6, 128  ;;  %p4862_p1 = scmp.lt.s32.totalorder %s5493_s6, %s5493_s6 }
  0x31   : > { %p4855_p12 = scmp.ne.s32.totalorder %s5493_s6, %s4854_s29  ;;  %p4863_p4 = scmp.lt.s32.totalorder %s4854_s29, %s4854_s29 }
  0x33   : > { %p4857_p13 = pnand %p4855_p12, %p5521_p7  ;;  %p4864_p6 = por %p4863_p4, %p4862_p1 }
  0x35   : > { %p4858_p0 = pneg %p4857_p13 }
  0x37   : > { %p4865_p8 = pnand %p4864_p6, %p4858_p0 }
  0x39   : > { %4868 = shalt.err (!%p4865_p8)
}
  0x3a   : > { %4344 = dma.hbm_to_vmem [thread:$0]  (!%p5505_p5), %s6820_s0, 128, %s5493_s6, [#allocation5]  }
  0x3b   : > { %s6822_s3 = sld [smem:[#allocation38_spill]] }
  0x41   : > { %s4869_s4 = scalar_lea.hbm %s6822_s3, 128 }
  0x42   : > { %p4870_p9 = scmp.ne.s32.totalorder %s6822_s3, %s4869_s4  ;;  %p4876_p12 = scmp.lt.u32.totalorder %s4869_s4, %s6822_s3 }
  0x44   : > { %p4872_p10 = pnand %p4870_p9, %p5521_p7 }
  0x46   : > { %p4873_p11 = pneg %p4872_p10 }
  0x48   : > { %p4878_p13 = pnand %p4876_p12, %p4873_p11 }
  0x4a   : > { %4881 = shalt.err (!%p4878_p13)
}
  0x4b   : > { %s4882_s6 = scalar_lea.vmem %s5501_s26, 128  ;;  %p4890_p6 = scmp.lt.s32.totalorder %s5501_s26, %s5501_s26 }
  0x4c   : > { %p4883_p0 = scmp.ne.s32.totalorder %s5501_s26, %s4882_s6  ;;  %p4891_p8 = scmp.lt.s32.totalorder %s4882_s6, %s4882_s6 }
  0x4e   : > { %p4885_p1 = pnand %p4883_p0, %p5521_p7  ;;  %p4892_p9 = por %p4891_p8, %p4890_p6 }
  0x50   : > { %p4886_p4 = pneg %p4885_p1 }
  0x52   : > { %p4893_p10 = pnand %p4892_p9, %p4886_p4 }
  0x54   : > { %4896 = shalt.err (!%p4893_p10)
}
  0x55   : > { %4350 = dma.hbm_to_vmem [thread:$0]  (!%p5505_p5), %s6822_s3, 128, %s5501_s26, [#allocation8]  }
  0x56   : > { %s6823_s9 = sld [smem:[#allocation40_spill]] }
  0x5c   : > { %s4897_s5 = scalar_lea.hbm %s6823_s9, 128 }
  0x5d   : > { %p4898_p11 = scmp.ne.s32.totalorder %s6823_s9, %s4897_s5  ;;  %p4904_p0 = scmp.lt.u32.totalorder %s4897_s5, %s6823_s9 }
  0x5f   : > { %p4900_p12 = pnand %p4898_p11, %p5521_p7 }
  0x61   : > { %p4901_p13 = pneg %p4900_p12 }
  0x63   : > { %p4906_p1 = pnand %p4904_p0, %p4901_p13 }
  0x65   : > { %4909 = shalt.err (!%p4906_p1)
}
  0x66   : > { %s4910_s26 = scalar_lea.vmem %s5509_s8, 128  ;;  %p4918_p9 = scmp.lt.s32.totalorder %s5509_s8, %s5509_s8 }
  0x67   : > { %p4911_p4 = scmp.ne.s32.totalorder %s5509_s8, %s4910_s26  ;;  %p4919_p10 = scmp.lt.s32.totalorder %s4910_s26, %s4910_s26 }
  0x69   : > { %p4913_p6 = pnand %p4911_p4, %p5521_p7  ;;  %p4920_p11 = por %p4919_p10, %p4918_p9 }
  0x6b   : > { %p4914_p8 = pneg %p4913_p6 }
  0x6d   : > { %p4921_p12 = pnand %p4920_p11, %p4914_p8 }
  0x6f   : > { %4924 = shalt.err (!%p4921_p12)
}
  0x70   : > { %4356 = dma.hbm_to_vmem [thread:$0]  (!%p5505_p5), %s6823_s9, 128, %s5509_s8, [#allocation11]  }
  0x71   : > { %s6824_s5 = sld [smem:[#allocation42_spill]] }
  0x77   : > { %s4925_s2 = scalar_lea.hbm %s6824_s5, 128 }
  0x78   : > { %p4926_p13 = scmp.ne.s32.totalorder %s6824_s5, %s4925_s2  ;;  %p4932_p4 = scmp.lt.u32.totalorder %s4925_s2, %s6824_s5 }
  0x7a   : > { %p4928_p0 = pnand %p4926_p13, %p5521_p7 }
  0x7c   : > { %p4929_p1 = pneg %p4928_p0 }
  0x7e   : > { %p4934_p6 = pnand %p4932_p4, %p4929_p1 }
  0x80   : > { %4937 = shalt.err (!%p4934_p6)
}
  0x81   : > { %s4938_s8 = scalar_lea.vmem %s5511_s28, 128  ;;  %p4946_p11 = scmp.lt.s32.totalorder %s5511_s28, %s5511_s28 }
  0x82   : > { %p4939_p8 = scmp.ne.s32.totalorder %s5511_s28, %s4938_s8  ;;  %p4947_p12 = scmp.lt.s32.totalorder %s4938_s8, %s4938_s8 }
  0x84   : > { %p4941_p9 = pnand %p4939_p8, %p5521_p7  ;;  %p4948_p13 = por %p4947_p12, %p4946_p11 }
  0x86   : > { %p4942_p10 = pneg %p4941_p9 }
  0x88   : > { %p4949_p0 = pnand %p4948_p13, %p4942_p10 }
  0x8a   : > { %4952 = shalt.err (!%p4949_p0)
}
  0x8b   : > { %4362 = dma.hbm_to_vmem [thread:$0]  (!%p5505_p5), %s6824_s5, 128, %s5511_s28, [#allocation14]  }
  0x8c   : > { %s5305_s18 = smov [#allocation16]   ;;  %s6825_s10 = sld [smem:[#allocation44_spill]] }
  0x8d   : > { %s716_s25 = sshll.u32 %s5305_s18, 4  ;;  %s717_s25 = int_to_ptr.vmem [resolvable:$true] %s716_s25 }
  0x92   : > { %s4953_s29 = scalar_lea.hbm %s6825_s10, 128 }
  0x93   : > { %p4954_p1 = scmp.ne.s32.totalorder %s6825_s10, %s4953_s29  ;;  %p4960_p8 = scmp.lt.u32.totalorder %s4953_s29, %s6825_s10 }
  0x95   : > { %p4956_p4 = pnand %p4954_p1, %p5521_p7 }
  0x97   : > { %p4957_p6 = pneg %p4956_p4 }
  0x99   : > { %p4962_p9 = pnand %p4960_p8, %p4957_p6 }
  0x9b   : > { %4965 = shalt.err (!%p4962_p9)
}
  0x9c   : > { %s4966_s28 = scalar_lea.vmem %s717_s25, 128  ;;  %p4974_p13 = scmp.lt.s32.totalorder %s717_s25, %s717_s25 }
  0x9d   : > { %p4967_p10 = scmp.ne.s32.totalorder %s717_s25, %s4966_s28  ;;  %p4975_p0 = scmp.lt.s32.totalorder %s4966_s28, %s4966_s28 }
  0x9f   : > { %p4969_p11 = pnand %p4967_p10, %p5521_p7  ;;  %p4976_p2 = por %p4975_p0, %p4974_p13 }
  0xa1   : > { %p4970_p12 = pneg %p4969_p11 }
  0xa3   : > { %p4977_p3 = pnand %p4976_p2, %p4970_p12 }
  0xa5   : > { %4980 = shalt.err (!%p4977_p3)
}
  0xa6   : > { %4368 = dma.hbm_to_vmem [thread:$0]  (!%p5505_p5), %s6825_s10, 128, %s717_s25, [#allocation17]  }
  0xa7   : > { %s5306_s0 = smov [#allocation19]   ;;  %s5307_s2 = smov [#allocation22]  }
  0xa8   : > { %s763_s18 = sshll.u32 %s5306_s0, 4  ;;  %s790_s4 = sshll.u32 %s5307_s2, 4  ;;  %s764_s18 = int_to_ptr.vmem [resolvable:$true] %s763_s18  ;;  %s5629_s4 = int_to_ptr.vmem [resolvable:$true] %s790_s4 }
  0xa9   : > { %s4981_s26 = scalar_lea.hbm %s6752_s20, 1024 }
  0xaa   : > { %p4982_p2 = scmp.ne.s32.totalorder %s6752_s20, %s4981_s26  ;;  %p4988_p4 = scmp.lt.u32.totalorder %s4981_s26, %s6752_s20 }
  0xac   : > { %p4984_p3 = pnand %p4982_p2, %p5521_p7 }
  0xae   : > { %p4985_p1 = pneg %p4984_p3 }
  0xb0   : > { %p4990_p6 = pnand %p4988_p4, %p4985_p1 }
  0xb2   : > { %4993 = shalt.err (!%p4990_p6)
}
  0xb3   : > { %s4994_s17 = scalar_lea.vmem %s764_s18, 1024  ;;  %p5002_p11 = scmp.lt.s32.totalorder %s764_s18, %s764_s18 }
  0xb4   : > { %p4995_p8 = scmp.ne.s32.totalorder %s764_s18, %s4994_s17  ;;  %p5003_p12 = scmp.lt.s32.totalorder %s4994_s17, %s4994_s17 }
  0xb6   : > { %p4997_p9 = pnand %p4995_p8, %p5521_p7  ;;  %p5004_p13 = por %p5003_p12, %p5002_p11 }
  0xb8   : > { %p4998_p10 = pneg %p4997_p9 }
  0xba   : > { %p5005_p0 = pnand %p5004_p13, %p4998_p10 }
  0xbc   : > { %5008 = shalt.err (!%p5005_p0)
}
  0xbd   : > { %s6773_s0 = smov 128   ;;  %s6775_s2 = smov 8  }
  0xbe   : > { %4374 = dma.hbm_to_vmem [thread:$0]  (!%p5505_p5), %s6752_s20, 1024, %s764_s18, [#allocation20], %s6773_s0, %s6773_s0, %s6775_s2  }
  0xbf   : > { %s5009_s28 = scalar_lea.hbm %s6754_s22, 64 }
  0xc0   : > { %p5010_p2 = scmp.ne.s32.totalorder %s6754_s22, %s5009_s28  ;;  %p5016_p4 = scmp.lt.u32.totalorder %s5009_s28, %s6754_s22 }
  0xc2   : > { %p5012_p3 = pnand %p5010_p2, %p5521_p7 }
  0xc4   : > { %p5013_p1 = pneg %p5012_p3 }
  0xc6   : > { %p5018_p6 = pnand %p5016_p4, %p5013_p1 }
  0xc8   : > { %5021 = shalt.err (!%p5018_p6)
}
  0xc9   : > { %s5022_s18 = scalar_lea.vmem %s5629_s4, 64  ;;  %p5030_p11 = scmp.lt.s32.totalorder %s5629_s4, %s5629_s4 }
  0xca   : > { %p5023_p8 = scmp.ne.s32.totalorder %s5629_s4, %s5022_s18  ;;  %p5031_p12 = scmp.lt.s32.totalorder %s5022_s18, %s5022_s18 }
  0xcc   : > { %p5025_p9 = pnand %p5023_p8, %p5521_p7  ;;  %p5032_p13 = por %p5031_p12, %p5030_p11 }
  0xce   : > { %p5026_p10 = pneg %p5025_p9 }
  0xd0   : > { %p5033_p0 = pnand %p5032_p13, %p5026_p10 }
  0xd2   : > { %5036 = shalt.err (!%p5033_p0)
}
  0xd3   : > { %4380 = dma.hbm_to_vmem [thread:$0]  (!%p5505_p5), %s6754_s22, 64, %s5629_s4, [#allocation23]  }
  0xd4   : > { %s5310_s6 = smov [#allocation2]   ;;  %s5311_s8 = smov [#allocation6]  }
  0xd5   : > { %s617_s26 = sshll.u32 %s5310_s6, 4  ;;  %s639_s28 = sshll.u32 %s5311_s8, 4  ;;  %s618_s26 = int_to_ptr.vmem [resolvable:$true] %s617_s26  ;;  %s5675_s28 = int_to_ptr.vmem [resolvable:$true] %s639_s28 }
  0xd6   : > { %s6826_s17 = sld [smem:[#allocation35_spill]] }
  0xdc   : > { %s5037_s18 = scalar_lea.hbm %s6826_s17, 128 }
  0xdd   : > { %p5038_p2 = scmp.ne.s32.totalorder %s6826_s17, %s5037_s18  ;;  %p5044_p4 = scmp.lt.u32.totalorder %s5037_s18, %s6826_s17 }
  0xdf   : > { %p5040_p3 = pnand %p5038_p2, %p5521_p7 }
  0xe1   : > { %p5041_p1 = pneg %p5040_p3 }
  0xe3   : > { %p5046_p6 = pnand %p5044_p4, %p5041_p1 }
  0xe5   : > { %5049 = shalt.err (!%p5046_p6)
}
  0xe6   : > { %s5050_s29 = scalar_lea.vmem %s618_s26, 128  ;;  %p5058_p11 = scmp.lt.s32.totalorder %s618_s26, %s618_s26 }
  0xe7   : > { %p5051_p8 = scmp.ne.s32.totalorder %s618_s26, %s5050_s29  ;;  %p5059_p12 = scmp.lt.s32.totalorder %s5050_s29, %s5050_s29 }
  0xe9   : > { %p5053_p9 = pnand %p5051_p8, %p5521_p7  ;;  %p5060_p13 = por %p5059_p12, %p5058_p11 }
  0xeb   : > { %p5054_p10 = pneg %p5053_p9 }
  0xed   : > { %p5061_p0 = pnand %p5060_p13, %p5054_p10 }
  0xef   : > { %5064 = shalt.err (!%p5061_p0)
}
  0xf0   : > { %4341 = dma.hbm_to_vmem [thread:$0]  (!%p5505_p5), %s6826_s17, 128, %s618_s26, [#allocation3]  }
  0xf1   : > { %s6827_s16 = sld [smem:[#allocation37_spill]] }
  0xf7   : > { %s5065_s25 = scalar_lea.hbm %s6827_s16, 128 }
  0xf8   : > { %p5066_p2 = scmp.ne.s32.totalorder %s6827_s16, %s5065_s25  ;;  %p5072_p4 = scmp.lt.u32.totalorder %s5065_s25, %s6827_s16 }
  0xfa   : > { %p5068_p3 = pnand %p5066_p2, %p5521_p7 }
  0xfc   : > { %p5069_p1 = pneg %p5068_p3 }
  0xfe   : > { %p5074_p6 = pnand %p5072_p4, %p5069_p1 }
 0x100   : > { %5077 = shalt.err (!%p5074_p6)
}
 0x101   : > { %s5078_s26 = scalar_lea.vmem %s5675_s28, 128  ;;  %p5086_p11 = scmp.lt.s32.totalorder %s5675_s28, %s5675_s28 }
 0x102   : > { %p5079_p8 = scmp.ne.s32.totalorder %s5675_s28, %s5078_s26  ;;  %p5087_p12 = scmp.lt.s32.totalorder %s5078_s26, %s5078_s26 }
 0x104   : > { %p5081_p9 = pnand %p5079_p8, %p5521_p7  ;;  %p5088_p13 = por %p5087_p12, %p5086_p11 }
 0x106   : > { %p5082_p10 = pneg %p5081_p9 }
 0x108   : > { %p5089_p0 = pnand %p5088_p13, %p5082_p10 }
 0x10a   : > { %5092 = shalt.err (!%p5089_p0)
}
 0x10b   : > { %4347 = dma.hbm_to_vmem [thread:$0]  (!%p5505_p5), %s6827_s16, 128, %s5675_s28, [#allocation5]  }
 0x10c   : > { %s5312_s6 = smov [#allocation9]   ;;  %s5313_s25 = smov [#allocation12]  }
 0x10d   : > { %s661_s8 = sshll.u32 %s5312_s6, 4  ;;  %s683_s18 = sshll.u32 %s5313_s25, 4  ;;  %s662_s8 = int_to_ptr.vmem [resolvable:$true] %s661_s8  ;;  %s5718_s18 = int_to_ptr.vmem [resolvable:$true] %s683_s18 }
 0x10e   : > { %s6828_s29 = sld [smem:[#allocation39_spill]] }
 0x114   : > { %s6829_s26 = smov %s6828_s29  ;;  %s5093_s5 = scalar_lea.hbm %s6828_s29, 128 }
 0x115   : > { %p5094_p2 = scmp.ne.s32.totalorder %s6829_s26, %s5093_s5  ;;  %p5100_p4 = scmp.lt.u32.totalorder %s5093_s5, %s6829_s26 }
 0x117   : > { %p5096_p3 = pnand %p5094_p2, %p5521_p7 }
 0x119   : > { %p5097_p1 = pneg %p5096_p3 }
 0x11b   : > { %p5102_p6 = pnand %p5100_p4, %p5097_p1 }
 0x11d   : > { %5105 = shalt.err (!%p5102_p6)
}
 0x11e   : > { %s5106_s2 = scalar_lea.vmem %s662_s8, 128  ;;  %p5114_p11 = scmp.lt.s32.totalorder %s662_s8, %s662_s8 }
 0x11f   : > { %p5107_p8 = scmp.ne.s32.totalorder %s662_s8, %s5106_s2  ;;  %p5115_p12 = scmp.lt.s32.totalorder %s5106_s2, %s5106_s2 }
 0x121   : > { %p5109_p9 = pnand %p5107_p8, %p5521_p7  ;;  %p5116_p13 = por %p5115_p12, %p5114_p11 }
 0x123   : > { %p5110_p10 = pneg %p5109_p9 }
 0x125   : > { %p5117_p0 = pnand %p5116_p13, %p5110_p10 }
 0x127   : > { %5120 = shalt.err (!%p5117_p0)
}
 0x128   : > { %4353 = dma.hbm_to_vmem [thread:$0]  (!%p5505_p5), %s6829_s26, 128, %s662_s8, [#allocation8]  }
 0x129   : > { %s6830_s25 = sld [smem:[#allocation41_spill]] }
 0x12f   : > { %s5121_s3 = scalar_lea.hbm %s6830_s25, 128 }
 0x130   : > { %p5122_p2 = scmp.ne.s32.totalorder %s6830_s25, %s5121_s3  ;;  %p5128_p4 = scmp.lt.u32.totalorder %s5121_s3, %s6830_s25 }
 0x132   : > { %p5124_p3 = pnand %p5122_p2, %p5521_p7 }
 0x134   : > { %p5125_p1 = pneg %p5124_p3 }
 0x136   : > { %p5130_p6 = pnand %p5128_p4, %p5125_p1 }
 0x138   : > { %5133 = shalt.err (!%p5130_p6)
}
 0x139   : > { %s5134_s8 = scalar_lea.vmem %s5718_s18, 128  ;;  %p5142_p11 = scmp.lt.s32.totalorder %s5718_s18, %s5718_s18 }
 0x13a   : > { %p5135_p8 = scmp.ne.s32.totalorder %s5718_s18, %s5134_s8  ;;  %p5143_p12 = scmp.lt.s32.totalorder %s5134_s8, %s5134_s8 }
 0x13c   : > { %p5137_p9 = pnand %p5135_p8, %p5521_p7  ;;  %p5144_p13 = por %p5143_p12, %p5142_p11 }
 0x13e   : > { %p5138_p10 = pneg %p5137_p9 }
 0x140   : > { %p5145_p0 = pnand %p5144_p13, %p5138_p10 }
 0x142   : > { %5148 = shalt.err (!%p5145_p0)
}
 0x143   : > { %4359 = dma.hbm_to_vmem [thread:$0]  (!%p5505_p5), %s6830_s25, 128, %s5718_s18, [#allocation11]  }
 0x144   : > { %s5314_s9 = smov [#allocation15]   ;;  %s5315_s6 = smov [#allocation18]  }
 0x145   : > { %s705_s5 = sshll.u32 %s5314_s9, 4  ;;  %s750_s3 = sshll.u32 %s5315_s6, 4  ;;  %s706_s5 = int_to_ptr.vmem [resolvable:$true] %s705_s5  ;;  %s5761_s3 = int_to_ptr.vmem [resolvable:$true] %s750_s3 }
 0x146   : > { %s6831_s0 = sld [smem:[#allocation43_spill]] }
 0x14c   : > { %s5149_s28 = scalar_lea.hbm %s6831_s0, 128 }
 0x14d   : > { %p5150_p2 = scmp.ne.s32.totalorder %s6831_s0, %s5149_s28  ;;  %p5156_p4 = scmp.lt.u32.totalorder %s5149_s28, %s6831_s0 }
 0x14f   : > { %p5152_p3 = pnand %p5150_p2, %p5521_p7 }
 0x151   : > { %p5153_p1 = pneg %p5152_p3 }
 0x153   : > { %p5158_p6 = pnand %p5156_p4, %p5153_p1 }
 0x155   : > { %5161 = shalt.err (!%p5158_p6)
}
 0x156   : > { %s5162_s10 = scalar_lea.vmem %s706_s5, 128  ;;  %p5170_p11 = scmp.lt.s32.totalorder %s706_s5, %s706_s5 }
 0x157   : > { %p5163_p8 = scmp.ne.s32.totalorder %s706_s5, %s5162_s10  ;;  %p5171_p12 = scmp.lt.s32.totalorder %s5162_s10, %s5162_s10 }
 0x159   : > { %p5165_p9 = pnand %p5163_p8, %p5521_p7  ;;  %p5172_p13 = por %p5171_p12, %p5170_p11 }
 0x15b   : > { %p5166_p10 = pneg %p5165_p9 }
 0x15d   : > { %p5173_p0 = pnand %p5172_p13, %p5166_p10 }
 0x15f   : > { %5176 = shalt.err (!%p5173_p0)
}
 0x160   : > { %4365 = dma.hbm_to_vmem [thread:$0]  (!%p5505_p5), %s6831_s0, 128, %s706_s5, [#allocation14]  }
 0x161   : > { %s5177_s29 = scalar_lea.hbm %s6751_s19, 4096 }
 0x162   : > { %p5178_p2 = scmp.ne.s32.totalorder %s6751_s19, %s5177_s29  ;;  %p5184_p4 = scmp.lt.u32.totalorder %s5177_s29, %s6751_s19 }
 0x164   : > { %p5180_p3 = pnand %p5178_p2, %p5521_p7 }
 0x166   : > { %p5181_p1 = pneg %p5180_p3 }
 0x168   : > { %p5186_p6 = pnand %p5184_p4, %p5181_p1 }
 0x16a   : > { %5189 = shalt.err (!%p5186_p6)
}
 0x16b   : > { %s5190_s5 = scalar_lea.vmem %s5761_s3, 4096  ;;  %p5198_p11 = scmp.lt.s32.totalorder %s5761_s3, %s5761_s3 }
 0x16c   : > { %p5191_p8 = scmp.ne.s32.totalorder %s5761_s3, %s5190_s5  ;;  %p5199_p12 = scmp.lt.s32.totalorder %s5190_s5, %s5190_s5 }
 0x16e   : > { %p5193_p9 = pnand %p5191_p8, %p5521_p7  ;;  %p5200_p13 = por %p5199_p12, %p5198_p11 }
 0x170   : > { %p5194_p10 = pneg %p5193_p9 }
 0x172   : > { %p5201_p0 = pnand %p5200_p13, %p5194_p10 }
 0x174   : > { %5204 = shalt.err (!%p5201_p0)
}
 0x175   : > { %s6832_s10 = smov 8   ;;  %s6833_s16 = smov 128  }
 0x176   : > { %4371 = dma.hbm_to_vmem [thread:$0]  (!%p5505_p5), %s6751_s19, 4096, %s5761_s3, [#allocation17], %s6833_s16, %s6833_s16, %s6832_s10  }
 0x177   : > { %s5316_s4 = smov [#allocation21]   ;;  %s5317_s28 = smov [#allocation24]  }
 0x178   : > { %s776_s29 = sshll.u32 %s5316_s4, 4  ;;  %s800_s8 = sshll.u32 %s5317_s28, 4  ;;  %s777_s29 = int_to_ptr.vmem [resolvable:$true] %s776_s29  ;;  %s5807_s8 = int_to_ptr.vmem [resolvable:$true] %s800_s8 }
 0x179   : > { %s5205_s5 = scalar_lea.hbm %s6753_s21, 256 }
 0x17a   : > { %p5206_p2 = scmp.ne.s32.totalorder %s6753_s21, %s5205_s5  ;;  %p5212_p4 = scmp.lt.u32.totalorder %s5205_s5, %s6753_s21 }
 0x17c   : > { %p5208_p3 = pnand %p5206_p2, %p5521_p7 }
 0x17e   : > { %p5209_p1 = pneg %p5208_p3 }
 0x180   : > { %p5214_p6 = pnand %p5212_p4, %p5209_p1 }
 0x182   : > { %5217 = shalt.err (!%p5214_p6)
}
 0x183   : > { %s5218_s6 = scalar_lea.vmem %s777_s29, 256  ;;  %p5226_p11 = scmp.lt.s32.totalorder %s777_s29, %s777_s29 }
 0x184   : > { %p5219_p8 = scmp.ne.s32.totalorder %s777_s29, %s5218_s6  ;;  %p5227_p12 = scmp.lt.s32.totalorder %s5218_s6, %s5218_s6 }
 0x186   : > { %p5221_p9 = pnand %p5219_p8, %p5521_p7  ;;  %p5228_p13 = por %p5227_p12, %p5226_p11 }
 0x188   : > { %p5222_p10 = pneg %p5221_p9 }
 0x18a   : > { %p5229_p0 = pnand %p5228_p13, %p5222_p10 }
 0x18c   : > { %5232 = shalt.err (!%p5229_p0)
}
 0x18d   : > { %4377 = dma.hbm_to_vmem [thread:$0]  (!%p5505_p5), %s6753_s21, 256, %s777_s29, [#allocation20], %s6833_s16, %s6833_s16, %s6832_s10  }
 0x18e   : > { %s5233_s2 = scalar_lea.hbm %s6755_s23, 256 }
 0x18f   : > { %p5234_p2 = scmp.ne.s32.totalorder %s6755_s23, %s5233_s2  ;;  %p5240_p4 = scmp.lt.u32.totalorder %s5233_s2, %s6755_s23 }
 0x191   : > { %p5236_p3 = pnand %p5234_p2, %p5521_p7 }
 0x193   : > { %p5237_p1 = pneg %p5236_p3 }
 0x195   : > { %p5242_p6 = pnand %p5240_p4, %p5237_p1 }
 0x197   : > { %5245 = shalt.err (!%p5242_p6)
}
 0x198   : > { %s5246_s29 = scalar_lea.vmem %s5807_s8, 256  ;;  %p5254_p11 = scmp.lt.s32.totalorder %s5807_s8, %s5807_s8 }
 0x199   : > { %p5247_p8 = scmp.ne.s32.totalorder %s5807_s8, %s5246_s29  ;;  %p5255_p12 = scmp.lt.s32.totalorder %s5246_s29, %s5246_s29 }
 0x19b   : > { %p5249_p9 = pnand %p5247_p8, %p5521_p7  ;;  %p5256_p13 = por %p5255_p12, %p5254_p11 }
 0x19d   : > { %p5250_p10 = pneg %p5249_p9 }
 0x19f   : > { %p5257_p0 = pnand %p5256_p13, %p5250_p10 }
 0x1a1   : > { %5260 = shalt.err (!%p5257_p0)
}
 0x1a2   : > { %4383 = dma.hbm_to_vmem [thread:$0]  (!%p5505_p5), %s6755_s23, 256, %s5807_s8, [#allocation23], %s6833_s16, %s6833_s16, %s6832_s10  }
 0x1a3   : > { %p6834_p2 = scmp.ne.s32.totalorder %s6818_s7, 0 }
 0x1a4   : > { %p6835_p7 = scmp.eq.s32.totalorder (!%p6834_p2), %s5488_s30, 0 }
 0x1a5   : > { %827 = sbr.rel (%p6834_p2) target bundleno = 7282 (0x1c72), region = 120 }
 0x1ac   : > { %5266 = dma.done.wait (%p6835_p7), [#allocation3], 128   ;;  %p6836_p3 = pmov %p6835_p7 }
 0x1ae   : > { %5268 = vsyncadd (%p6836_p3), [#allocation3], 4294967168  ;;  %p6837_p1 = pmov %p6836_p3 }
 0x1b0   : > { %5270 = dma.done.wait (%p6837_p1), [#allocation5], 256   ;;  %p6838_p4 = pmov %p6837_p1 }
 0x1b1   : > { %p6839_p6 = pmov %p6837_p1 }
 0x1b2   : > { %5272 = vsyncadd (%p6838_p4), [#allocation5], 4294967040 }
 0x1b3   : > { %5274 = dma.done.wait (%p6839_p6), [#allocation8], 256   ;;  %p6840_p5 = pmov %p6837_p1 }
 0x1b4   : > { %p6841_p8 = pmov %p6837_p1 }
 0x1b5   : > { %5276 = vsyncadd (%p6840_p5), [#allocation8], 4294967040 }
 0x1b6   : > { %5278 = dma.done.wait (%p6841_p8), [#allocation11], 256   ;;  %p6842_p9 = pmov %p6837_p1 }
 0x1b7   : > { %p6843_p10 = pmov %p6837_p1 }
 0x1b8   : > { %5280 = vsyncadd (%p6842_p9), [#allocation11], 4294967040 }
 0x1b9   : > { %5282 = dma.done.wait (%p6843_p10), [#allocation14], 256   ;;  %p6844_p11 = pmov %p6837_p1 }
 0x1ba   : > { %p6845_p12 = pmov %p6837_p1 }
 0x1bb   : > { %5284 = vsyncadd (%p6844_p11), [#allocation14], 4294967040 }
 0x1bc   : > { %5286 = dma.done.wait (%p6845_p12), [#allocation17], 4224   ;;  %p6846_p13 = pmov %p6837_p1 }
 0x1bd   : > { %p6847_p0 = pmov %p6837_p1 }
 0x1be   : > { %5288 = vsyncadd (%p6846_p13), [#allocation17], 4294963072 }
 0x1bf   : > { %5290 = dma.done.wait (%p6847_p0), [#allocation20], 1280   ;;  %p6848_p2 = pmov %p6847_p0 }
 0x1c0   : > { %p6849_p7 = pmov %p6847_p0 }
 0x1c1   : > { %5292 = vsyncadd (%p6848_p2), [#allocation20], 4294966016 }
 0x1c2   : > { %5294 = dma.done.wait (%p6849_p7), [#allocation23], 320   ;;  %p6850_p3 = pmov %p6847_p0 }
 0x1c3   : > { %p951_p1 = scmp.lt.s32.totalorder %s5488_s30, 1  ;;  %v978_v0 = vlaneseq  ;;  %v5318_v1 = vmov 0.0   ;;  %s6851_s10 = sld [smem:[#allocation34_spill]]  ;;  %vm971_vm4 = vcmask 138240   ;;  %vm1025_vm5 = vcmask 15360  }
 0x1c4   : > { %5296 = vsyncadd (%p6850_p3), [#allocation23], 4294966976  ;;  %1276 = vmatprep.mubr.f32.mxu1 %v5318_v1  ;;  %s6791_s8 = smov 17   ;;  %s5320_s0 = smov 16   ;;  %vm1063_vm6 = vcmask 261120   ;;  %vm1039_vm7 = vcmask 130048  }
 0x1c5   : > { %s6889_s30 = smov (!%p951_p1, %s5488_s30), 1  ;;  %v5895_v2 = vand.u32 127, %v978_v0  ;;  %s5321_s4 = smov 2   ;;  %vm1051_vm8 = vcmask 146432   ;;  %vm1075_vm9 = vcmask 277504   ;;  %vm1094_vm10 = vcmask 1039360  }
 0x1c6   : > { %s3807_s7 = sshll.u32 %s6889_s30, 3  ;;  %s5322_s28 = smov 18   ;;  %vm1108_vm11 = vcmask 1031168   ;;  %vm1195_vm12 = vcmask 1043456   ;;  %vm6798_vm13 = vcmask 908288   ;;  %vm6788_vm14 = vcmask 785408  }
 0x1c7   : > { %v980_v3 = vadd.s32 128, %v5895_v2  ;;  %v985_v4 = vand.u32 15, %v5895_v2  ;;  %s5323_s2 = smov 32   ;;  %s5324_s18 = smov 34   ;;  %vm6799_vm15 = vcmask 916480  }
 0x1c8   : > { %s6796_s5 = smov 111   ;;  %s5326_s9 = smov 127  }
 0x1c9   : > { %s955_s16 = scalar_lea.vmem %s6851_s10, %s3807_s7  ;;  %v992_v5 = vand.u32 15, %v980_v3  ;;  %vm1005_vm0 = vcmp.ge.s32.totalorder %v985_v4, 1  ;;  %vm1011_vm1 = vcmp.lt.s32.totalorder %v985_v4, 15  ;;  %s5327_s3 = smov 126   ;;  %v5332_v4 = vmov 0  }
 0x1ca   : > { %v961_v6 = vld [vmem:[%s955_s16] sm:$0xff]  ;;  %v5904_v7 = vsel %vm1005_vm0, 1.0, %v5318_v1  ;;  %v3779_v10 = vsel %vm1011_vm1, 1.0, %v5318_v1  ;;  %s6800_s29 = smov 112   ;;  %s6786_s6 = smov 95   ;;  %4533 = vset.pattern.permute.xlu0 %v5332_v4  ;;  %4534 = vset.pattern.permute.xlu1 %v5332_v4  ;;  %vm6783_vm0 = vcmask 777216  }
 0x1cb   : > { %967 = vrot.lane.b32.xlu0 %v961_v6, %s6791_s8  ;;  %v966_v8 = vcombine.high %v961_v6, %v961_v6  ;;  %vm1006_vm2 = vcmp.ge.s32.totalorder %v992_v5, 1  ;;  %vm1012_vm3 = vcmp.lt.s32.totalorder %v992_v5, 15  ;;  %s6789_s17 = smov 96   ;;  %s6794_s7 = smov 110   ;;  %vm6793_vm1 = vcmask 900096  }
 0x1cc   : > { %v5908_v9 = vsel %vm1006_vm2, 1.0, %v5318_v1  ;;  %v3780_v11 = vsel %vm1012_vm3, 1.0, %v5318_v1  ;;  %s6784_s27 = smov 94   ;;  %vm6782_vm2 = vcmask 769024   ;;  %vm1204_vm3 = vcmask 293888   ;;  %s5334_s1 = smov 10  }
 0x1cd   : > { %v4473_v12 = vpack.i.bf16 %v5908_v9, %v5904_v7  ;;  %v4478_v13 = vpack.i.bf16 %v3780_v11, %v3779_v10  ;;  %v963_v10 = vld [vmem:[#allocation4] sm:$0xff]  ;;  %v964_v11 = vld [vmem:[#allocation6] sm:$0xff]  ;;  %s5335_s10 = smov 9   ;;  %s5336_s16 = smov 8  }
 0x1cf   : > { %4474 = vrot.lane.b32.xlu1 %v4473_v12, %s5320_s0  ;;  %969 = vrot.lane.b32.xlu0 %v966_v8, %s6791_s8 }
 0x1d3   : > { %4479 = vrot.lane.b32.xlu1 %v4478_v13, %s5321_s4  ;;  %4484 = vrot.lane.b32.xlu0 %v4478_v13, %s5322_s28 }
 0x1d7   : > { %4489 = vrot.lane.b32.xlu1 %v4473_v12, %s5323_s2  ;;  %4494 = vrot.lane.b32.xlu0 %v4478_v13, %s5324_s18  ;;  %s5341_s2 = smov 118   ;;  %s5342_s18 = smov 6  }
 0x23d   : > { %v968_v14 = vpop.permute.xlu0 %967 }
 0x23e   : > { %v5919_v15 = vsel %vm971_vm4, 0.0, %v968_v14 }
 0x23f   : > { %1130 = vrot.lane.b32.xlu1 %v5919_v15, %s6796_s5  ;;  %v1085_v16 = vrot.slane %v5919_v15, 4 }
 0x241   : > { %v4475_v17 = vpop.permute.xlu1 %4474  ;;  %1088 = vrot.lane.b32.xlu0 %v1085_v16, %s5326_s9  ;;  %v970_v18 = vpop.permute.xlu0 %969 }
 0x242   : > { %v5931_v22 = vunpack.i.l.bf16 %v4475_v17  ;;  %v5934_v23 = vsel %vm971_vm4, %v970_v18, 0.0  ;;  %v5937_v24 = vsel %vm971_vm4, %v968_v14, %v970_v18  ;;  %v5947_v28 = vunpack.i.h.bf16 %v4475_v17 }
 0x243   : > { %v1086_v36 = vrot.slane %v5937_v24, 4  ;;  %v1087_v37 = vrot.slane %v5934_v23, 4  ;;  %v4498_v40 = vpack.i.bf16 %v5934_v23, %v5937_v24 }
 0x244   : > { %v1044_v35 = vmul.f32 %v5931_v22, %v5919_v15  ;;  %v5974_v42 = vsel %vm1039_vm7, %v5931_v22, %v5947_v28  ;;  %v1046_v45 = vmul.f32 %v5947_v28, %v5934_v23 }
 0x245   : > { %v4480_v19 = vpop.permute.xlu1 %4479  ;;  %v4485_v29 = vpop.permute.xlu0 %4484  ;;  %v4503_v44 = vpack.i.bf16 %v1087_v37, %v1086_v36  ;;  %v1045_v48 = vmul.f32 %v5974_v42, %v5937_v24 }
 0x246   : > { %v5927_v20 = vunpack.i.h.bf16 %v4480_v19  ;;  %v5929_v21 = vunpack.i.l.bf16 %v4480_v19  ;;  %v5960_v38 = vunpack.i.h.bf16 %v4485_v29  ;;  %v5962_v39 = vunpack.i.l.bf16 %v4485_v29 }
 0x247   : > { %v1116_v43 = vrot.slane %v1044_v35, 4  ;;  %v1117_v54 = vrot.slane %v1045_v48, 4  ;;  %v1118_v55 = vrot.slane %v1046_v45, 4 }
 0x248   : > { %v1030_v25 = vmul.f32 %v5929_v21, %v5919_v15  ;;  %v5943_v26 = vsel %vm1025_vm5, %v5929_v21, %v5927_v20  ;;  %v1032_v27 = vmul.f32 %v5927_v20, %v5934_v23  ;;  %v5987_v49 = vsel %vm1051_vm8, %v5962_v39, %v5960_v38 }
 0x249   : > { %v4490_v30 = vpop.permute.xlu1 %4489  ;;  %v1031_v31 = vmul.f32 %v5943_v26, %v5937_v24  ;;  %v1056_v50 = vmul.f32 %v5962_v39, %v5919_v15  ;;  %v1057_v51 = vmul.f32 %v5987_v49, %v5937_v24  ;;  %v1058_v52 = vmul.f32 %v5960_v38, %v5934_v23  ;;  %v4495_v56 = vpop.permute.xlu0 %4494 }
 0x24a   : > { %v5951_v32 = vunpack.i.h.bf16 %v4490_v30  ;;  %v5953_v33 = vunpack.i.l.bf16 %v4490_v30  ;;  %1102 = vrot.lane.b32.xlu1 %v1030_v25, %s5327_s3  ;;  %v4523_v60 = vpack.i.bf16 %v1118_v55, %v1117_v54  ;;  %v5999_v61 = vunpack.i.h.bf16 %v4495_v56 }
 0x24b   : > { %v4508_v34 = vpack.i.bf16 %v1032_v27, %v1031_v31  ;;  %v1144_v57 = vrot.slane %v1056_v50, 4  ;;  %v1145_v58 = vrot.slane %v1057_v51, 4  ;;  %v1146_v59 = vrot.slane %v1058_v52, 4 }
 0x24c   : > { %v5969_v41 = vsel %vm1063_vm6, %v5953_v33, %v5951_v32  ;;  %v1070_v47 = vmul.f32 %v5951_v32, %v5934_v23  ;;  %v6001_v62 = vunpack.i.l.bf16 %v4495_v56  ;;  %v1068_v0 = vmul.f32 %v5953_v33, %v5919_v15 }
 0x24d   : > { %4509 = vrot.lane.b32.xlu0 %v4508_v34, %s5327_s3  ;;  %v1069_v46 = vmul.f32 %v5969_v41, %v5937_v24  ;;  %v4528_v63 = vpack.i.bf16 %v1146_v59, %v1145_v58  ;;  %v1082_v6 = vmul.f32 %v5999_v61, %v5934_v23  ;;  %v1017_v30 = vmul.f32 %v5904_v7, %v5919_v15 }
 0x24e   : > { %4499 = vrot.lane.b32.xlu1 %v4498_v40, %s6796_s5  ;;  %v6010_v3 = vsel %vm1075_vm9, %v6001_v62, %v5999_v61  ;;  %v1080_v8 = vmul.f32 %v6001_v62, %v5919_v15  ;;  %v1018_v31 = vmul.f32 %v5908_v9, %v5937_v24  ;;  %vm1428_vm5 = vcmask 588800  }
 0x24f   : > { %v4513_v53 = vpack.i.bf16 %v1070_v47, %v1069_v46  ;;  %v1081_v5 = vmul.f32 %v6010_v3, %v5937_v24  ;;  %vm1660_vm9 = vcmask 72704  }
 0x251   : > { %1119 = vrot.lane.b32.xlu0 %v1116_v43, %s6800_s29 }
 0x252   : > { %4504 = vrot.lane.b32.xlu1 %v4503_v44, %s5326_s9 }
 0x255   : > { %4519 = vrot.lane.b32.xlu0 %v4503_v44, %s6786_s6 }
 0x256   : > { %4514 = vrot.lane.b32.xlu1 %v4513_v53, %s6789_s17 }
 0x259   : > { %1147 = vrot.lane.b32.xlu0 %v1144_v57, %s6794_s7 }
 0x25a   : > { %4524 = vrot.lane.b32.xlu1 %v4523_v60, %s6800_s29 }
 0x25d   : > { %4529 = vrot.lane.b32.xlu0 %v4528_v63, %s6794_s7 }
 0x25e   : > { %1161 = vrot.lane.b32.xlu1 %v1068_v0, %s6789_s17 }
 0x261   : > { %1172 = vrot.lane.b32.xlu0 %v1085_v16, %s6786_s6 }
 0x262   : > { %1188 = vrot.lane.b32.xlu1 %v1081_v5, %s6784_s27 }
 0x265   : > { %1190 = vrot.lane.b32.xlu0 %v1082_v6, %s6784_s27 }
 0x266   : > { %1186 = vrot.lane.b32.xlu1 %v1080_v8, %s6784_s27 }
 0x269   : > { %1285 = vperm.xlu0 %4533, %v963_v10  }
 0x26a   : > { %1292 = vperm.xlu1 %4534, %v964_v11  }
 0x2b1   : > { %v6025_v12 = vpop.permute.xlu1 %1130 }
 0x2b3   : > { %v1089_v13 = vpop.permute.xlu0 %1088 }
 0x2bc   : > { %v1103_v14 = vpop.permute.xlu1 %1102 }
 0x2bf   : > { %v4510_v16 = vpop.permute.xlu0 %4509 }
 0x2c0   : > { %v4500_v17 = vpop.permute.xlu1 %4499  ;;  %v4512_v34 = vunpack.i.h.bf16 %v4510_v16  ;;  %v4511_v35 = vunpack.i.l.bf16 %v4510_v16 }
 0x2c1   : > { %v4502_v15 = vunpack.i.h.bf16 %v4500_v17  ;;  %v4501_v24 = vunpack.i.l.bf16 %v4500_v17 }
 0x2c2   : > { %v1110_v51 = vsel %vm1108_vm11, %v4511_v35, %v4512_v34  ;;  %v1109_v53 = vsel %vm1108_vm11, %v1103_v14, %v4511_v35 }
 0x2c3   : > { %v1120_v18 = vpop.permute.xlu0 %1119  ;;  %v1138_v10 = vsel %vm6798_vm13, %v4501_v24, %v4502_v15 }
 0x2c4   : > { %v4505_v19 = vpop.permute.xlu1 %4504 }
 0x2c5   : > { %v4507_v23 = vunpack.i.h.bf16 %v4505_v19  ;;  %v4506_v25 = vunpack.i.l.bf16 %v4505_v19 }
 0x2c7   : > { %v4520_v27 = vpop.permute.xlu0 %4519  ;;  %v1096_v36 = vsel %vm1094_vm10, %v4506_v25, %v4507_v23  ;;  %v1095_v37 = vsel %vm1094_vm10, %v1089_v13, %v4506_v25 }
 0x2c8   : > { %v4515_v29 = vpop.permute.xlu1 %4514  ;;  %v4522_v40 = vunpack.i.h.bf16 %v4520_v27  ;;  %v4521_v43 = vunpack.i.l.bf16 %v4520_v27  ;;  %v1197_v52 = vsel %vm1195_vm12, %v1018_v31, %v1096_v36  ;;  %v1196_v54 = vsel %vm1195_vm12, %v1017_v30, %v1095_v37  ;;  %v962_v37 = vld [vmem:[#allocation2] sm:$0xff] }
 0x2c9   : > { %v4517_v44 = vunpack.i.h.bf16 %v4515_v29  ;;  %v4516_v45 = vunpack.i.l.bf16 %v4515_v29  ;;  %v1137_v27 = vsel %vm6798_vm13, %v6025_v12, %v4501_v24 }
 0x2ca   : > { %v1180_v59 = vsel %vm6783_vm0, %v4521_v43, %v4522_v40 }
 0x2cb   : > { %v1148_v46 = vpop.permute.xlu0 %1147  ;;  %v1169_v58 = vsel %vm6788_vm14, %v4516_v45, %v4517_v44 }
 0x2cc   : > { %v4525_v47 = vpop.permute.xlu1 %4524  ;;  %v1203_v17 = vsel %vm1195_vm12, %v1169_v58, %v1180_v59 }
 0x2cd   : > { %v4527_v48 = vunpack.i.h.bf16 %v4525_v47  ;;  %v4526_v50 = vunpack.i.l.bf16 %v4525_v47 }
 0x2cf   : > { %v4530_v55 = vpop.permute.xlu0 %4529  ;;  %v1127_v56 = vsel %vm6799_vm15, %v4526_v50, %v4527_v48  ;;  %v1126_v57 = vsel %vm6799_vm15, %v1120_v18, %v4526_v50 }
 0x2d0   : > { %v4532_v60 = vunpack.i.h.bf16 %v4530_v55  ;;  %v4531_v63 = vunpack.i.l.bf16 %v4530_v55  ;;  %v1162_v0 = vpop.permute.xlu1 %1161  ;;  %v1199_v4 = vsel %vm1195_vm12, %v1110_v51, %v1127_v56  ;;  %v1198_v5 = vsel %vm1195_vm12, %v1109_v53, %v1126_v57 }
 0x2d1   : > { %v4023_v6 = vpack.c.bf16 %v1199_v4, %v1197_v52  ;;  %v4025_v8 = vpack.c.bf16 %v1198_v5, %v1196_v54  ;;  %v1168_v18 = vsel %vm6788_vm14, %v1162_v0, %v4516_v45 }
 0x2d2   : > { %v1155_v11 = vsel %vm6793_vm1, %v4531_v63, %v4532_v60  ;;  %v1154_v13 = vsel %vm6793_vm1, %v1148_v46, %v4531_v63 }
 0x2d3   : > { %4024 = vmatprep.subr.bf16.mxu1 %v4023_v6  ;;  %v1173_v14 = vpop.permute.xlu0 %1172  ;;  %v1201_v16 = vsel %vm1195_vm12, %v1138_v10, %v1155_v11  ;;  %v1200_v30 = vsel %vm1195_vm12, %v1137_v27, %v1154_v13  ;;  %v1301_v27 = vld [vmem:[#allocation10] sm:$0xff] }
 0x2d4   : > { %v1179_v19 = vsel %vm6783_vm0, %v1173_v14, %v4521_v43  ;;  %4026 = vmatpush1.bf16.msra.mxu1 %v4025_v8  ;;  %v1189_v23 = vpop.permute.xlu1 %1188  ;;  %v4027_v25 = vpack.c.bf16 %v1203_v17, %v1201_v16 }
 0x2d5   : > { %v1202_v29 = vsel %vm1195_vm12, %v1168_v18, %v1179_v19 }
 0x2d6   : > { %4028 = vmatprep.subr.bf16.mxu1 %v4027_v25  ;;  %v4029_v31 = vpack.c.bf16 %v1202_v29, %v1200_v30 }
 0x2d7   : > { %v1191_v34 = vpop.permute.xlu0 %1190 }
 0x2d8   : > { %v1194_v35 = vsel %vm6782_vm2, %v1189_v23, %v1191_v34  ;;  %v1187_v36 = vpop.permute.xlu1 %1186  ;;  %4030 = vmatpush1.bf16.msra.mxu1 %v4029_v31 }
 0x2d9   : > { %3781 = vmatprep.subr.msk.mxu1 %vm1195_vm12, %v1194_v35  ;;  %v1193_v40 = vsel %vm6782_vm2, %v1187_v36, %v1189_v23  ;;  %v1300_v23 = vld [vmem:[#allocation9] sm:$0xff] }
 0x2dc   : > { %3782 = vmatpush1.msk.msra.mxu1 %vm1195_vm12, %v1193_v40 }
 0x2dd   : > { %3783 = vmatmul.mubr.msk.f32.vlgmr.msra.gmra.mrb[0].mxu1 %vm1204_vm3, %v962_v37  ;;  %vm1662_vm3 = vcmask 596992  }
 0x2de   : > { %1496 = vmatprep.mubr.f32.mxu1 %v5318_v1 }
 0x2e8   : > { %v1286_v12 = vpop.permute.xlu0 %1285 }
 0x2e9   : > { %v1293_v44 = vpop.permute.xlu1 %1292 }
 0x3b0   : > { %v1278_v43 = vpop.f32.mrb[0].mxu1 }
 0x3b1   : > { %v1288_v45 = vmul.f32 %v1286_v12, %v1278_v43  ;;  %v1280_v46 = vpop.f32.mrb[1].mxu1 }
 0x3b2   : > { %v1289_v47 = vmul.f32 %v1286_v12, %v1280_v46 }
 0x3b3   : > { %v6059_v15 = vadd.f32 %v1293_v44, %v1288_v45 }
 0x3b4   : > { %v6061_v24 = vadd.f32 %v1293_v44, %v1289_v47 }
 0x3b5   : > { %v1297_v48 = vmax.f32 %v6059_v15, 0.0 }
 0x3b6   : > { %v1298_v50 = vmax.f32 %v6061_v24, 0.0 }
 0x3b7   : > { %1304 = vrot.lane.b32.xlu1 %v1297_v48, %s6791_s8 }
 0x3b8   : > { %1306 = vrot.lane.b32.xlu0 %v1298_v50, %s6791_s8  ;;  %s5347_s8 = smov 122  }
 0x429   : > { %v1305_v51 = vpop.permute.xlu1 %1304 }
 0x42a   : > { %v1312_v52 = vsel %vm971_vm4, 0.0, %v1305_v51  ;;  %v1307_v53 = vpop.permute.xlu0 %1306 }
 0x42b   : > { %v1308_v54 = vsel %vm971_vm4, %v1305_v51, %v1307_v53  ;;  %v1313_v55 = vsel %vm971_vm4, %v1307_v53, 0.0  ;;  %1369 = vrot.lane.b32.xlu1 %v1312_v52, %s6796_s5  ;;  %1333 = vrot.lane.b32.xlu0 %v1312_v52, %s5326_s9  ;;  %v1319_v57 = vmul.f32 %v5931_v22, %v1312_v52  ;;  %v1322_v58 = vmul.f32 %v5962_v39, %v1312_v52 }
 0x42c   : > { %v4535_v56 = vpack.i.bf16 %v1313_v55, %v1308_v54  ;;  %v1320_v59 = vmul.f32 %v1308_v54, %v5974_v42  ;;  %v1321_v60 = vmul.f32 %v5947_v28, %v1313_v55  ;;  %v1316_v63 = vmul.f32 %v5929_v21, %v1312_v52 }
 0x42d   : > { %v1323_v0 = vmul.f32 %v1308_v54, %v5987_v49  ;;  %v1324_v5 = vmul.f32 %v5960_v38, %v1313_v55  ;;  %v1317_v6 = vmul.f32 %v1308_v54, %v5943_v26  ;;  %v1318_v8 = vmul.f32 %v5927_v20, %v1313_v55 }
 0x42e   : > { %v4550_v4 = vpack.i.bf16 %v1321_v60, %v1320_v59  ;;  %v1325_v13 = vmul.f32 %v5953_v33, %v1312_v52  ;;  %v1326_v14 = vmul.f32 %v1308_v54, %v5969_v41  ;;  %v1327_v16 = vmul.f32 %v5951_v32, %v1313_v55 }
 0x42f   : > { %1359 = vrot.lane.b32.xlu0 %v1319_v57, %s6800_s29  ;;  %4536 = vrot.lane.b32.xlu1 %v4535_v56, %s5326_s9  ;;  %v4555_v10 = vpack.i.bf16 %v1324_v5, %v1323_v0  ;;  %v4545_v11 = vpack.i.bf16 %v1318_v8, %v1317_v6  ;;  %v1330_v18 = vmul.f32 %v5999_v61, %v1313_v55 }
 0x430   : > { %v4565_v17 = vpack.i.bf16 %v1327_v16, %v1326_v14  ;;  %v1329_v19 = vmul.f32 %v1308_v54, %v6010_v3  ;;  %v1328_v25 = vmul.f32 %v6001_v62, %v1312_v52  ;;  %v1315_v37 = vmul.f32 %v5908_v9, %v1308_v54 }
 0x431   : > { %v1314_v40 = vmul.f32 %v5904_v7, %v1312_v52 }
 0x433   : > { %1382 = vrot.lane.b32.xlu0 %v1322_v58, %s6794_s7  ;;  %4541 = vrot.lane.b32.xlu1 %v4535_v56, %s6796_s5 }
 0x437   : > { %1346 = vrot.lane.b32.xlu1 %v1316_v63, %s5327_s3  ;;  %4551 = vrot.lane.b32.xlu0 %v4550_v4, %s6800_s29 }
 0x43b   : > { %4556 = vrot.lane.b32.xlu0 %v4555_v10, %s6794_s7  ;;  %4546 = vrot.lane.b32.xlu1 %v4545_v11, %s5327_s3 }
 0x43f   : > { %4561 = vrot.lane.b32.xlu0 %v4535_v56, %s6786_s6  ;;  %1395 = vrot.lane.b32.xlu1 %v1325_v13, %s6789_s17 }
 0x443   : > { %1405 = vrot.lane.b32.xlu0 %v1312_v52, %s6786_s6  ;;  %4566 = vrot.lane.b32.xlu1 %v4565_v17, %s6789_s17  ;;  %s5344_s6 = smov 4   ;;  %s5346_s17 = smov 123  }
 0x447   : > { %1422 = vrot.lane.b32.xlu0 %v1330_v18, %s6784_s27  ;;  %1420 = vrot.lane.b32.xlu1 %v1329_v19, %s6784_s27 }
 0x44b   : > { %1505 = vperm.xlu0 %4533, %v1300_v23   ;;  %1418 = vrot.lane.b32.xlu1 %v1328_v25, %s6784_s27  ;;  %s5343_s27 = smov 5  }
 0x44f   : > { %1512 = vperm.xlu1 %4534, %v1301_v27  }
 0x49d   : > { %v1370_v29 = vpop.permute.xlu1 %1369  ;;  %v1334_v30 = vpop.permute.xlu0 %1333 }
 0x4a1   : > { %v4537_v31 = vpop.permute.xlu1 %4536  ;;  %v1360_v34 = vpop.permute.xlu0 %1359 }
 0x4a2   : > { %v4539_v35 = vunpack.i.h.bf16 %v4537_v31  ;;  %v4538_v36 = vunpack.i.l.bf16 %v4537_v31 }
 0x4a4   : > { %v1339_v12 = vsel %vm1094_vm10, %v1334_v30, %v4538_v36  ;;  %v1340_v43 = vsel %vm1094_vm10, %v4538_v36, %v4539_v35 }
 0x4a5   : > { %v4542_v44 = vpop.permute.xlu1 %4541  ;;  %v1383_v45 = vpop.permute.xlu0 %1382  ;;  %v4031_v46 = vpack.c.bf16 %v1340_v43, %v1315_v37  ;;  %v4033_v47 = vpack.c.bf16 %v1339_v12, %v1314_v40 }
 0x4a6   : > { %v4544_v57 = vunpack.i.h.bf16 %v4542_v44  ;;  %v4543_v58 = vunpack.i.l.bf16 %v4542_v44 }
 0x4a7   : > { %4032 = vmatprep.subr.bf16.mxu1 %v4031_v46 }
 0x4a8   : > { %4034 = vmatpush1.bf16.msra.mxu1 %v4033_v47  ;;  %v1376_v17 = vsel %vm6798_vm13, %v4543_v58, %v4544_v57  ;;  %v1375_v27 = vsel %vm6798_vm13, %v1370_v29, %v4543_v58  ;;  %vm2311_vm13 = vcmask 48128  }
 0x4a9   : > { %v1347_v51 = vpop.permute.xlu1 %1346  ;;  %v4552_v53 = vpop.permute.xlu0 %4551 }
 0x4aa   : > { %v4553_v55 = vunpack.i.l.bf16 %v4552_v53  ;;  %v4554_v56 = vunpack.i.h.bf16 %v4552_v53 }
 0x4ac   : > { %v1365_v4 = vsel %vm6799_vm15, %v1360_v34, %v4553_v55  ;;  %v1366_v8 = vsel %vm6799_vm15, %v4553_v55, %v4554_v56  ;;  %v1299_v55 = vld [vmem:[#allocation7] sm:$0xff] }
 0x4ad   : > { %v4547_v59 = vpop.permute.xlu1 %4546  ;;  %v4557_v54 = vpop.permute.xlu0 %4556 }
 0x4ae   : > { %v4549_v60 = vunpack.i.h.bf16 %v4547_v59  ;;  %v4548_v52 = vunpack.i.l.bf16 %v4547_v59  ;;  %v4559_v63 = vunpack.i.h.bf16 %v4557_v54  ;;  %v4558_v0 = vunpack.i.l.bf16 %v4557_v54 }
 0x4b0   : > { %v1352_v5 = vsel %vm1108_vm11, %v1347_v51, %v4548_v52  ;;  %v1353_v6 = vsel %vm1108_vm11, %v4548_v52, %v4549_v60  ;;  %v1389_v10 = vsel %vm6793_vm1, %v4558_v0, %v4559_v63  ;;  %v1388_v18 = vsel %vm6793_vm1, %v1383_v45, %v4558_v0  ;;  %v1535_v0 = vld [vmem:[#allocation18 + $0x80] sm:$0xff] }
 0x4b1   : > { %v1396_v11 = vpop.permute.xlu1 %1395  ;;  %v4562_v13 = vpop.permute.xlu0 %4561  ;;  %v4035_v14 = vpack.c.bf16 %v1366_v8, %v1353_v6  ;;  %v4037_v16 = vpack.c.bf16 %v1365_v4, %v1352_v5  ;;  %v4039_v19 = vpack.c.bf16 %v1389_v10, %v1376_v17  ;;  %v4041_v36 = vpack.c.bf16 %v1388_v18, %v1375_v27  ;;  %v1536_v4 = vld [vmem:[#allocation18 + $0x88] sm:$0xff]  ;;  %v1519_v5 = vld [vmem:[#allocation18] sm:$0xff]  ;;  %v1521_v18 = vld [vmem:[#allocation18 + $0x10] sm:$0xff] }
 0x4b2   : > { %v4564_v23 = vunpack.i.h.bf16 %v4562_v13  ;;  %v4563_v25 = vunpack.i.l.bf16 %v4562_v13  ;;  %v4047_v8 = vpack.c.bf16 %v1536_v4, %v1535_v0  ;;  %v1520_v10 = vld [vmem:[#allocation18 + $0x8] sm:$0xff]  ;;  %v1538_v13 = vld [vmem:[#allocation18 + $0x98] sm:$0xff]  ;;  %v1531_v0 = vld [vmem:[#allocation18 + $0x60] sm:$0xff] }
 0x4b3   : > { %4036 = vmatprep.subr.bf16.mxu1 %v4035_v14 }
 0x4b4   : > { %4038 = vmatpush1.bf16.msra.mxu1 %v4037_v16  ;;  %v1412_v43 = vsel %vm6783_vm0, %v4563_v25, %v4564_v23  ;;  %v4049_v16 = vpack.c.bf16 %v1520_v10, %v1519_v5  ;;  %v1539_v23 = vld [vmem:[#allocation18 + $0xa0] sm:$0xff]  ;;  %4048 = vmatprep.subr.bf16.mxu0 %v4047_v8  ;;  %v1532_v5 = vld [vmem:[#allocation18 + $0x68] sm:$0xff]  ;;  %v1549_v10 = vld [vmem:[#allocation18 + $0xf0] sm:$0xff] }
 0x4b5   : > { %v4567_v30 = vpop.permute.xlu1 %4566  ;;  %v1406_v31 = vpop.permute.xlu0 %1405  ;;  %4040 = vmatprep.subr.bf16.mxu1 %v4039_v19  ;;  %v1522_v19 = vld [vmem:[#allocation18 + $0x18] sm:$0xff]  ;;  %v4073_v8 = vpack.c.bf16 %v1532_v5, %v1531_v0 }
 0x4b6   : > { %v4569_v34 = vunpack.i.h.bf16 %v4567_v30  ;;  %v4568_v35 = vunpack.i.l.bf16 %v4567_v30  ;;  %v1411_v40 = vsel %vm6783_vm0, %v1406_v31, %v4563_v25  ;;  %v1540_v25 = vld [vmem:[#allocation18 + $0xa8] sm:$0xff]  ;;  %4050 = vmatpush3.bf16.msra.mxu0 %v4049_v16  ;;  %v4053_v30 = vpack.c.bf16 %v1522_v19, %v1521_v18 }
 0x4b7   : > { %v4055_v31 = vpack.c.bf16 %v1540_v25, %v1539_v23 }
 0x4b8   : > { %v1401_v37 = vsel %vm6788_vm14, %v1396_v11, %v4568_v35  ;;  %4042 = vmatpush1.bf16.msra.mxu1 %v4041_v36  ;;  %v1402_v12 = vsel %vm6788_vm14, %v4568_v35, %v4569_v34  ;;  %v1537_v11 = vld [vmem:[#allocation18 + $0x90] sm:$0xff]  ;;  %v1523_v34 = vld [vmem:[#allocation18 + $0x20] sm:$0xff]  ;;  %v1524_v35 = vld [vmem:[#allocation18 + $0x28] sm:$0xff]  ;;  %vm1920_vm14 = vcmask 171008  }
 0x4b9   : > { %v4045_v44 = vpack.c.bf16 %v1411_v40, %v1401_v37  ;;  %v1421_v45 = vpop.permute.xlu1 %1420  ;;  %v1423_v46 = vpop.permute.xlu0 %1422  ;;  %v4043_v47 = vpack.c.bf16 %v1412_v43, %v1402_v12  ;;  %v4051_v17 = vpack.c.bf16 %v1538_v13, %v1537_v11  ;;  %v1541_v36 = vld [vmem:[#allocation18 + $0xb0] sm:$0xff]  ;;  %v1542_v37 = vld [vmem:[#allocation18 + $0xb8] sm:$0xff]  ;;  %v4057_v40 = vpack.c.bf16 %v1524_v35, %v1523_v34 }
 0x4ba   : > { %v1425_v29 = vsel %vm6782_vm2, %v1421_v45, %v1423_v46  ;;  %v4059_v12 = vpack.c.bf16 %v1542_v37, %v1541_v36  ;;  %v1525_v43 = vld [vmem:[#allocation18 + $0x30] sm:$0xff]  ;;  %v1544_v46 = vld [vmem:[#allocation18 + $0xc8] sm:$0xff]  ;;  %v1550_v11 = vld [vmem:[#allocation18 + $0xf8] sm:$0xff] }
 0x4bb   : > { %4044 = vmatprep.subr.bf16.mxu1 %v4043_v47  ;;  %4052 = vmatprep.subr.bf16.mxu0 %v4051_v17  ;;  %v1533_v13 = vld [vmem:[#allocation18 + $0x70] sm:$0xff]  ;;  %v4075_v16 = vpack.c.bf16 %v1550_v11, %v1549_v10  ;;  %v1534_v17 = vld [vmem:[#allocation18 + $0x78] sm:$0xff] }
 0x4bc   : > { %4046 = vmatpush1.bf16.msra.mxu1 %v4045_v44  ;;  %4054 = vmatpush3.bf16.msra.mxu0 %v4053_v30  ;;  %v1526_v44 = vld [vmem:[#allocation18 + $0x38] sm:$0xff]  ;;  %v4077_v18 = vpack.c.bf16 %v1534_v17, %v1533_v13 }
 0x4bd   : > { %v1419_v51 = vpop.permute.xlu1 %1418  ;;  %1448 = vmatprep.subr.mxu1 %v1425_v29  ;;  %4056 = vmatprep.subr.bf16.mxu0 %v4055_v31  ;;  %v4061_v47 = vpack.c.bf16 %v1526_v44, %v1525_v43 }
 0x4be   : > { %v1424_v53 = vsel %vm6782_vm2, %v1419_v51, %v1421_v45  ;;  %v1543_v45 = vld [vmem:[#allocation18 + $0xc0] sm:$0xff] }
 0x4bf   : > { %v4063_v29 = vpack.c.bf16 %v1544_v46, %v1543_v45  ;;  %v1527_v51 = vld [vmem:[#allocation18 + $0x40] sm:$0xff] }
 0x4c0   : > { %1449 = vmatpush1.msra.mxu1 %v1424_v53  ;;  %4058 = vmatpush3.bf16.msra.mxu0 %v4057_v40  ;;  %v1528_v53 = vld [vmem:[#allocation18 + $0x48] sm:$0xff] }
 0x4c1   : > { %3784 = vmatmul.mubr.msk.f32.vlgmr.msra.gmra.mrb[2].mxu1 %vm1428_vm5, %v1299_v55  ;;  %4060 = vmatprep.subr.bf16.mxu0 %v4059_v12  ;;  %v1545_v55 = vld [vmem:[#allocation18 + $0xd0] sm:$0xff] }
 0x4c4   : > { %4062 = vmatpush3.bf16.msra.mxu0 %v4061_v47 }
 0x4c5   : > { %4064 = vmatprep.subr.bf16.mxu0 %v4063_v29 }
 0x4ca   : > { %v1506_v56 = vpop.permute.xlu0 %1505 }
 0x4ce   : > { %v1513_v54 = vpop.permute.xlu1 %1512 }
 0x594   : > { %v1498_v57 = vpop.f32.mrb[2].mxu1 }
 0x595   : > { %v1508_v58 = vmul.f32 %v1506_v56, %v1498_v57  ;;  %v1500_v59 = vpop.f32.mrb[3].mxu1  ;;  %v4065_v57 = vpack.c.bf16 %v1528_v53, %v1527_v51 }
 0x596   : > { %v1509_v60 = vmul.f32 %v1506_v56, %v1500_v59  ;;  %v1546_v56 = vld [vmem:[#allocation18 + $0xd8] sm:$0xff]  ;;  %v1529_v59 = vld [vmem:[#allocation18 + $0x50] sm:$0xff] }
 0x597   : > { %v1515_v52 = vadd.f32 %v1513_v54, %v1508_v58  ;;  %v4067_v58 = vpack.c.bf16 %v1546_v56, %v1545_v55  ;;  %4066 = vmatpush3.bf16.msra.mxu0 %v4065_v57 }
 0x598   : > { %v1516_v63 = vadd.f32 %v1513_v54, %v1509_v60  ;;  %v1530_v54 = vld [vmem:[#allocation18 + $0x58] sm:$0xff] }
 0x599   : > { %v6125_v6 = vmax.f32 %v1515_v52, 0.0  ;;  %v4069_v60 = vpack.c.bf16 %v1530_v54, %v1529_v59  ;;  %4068 = vmatprep.subr.bf16.mxu0 %v4067_v58  ;;  %v1547_v52 = vld [vmem:[#allocation18 + $0xe0] sm:$0xff]  ;;  %v5337_v59 = vmov 0.0|0.0  }
 0x59a   : > { %v6127_v14 = vmax.f32 %v1516_v63, 0.0  ;;  %v1548_v63 = vld [vmem:[#allocation18 + $0xe8] sm:$0xff]  ;;  %4079 = vmatprep.subr.bf16.mxu1 %v5337_v59 }
 0x59b   : > { %1554 = vrot.lane.b32.xlu1 %v6125_v6, %s5326_s9  ;;  %4070 = vmatpush3.bf16.msra.mxu0 %v4069_v60  ;;  %v4071_v4 = vpack.c.bf16 %v1548_v63, %v1547_v52 }
 0x59c   : > { %v4570_v27 = vpack.i.bf16 %v5318_v1, %v6127_v14 }
 0x59d   : > { %4072 = vmatprep.subr.bf16.mxu0 %v4071_v4 }
 0x59e   : > { %4571 = vrot.lane.b32.xlu0 %v4570_v27, %s5326_s9  ;;  %v1668_v27 = vand.u32 7, %v5895_v2 }
 0x59f   : > { %4074 = vmatpush3.bf16.msra.mxu0 %v4073_v8 }
 0x5a0   : > { %4076 = vmatprep.subr.bf16.mxu0 %v4075_v16  ;;  %vm1679_vm6 = vcmp.lt.s32.totalorder %v1668_v27, 7  ;;  %vm1676_vm8 = vcmp.ge.s32.totalorder %v1668_v27, 1 }
 0x5a1   : > { %v3786_v12 = vsel %vm1679_vm6, 1.0, %v5318_v1  ;;  %v6149_v58 = vsel %vm1676_vm8, 1.0, %v5318_v1  ;;  %vm5340_vm6 = vmmov 0   ;;  %vm1829_vm8 = vcmask 523264  }
 0x5a2   : > { %3919 = vmatprep.mubr.msk.f32.mxu1 %vm5340_vm6, %v5318_v1 }
 0x5a3   : > { %4078 = vmatpush3.bf16.msra.mxu0 %v4077_v18  ;;  %v1654_v18 = vld [vmem:[#allocation13] sm:$0xff] }
 0x5a4   : > { %4103 = vmatprep.subr.bf16.mxu0 %v5337_v59 }
 0x60d   : > { %v1555_v30 = vpop.permute.xlu1 %1554 }
 0x610   : > { %v4572_v19 = vpop.permute.xlu0 %4571 }
 0x611   : > { %v4574_v23 = vunpack.i.h.bf16 %v4572_v19  ;;  %v4573_v25 = vunpack.i.l.bf16 %v4572_v19  ;;  %v1655_v19 = vld [vmem:[#allocation15] sm:$0xff] }
 0x613   : > { %v1567_v31 = vmax.f32 %v4574_v23, 0.0  ;;  %v1560_v34 = vsel %vm1094_vm10, %v1555_v30, %v4573_v25  ;;  %v1561_v35 = vsel %vm1094_vm10, %v4573_v25, %v4574_v23 }
 0x614   : > { %v1564_v36 = vmax.f32 %v6125_v6, %v1560_v34  ;;  %v1565_v37 = vmax.f32 %v6127_v14, %v1561_v35 }
 0x616   : > { %1571 = vrot.lane.b32.xlu1 %v1564_v36, %s6800_s29  ;;  %v4575_v40 = vpack.i.bf16 %v1567_v31, %v1565_v37 }
 0x618   : > { %4576 = vrot.lane.b32.xlu0 %v4575_v40, %s6800_s29 }
 0x61a   : > { %1684 = vrot.lane.b32.xlu1 %v3786_v12, %s5321_s4 }
 0x61e   : > { %1693 = vrot.lane.b32.xlu1 %v3786_v12, %s5334_s1 }
 0x622   : > { %1701 = vrot.lane.b32.xlu1 %v3786_v12, %s5322_s28  ;;  %s5339_s28 = smov 119  }
 0x688   : > { %v1572_v46 = vpop.permute.xlu1 %1571 }
 0x68a   : > { %v4577_v43 = vpop.permute.xlu0 %4576 }
 0x68b   : > { %v4579_v44 = vunpack.i.h.bf16 %v4577_v43  ;;  %v4578_v45 = vunpack.i.l.bf16 %v4577_v43 }
 0x68c   : > { %v6157_v54 = vpop.permute.xlu1 %1684 }
 0x68d   : > { %v1578_v47 = vsel %vm6799_vm15, %v4578_v45, %v4579_v44  ;;  %v1577_v29 = vsel %vm6799_vm15, %v1572_v46, %v4578_v45  ;;  %v6191_v44 = vld [vmem:[#allocation12] sm:$0xff]  ;;  %vm2313_vm15 = vcmask 80896  }
 0x68e   : > { %v1582_v51 = vmax.f32 %v1565_v37, %v1578_v47  ;;  %v1581_v53 = vmax.f32 %v1564_v36, %v1577_v29  ;;  %v1821_v46 = vld [vmem:[#allocation19] sm:$0xff]  ;;  %v1822_v47 = vld [vmem:[#allocation19 + $0x8] sm:$0xff]  ;;  %v1823_v29 = vld [vmem:[#allocation19 + $0x10] sm:$0xff] }
 0x690   : > { %1647 = vmatprep.mubr.f32.mxu0 %v1582_v51  ;;  %v6167_v8 = vpop.permute.xlu1 %1693  ;;  %v4092_v51 = vpack.c.bf16 %v1822_v47, %v1821_v46 }
 0x691   : > { %1648 = vmatmul.mubr.f32.vlgmr.msra.gmra.mrb[0].mxu0 %v1581_v53  ;;  %v1824_v53 = vld [vmem:[#allocation19 + $0x18] sm:$0xff] }
 0x692   : > { %3959 = vmatprep.mubr.msk.f32.mxu0 %vm5340_vm6, %v5318_v1 }
 0x694   : > { %v6180_v16 = vpop.permute.xlu1 %1701 }
 0x764   : > { %v3841_v55 = vpop.f32.mrb[0].mxu0 }
 0x765   : > { %v3842_v56 = vpop.f32.mrb[1].mxu0 }
 0x766   : > { %v3843_v57 = vadd.f32 %v3842_v56, %v3841_v55 }
 0x768   : > { %1657 = vrot.lane.b32.xlu0 %v3843_v57, %s5335_s10  ;;  %v4095_v57 = vpack.c.bf16 %v1824_v53, %v1823_v29 }
 0x76c   : > { %1689 = vrot.lane.b32.xlu0 %v6149_v58, %s5336_s16 }
 0x770   : > { %1697 = vrot.lane.b32.xlu0 %v6149_v58, %s5320_s0  ;;  %s5338_s0 = smov 120  }
 0x7da   : > { %v1658_v60 = vpop.permute.xlu0 %1657 }
 0x7db   : > { %v1661_v52 = vsel %vm1660_vm9, 0.0, %v1658_v60 }
 0x7dc   : > { %v1663_v63 = vsel %vm1662_vm3, %v1661_v52, 0.0 }
 0x7dd   : > { %1706 = vrot.lane.b32.xlu0 %v1663_v63, %s5326_s9  ;;  %v1687_v0 = vmul.f32 %v6157_v54, %v1663_v63  ;;  %v1696_v11 = vmul.f32 %v6167_v8, %v1663_v63  ;;  %v1704_v17 = vmul.f32 %v6180_v16, %v1663_v63  ;;  %v1682_v23 = vmul.f32 %v6149_v58, %v1663_v63 }
 0x7de   : > { %v6163_v4 = vpop.permute.xlu0 %1689 }
 0x7df   : > { %1710 = vrot.lane.b32.xlu1 %v1687_v0, %s5327_s3  ;;  %v1692_v5 = vmul.f32 %v6163_v4, %v1663_v63  ;;  %v1826_v0 = vld [vmem:[#allocation19 + $0x28] sm:$0xff] }
 0x7e1   : > { %1714 = vrot.lane.b32.xlu0 %v1692_v5, %s5338_s0 }
 0x7e2   : > { %v6170_v10 = vpop.permute.xlu0 %1697 }
 0x7e3   : > { %1717 = vrot.lane.b32.xlu1 %v1663_v63, %s5339_s28  ;;  %v1700_v13 = vmul.f32 %v6170_v10, %v1663_v63 }
 0x7e5   : > { %1721 = vrot.lane.b32.xlu0 %v1696_v11, %s5341_s2 }
 0x7e7   : > { %1725 = vrot.lane.b32.xlu1 %v1700_v13, %s6800_s29 }
 0x7e9   : > { %1728 = vrot.lane.b32.xlu0 %v1663_v63, %s6796_s5  ;;  %v1825_v63 = vld [vmem:[#allocation19 + $0x20] sm:$0xff]  ;;  %s5350_s5 = smov 12  }
 0x7ea   : > { %v4098_v13 = vpack.c.bf16 %v1826_v0, %v1825_v63 }
 0x7eb   : > { %1732 = vrot.lane.b32.xlu1 %v1704_v17, %s6794_s7  ;;  %s5348_s7 = smov 3  }
 0x7ed   : > { %1810 = vperm.xlu0 %4533, %v1654_v18   ;;  %v1827_v18 = vld [vmem:[#allocation19 + $0x30] sm:$0xff] }
 0x7ef   : > { %1816 = vperm.xlu1 %4534, %v1655_v19   ;;  %v1828_v19 = vld [vmem:[#allocation19 + $0x38] sm:$0xff] }
 0x84f   : > { %v1707_v25 = vpop.permute.xlu0 %1706 }
 0x850   : > { %v4080_v27 = vpack.c.bf16 %v1707_v25, %v1682_v23  ;;  %v4101_v25 = vpack.c.bf16 %v1828_v19, %v1827_v18 }
 0x851   : > { %v1711_v30 = vpop.permute.xlu1 %1710 }
 0x852   : > { %4081 = vmatpush3.bf16.msra.mxu1 %v4080_v27  ;;  %v1926_v27 = vand.u32 3, %v5895_v2 }
 0x853   : > { %v1715_v31 = vpop.permute.xlu0 %1714  ;;  %4082 = vmatprep.subr.bf16.mxu1 %v5337_v59 }
 0x854   : > { %v4083_v34 = vpack.c.bf16 %v1715_v31, %v1711_v30  ;;  %vm1937_vm2 = vcmp.lt.s32.totalorder %v1926_v27, 3  ;;  %vm1934_vm0 = vcmp.ge.s32.totalorder %v1926_v27, 1 }
 0x855   : > { %v1718_v35 = vpop.permute.xlu1 %1717 }
 0x856   : > { %4084 = vmatpush3.bf16.msra.mxu1 %v4083_v34  ;;  %v3790_v34 = vsel %vm1937_vm2, 1.0, %v5318_v1  ;;  %vm1918_vm2 = vcmask 39936  }
 0x857   : > { %v1722_v36 = vpop.permute.xlu0 %1721  ;;  %4085 = vmatprep.subr.bf16.mxu1 %v5337_v59 }
 0x858   : > { %v4086_v37 = vpack.c.bf16 %v1722_v36, %v1718_v35 }
 0x859   : > { %v1726_v40 = vpop.permute.xlu1 %1725 }
 0x85a   : > { %4087 = vmatpush3.bf16.msra.mxu1 %v4086_v37 }
 0x85b   : > { %v1729_v12 = vpop.permute.xlu0 %1728  ;;  %4088 = vmatprep.subr.bf16.mxu1 %v5337_v59 }
 0x85c   : > { %v4089_v43 = vpack.c.bf16 %v1729_v12, %v1726_v40  ;;  %v6226_v12 = vsel %vm1934_vm0, 1.0, %v5318_v1 }
 0x85d   : > { %v1733_v45 = vpop.permute.xlu1 %1732 }
 0x85e   : > { %4090 = vmatpush3.bf16.msra.mxu1 %v4089_v43 }
 0x85f   : > { %3917 = vmatprep.subr.mxu1 %v5318_v1 }
 0x862   : > { %3918 = vmatpush3.msra.mxu1 %v1733_v45 }
 0x863   : > { %3920 = vmatmul.mubr.msk.f32.vlgmr.msra.gmra.mrb[4].mxu1 %vm1428_vm5, %v6191_v44  ;;  %4091 = vmatprep.subr.bf16.mxu1 %v5337_v59 }
 0x864   : > { %3938 = vmatprep.mubr.msk.f32.mxu1 %vm5340_vm6, %v5318_v1  ;;  %4093 = vmatpush3.bf16.msra.mxu1 %v4092_v51 }
 0x865   : > { %4094 = vmatprep.subr.bf16.mxu1 %v5337_v59 }
 0x868   : > { %4096 = vmatpush3.bf16.msra.mxu1 %v4095_v57 }
 0x869   : > { %4097 = vmatprep.subr.bf16.mxu1 %v5337_v59 }
 0x86c   : > { %v6198_v55 = vpop.permute.xlu0 %1810  ;;  %4099 = vmatpush3.bf16.msra.mxu1 %v4098_v13 }
 0x86d   : > { %4100 = vmatprep.subr.bf16.mxu1 %v5337_v59 }
 0x86e   : > { %v6202_v5 = vpop.permute.xlu1 %1816 }
 0x870   : > { %4102 = vmatpush3.bf16.msra.mxu1 %v4101_v25 }
 0x871   : > { %4115 = vmatprep.subr.bf16.mxu1 %v5337_v59 }
 0x936   : > { %v1804_v56 = vpop.f32.mrb[4].mxu1 }
 0x937   : > { %v1813_v60 = vmul.f32 %v6198_v55, %v1804_v56  ;;  %v3921_v52 = vpop.f32.mrb[5].mxu1 }
 0x939   : > { %v6205_v11 = vadd.f32 %v6202_v5, %v1813_v60 }
 0x93b   : > { %v1820_v17 = vmax.f32 %v6205_v11, 0.0 }
 0x93d   : > { %v1830_v23 = vsel %vm1829_vm8, %v1820_v17, 0.0 }
 0x93e   : > { %1832 = vrot.lane.b32.xlu0 %v1830_v23, %s5326_s9 }
 0x9b0   : > { %v1833_v30 = vpop.permute.xlu0 %1832 }
 0x9b1   : > { %v1835_v31 = vmax.f32 %v1830_v23, %v1833_v30 }
 0x9b3   : > { %1837 = vrot.lane.b32.xlu1 %v1835_v31, %s5338_s0 }
 0x9b7   : > { %1942 = vrot.lane.b32.xlu1 %v3790_v34, %s5321_s4 }
 0x9bb   : > { %1951 = vrot.lane.b32.xlu1 %v3790_v34, %s5342_s18 }
 0x9bf   : > { %1959 = vrot.lane.b32.xlu1 %v3790_v34, %s5334_s1  ;;  %s5345_s1 = smov 124  }
 0xa25   : > { %v1838_v35 = vpop.permute.xlu1 %1837 }
 0xa26   : > { %v1840_v36 = vmax.f32 %v1835_v31, %v1838_v35 }
 0xa28   : > { %3939 = vmatmul.mubr.msk.f32.vlgmr.msra.gmra.mrb[6].mxu1 %vm1829_vm8, %v1840_v36 }
 0xa29   : > { %3966 = vmatprep.mubr.msk.f32.mxu1 %vm5340_vm6, %v5318_v1  ;;  %v6232_v43 = vpop.permute.xlu1 %1942 }
 0xa2d   : > { %v6242_v56 = vpop.permute.xlu1 %1951 }
 0xa31   : > { %v6251_v63 = vpop.permute.xlu1 %1959 }
 0xafb   : > { %v1910_v37 = vpop.f32.mrb[6].mxu1 }
 0xafc   : > { %1915 = vrot.lane.b32.xlu0 %v1910_v37, %s5343_s27  ;;  %v3940_v40 = vpop.f32.mrb[7].mxu1 }
 0xb00   : > { %1947 = vrot.lane.b32.xlu0 %v6226_v12, %s5344_s6 }
 0xb04   : > { %1955 = vrot.lane.b32.xlu0 %v6226_v12, %s5336_s16 }
 0xb6e   : > { %v1916_v45 = vpop.permute.xlu0 %1915 }
 0xb6f   : > { %v1919_v46 = vsel %vm1918_vm2, 0.0, %v1916_v45  ;;  %v2066_v45 = vld [vmem:[#allocation21] sm:$0xff] }
 0xb70   : > { %v1921_v47 = vsel %vm1920_vm14, %v1919_v46, 0.0  ;;  %v2067_v46 = vld [vmem:[#allocation21 + $0x8] sm:$0xff] }
 0xb71   : > { %1964 = vrot.lane.b32.xlu0 %v1921_v47, %s5326_s9  ;;  %v1945_v29 = vmul.f32 %v6232_v43, %v1921_v47  ;;  %v1954_v60 = vmul.f32 %v6242_v56, %v1921_v47  ;;  %v1962_v0 = vmul.f32 %v6251_v63, %v1921_v47  ;;  %v1940_v13 = vmul.f32 %v6226_v12, %v1921_v47 }
 0xb72   : > { %v6238_v51 = vpop.permute.xlu0 %1947 }
 0xb73   : > { %1968 = vrot.lane.b32.xlu1 %v1945_v29, %s5327_s3  ;;  %v1950_v53 = vmul.f32 %v6238_v51, %v1921_v47 }
 0xb75   : > { %1972 = vrot.lane.b32.xlu0 %v1950_v53, %s5345_s1 }
 0xb76   : > { %v6245_v57 = vpop.permute.xlu0 %1955 }
 0xb77   : > { %1975 = vrot.lane.b32.xlu1 %v1921_v47, %s5346_s17  ;;  %v1958_v52 = vmul.f32 %v6245_v57, %v1921_v47 }
 0xb79   : > { %1979 = vrot.lane.b32.xlu0 %v1954_v60, %s5347_s8 }
 0xb7b   : > { %1983 = vrot.lane.b32.xlu1 %v1958_v52, %s5338_s0 }
 0xb7d   : > { %1986 = vrot.lane.b32.xlu0 %v1921_v47, %s5339_s28  ;;  %v4116_v47 = vpack.c.bf16 %v2067_v46, %v2066_v45 }
 0xb7f   : > { %1990 = vrot.lane.b32.xlu1 %v1962_v0, %s5341_s2  ;;  %4117 = vmatpush3.bf16.msra.mxu1 %v4116_v47 }
 0xb80   : > { %4118 = vmatprep.subr.bf16.mxu1 %v5337_v59 }
 0xbe3   : > { %v1965_v18 = vpop.permute.xlu0 %1964 }
 0xbe4   : > { %v4104_v19 = vpack.c.bf16 %v1965_v18, %v1940_v13  ;;  %v2164_v18 = vand.u32 1, %v5895_v2 }
 0xbe5   : > { %v1969_v23 = vpop.permute.xlu1 %1968 }
 0xbe6   : > { %4105 = vmatpush3.bf16.msra.mxu0 %v4104_v19  ;;  %vm2172_vm0 = vcmp.ge.s32.totalorder %v2164_v18, 1  ;;  %vm2175_vm1 = vcmp.lt.s32.totalorder %v2164_v18, 1 }
 0xbe7   : > { %v1973_v25 = vpop.permute.xlu0 %1972  ;;  %4106 = vmatprep.subr.bf16.mxu0 %v5337_v59 }
 0xbe8   : > { %v4107_v27 = vpack.c.bf16 %v1973_v25, %v1969_v23  ;;  %v6279_v23 = vsel %vm2172_vm0, 1.0, %v5318_v1  ;;  %v3794_v25 = vsel %vm2175_vm1, 1.0, %v5318_v1  ;;  %vm2156_vm1 = vcmask 23552  }
 0xbe9   : > { %v1976_v30 = vpop.permute.xlu1 %1975  ;;  %vm2158_vm0 = vcmask 56320  }
 0xbea   : > { %4108 = vmatpush3.bf16.msra.mxu0 %v4107_v27 }
 0xbeb   : > { %v1980_v31 = vpop.permute.xlu0 %1979  ;;  %4109 = vmatprep.subr.bf16.mxu0 %v5337_v59 }
 0xbec   : > { %v4110_v34 = vpack.c.bf16 %v1980_v31, %v1976_v30  ;;  %v4580_v30 = vpack.i.bf16 %v6279_v23, %v3794_v25 }
 0xbed   : > { %v1984_v35 = vpop.permute.xlu1 %1983 }
 0xbee   : > { %4111 = vmatpush3.bf16.msra.mxu0 %v4110_v34 }
 0xbef   : > { %v1987_v36 = vpop.permute.xlu0 %1986  ;;  %4112 = vmatprep.subr.bf16.mxu0 %v5337_v59 }
 0xbf0   : > { %v4113_v37 = vpack.c.bf16 %v1987_v36, %v1984_v35 }
 0xbf1   : > { %v1991_v40 = vpop.permute.xlu1 %1990 }
 0xbf2   : > { %4114 = vmatpush3.bf16.msra.mxu0 %v4113_v37 }
 0xbf3   : > { %3957 = vmatprep.subr.mxu0 %v5318_v1 }
 0xbf6   : > { %3958 = vmatpush3.msra.mxu0 %v1991_v40 }
 0xbf7   : > { %3960 = vmatmul.mubr.msk.f32.vlgmr.msra.gmra.mrb[2].mxu0 %vm1428_vm5, %v6191_v44  ;;  %4130 = vmatprep.subr.bf16.mxu0 %v5337_v59 }
 0xbf8   : > { %4008 = vmatprep.mubr.msk.f32.mxu0 %vm5340_vm6, %v5318_v1 }
 0xcca   : > { %v2059_v29 = vpop.f32.mrb[2].mxu0 }
 0xccb   : > { %v2063_v53 = vmul.f32 %v2059_v29, %v6198_v55  ;;  %v3961_v60 = vpop.f32.mrb[3].mxu0 }
 0xccd   : > { %v6270_v52 = vadd.f32 %v2063_v53, %v6202_v5 }
 0xccf   : > { %v2065_v0 = vmax.f32 %v6270_v52, 0.0 }
 0xcd1   : > { %v2068_v13 = vsel %vm1039_vm7, %v2065_v0, 0.0 }
 0xcd2   : > { %2070 = vrot.lane.b32.xlu0 %v2068_v13, %s5326_s9 }
 0xd44   : > { %v2071_v19 = vpop.permute.xlu0 %2070 }
 0xd45   : > { %v2073_v27 = vmax.f32 %v2068_v13, %v2071_v19 }
 0xd47   : > { %2075 = vrot.lane.b32.xlu1 %v2073_v27, %s5345_s1 }
 0xd4b   : > { %4581 = vrot.lane.b32.xlu1 %v4580_v30, %s5321_s4  ;;  %s5349_s4 = smov 125  }
 0xd4f   : > { %2193 = vrot.lane.b32.xlu1 %v6279_v23, %s5344_s6 }
 0xdb9   : > { %v2076_v31 = vpop.permute.xlu1 %2075 }
 0xdba   : > { %v2078_v2 = vmax.f32 %v2073_v27, %v2076_v31 }
 0xdbc   : > { %3967 = vmatmul.mubr.msk.f32.vlgmr.msra.gmra.mrb[8].mxu1 %vm1039_vm7, %v2078_v2 }
 0xdbd   : > { %3987 = vmatprep.mubr.msk.f32.mxu1 %vm5340_vm6, %v5318_v1  ;;  %v4582_v36 = vpop.permute.xlu1 %4581 }
 0xdbe   : > { %v6293_v37 = vunpack.i.h.bf16 %v4582_v36  ;;  %v6295_v40 = vunpack.i.l.bf16 %v4582_v36 }
 0xdc1   : > { %v6304_v18 = vpop.permute.xlu1 %2193 }
 0xe8f   : > { %v2148_v34 = vpop.f32.mrb[8].mxu1 }
 0xe90   : > { %2153 = vrot.lane.b32.xlu0 %v2148_v34, %s5348_s7  ;;  %v3968_v35 = vpop.f32.mrb[9].mxu1 }
 0xe94   : > { %2189 = vrot.lane.b32.xlu0 %v3794_v25, %s5344_s6 }
 0xe98   : > { %2197 = vrot.lane.b32.xlu0 %v3794_v25, %s5342_s18 }
 0xf02   : > { %v2154_v45 = vpop.permute.xlu0 %2153 }
 0xf03   : > { %v2157_v46 = vsel %vm2156_vm1, 0.0, %v2154_v45 }
 0xf04   : > { %v2159_v47 = vsel %vm2158_vm0, %v2157_v46, 0.0 }
 0xf05   : > { %2202 = vrot.lane.b32.xlu1 %v2159_v47, %s5326_s9  ;;  %v2183_v29 = vmul.f32 %v6295_v40, %v2159_v47  ;;  %v2188_v53 = vmul.f32 %v6293_v37, %v2159_v47  ;;  %v2196_v19 = vmul.f32 %v6304_v18, %v2159_v47  ;;  %v2178_v31 = vmul.f32 %v6279_v23, %v2159_v47 }
 0xf06   : > { %v6302_v60 = vpop.permute.xlu0 %2189 }
 0xf07   : > { %v4585_v13 = vpack.i.bf16 %v2188_v53, %v2183_v29  ;;  %v2192_v25 = vmul.f32 %v6302_v60, %v2159_v47 }
 0xf09   : > { %2213 = vrot.lane.b32.xlu1 %v2159_v47, %s5349_s4  ;;  %4586 = vrot.lane.b32.xlu0 %v4585_v13, %s5327_s3 }
 0xf0a   : > { %v6310_v27 = vpop.permute.xlu0 %2197 }
 0xf0b   : > { %v2200_v30 = vmul.f32 %v6310_v27, %v2159_v47 }
 0xf0d   : > { %2221 = vrot.lane.b32.xlu1 %v2196_v19, %s5345_s1  ;;  %2217 = vrot.lane.b32.xlu0 %v2192_v25, %s5345_s1 }
 0xf11   : > { %2228 = vrot.lane.b32.xlu1 %v2200_v30, %s5347_s8  ;;  %2224 = vrot.lane.b32.xlu0 %v2159_v47, %s5346_s17 }
 0xf15   : > { %4591 = vrot.lane.b32.xlu1 %v5318_v1, %s5344_s6  ;;  %s6855_s6 = smov 17  }
 0xf19   : > { %2336 = vrot.lane.b32.xlu1 %v5318_v1, %s5336_s16 }
 0xf77   : > { %v2203_v2 = vpop.permute.xlu1 %2202 }
 0xf78   : > { %v4119_v34 = vpack.c.bf16 %v2203_v2, %v2178_v31 }
 0xf7a   : > { %4120 = vmatpush3.bf16.msra.mxu1 %v4119_v34 }
 0xf7b   : > { %v4587_v35 = vpop.permute.xlu0 %4586  ;;  %4121 = vmatprep.subr.bf16.mxu1 %v5337_v59  ;;  %v2214_v29 = vpop.permute.xlu1 %2213 }
 0xf7c   : > { %v4589_v36 = vunpack.i.h.bf16 %v4587_v35  ;;  %v4588_v45 = vunpack.i.l.bf16 %v4587_v35 }
 0xf7e   : > { %v4122_v46 = vpack.c.bf16 %v4589_v36, %v4588_v45 }
 0xf7f   : > { %v2218_v53 = vpop.permute.xlu0 %2217  ;;  %v2222_v25 = vpop.permute.xlu1 %2221 }
 0xf80   : > { %4123 = vmatpush3.bf16.msra.mxu1 %v4122_v46  ;;  %v4125_v13 = vpack.c.bf16 %v2218_v53, %v2214_v29 }
 0xf81   : > { %4124 = vmatprep.subr.bf16.mxu1 %v5337_v59 }
 0xf83   : > { %v2225_v19 = vpop.permute.xlu0 %2224  ;;  %v2229_v30 = vpop.permute.xlu1 %2228 }
 0xf84   : > { %4126 = vmatpush3.bf16.msra.mxu1 %v4125_v13  ;;  %v4128_v47 = vpack.c.bf16 %v2225_v19, %v2222_v25 }
 0xf85   : > { %4127 = vmatprep.subr.bf16.mxu1 %v5337_v59 }
 0xf88   : > { %4129 = vmatpush3.bf16.msra.mxu1 %v4128_v47 }
 0xf89   : > { %3985 = vmatprep.subr.mxu1 %v5318_v1 }
 0xf8c   : > { %3986 = vmatpush3.msra.mxu1 %v2229_v30 }
 0xf8d   : > { %3988 = vmatmul.mubr.msk.f32.vlgmr.msra.gmra.mrb[10].mxu1 %vm1428_vm5, %v6191_v44  ;;  %4142 = vmatprep.subr.bf16.mxu1 %v5337_v59  ;;  %v4592_v44 = vpop.permute.xlu1 %4591 }
 0xf8e   : > { %v4594_v45 = vunpack.i.h.bf16 %v4592_v44  ;;  %v4593_v46 = vunpack.i.l.bf16 %v4592_v44  ;;  %v2306_v44 = vld [vmem:[%s6744_s12] sm:$0xff] }
 0xf91   : > { %v2337_v47 = vpop.permute.xlu1 %2336 }
0x1060   : > { %v2297_v31 = vpop.f32.mrb[10].mxu1 }
0x1061   : > { %v2301_v2 = vmul.f32 %v2297_v31, %v6198_v55  ;;  %v3989_v34 = vpop.f32.mrb[11].mxu1 }
0x1063   : > { %v2302_v35 = vadd.f32 %v2301_v2, %v6202_v5 }
0x1065   : > { %v2303_v36 = vmax.f32 %v2302_v35, 0.0  ;;  %v2305_v35 = vld [vmem:[%s6743_s11] sm:$0xff] }
0x1067   : > { %2308 = vrot.lane.b32.xlu0 %v2303_v36, %s5342_s18  ;;  %s6859_s18 = smov 94  }
0x106b   : > { %2332 = vrot.lane.b32.xlu0 %v5318_v1, %s5336_s16  ;;  %s6858_s16 = sld [smem:[#allocation45_spill]] }
0x106f   : > { %2340 = vrot.lane.b32.xlu0 %v5318_v1, %s5350_s5  ;;  %s5351_s5 = smov 116  }
0x10d9   : > { %v2309_v29 = vpop.permute.xlu0 %2308 }
0x10da   : > { %v2312_v53 = vsel %vm2311_vm13, 0.0, %v2309_v29  ;;  %vm2634_vm13 = vcmask 31744  }
0x10db   : > { %v2314_v55 = vsel %vm2313_vm15, %v2312_v53, 0.0 }
0x10dc   : > { %2345 = vrot.lane.b32.xlu1 %v2314_v55, %s5327_s3  ;;  %v2326_v5 = vmul.f32 %v4593_v46, %v2314_v55  ;;  %v2331_v13 = vmul.f32 %v4594_v45, %v2314_v55  ;;  %v2339_v30 = vmul.f32 %v2337_v47, %v2314_v55  ;;  %v2321_v45 = vmul.f32 0.0, %v2314_v55 }
0x10dd   : > { %v2333_v19 = vpop.permute.xlu0 %2332 }
0x10de   : > { %v4595_v25 = vpack.i.bf16 %v2331_v13, %v2326_v5  ;;  %v2335_v31 = vmul.f32 %v2333_v19, %v2314_v55 }
0x10e0   : > { %2356 = vrot.lane.b32.xlu1 %v2314_v55, %s5347_s8  ;;  %4596 = vrot.lane.b32.xlu0 %v4595_v25, %s5345_s1 }
0x10e1   : > { %v2341_v2 = vpop.permute.xlu0 %2340 }
0x10e2   : > { %v2343_v34 = vmul.f32 %v2341_v2, %v2314_v55 }
0x10e4   : > { %2364 = vrot.lane.b32.xlu1 %v2339_v30, %s5338_s0  ;;  %2360 = vrot.lane.b32.xlu0 %v2335_v31, %s5338_s0 }
0x10e8   : > { %2367 = vrot.lane.b32.xlu0 %v2314_v55, %s5341_s2  ;;  %2371 = vrot.lane.b32.xlu1 %v2343_v34, %s5351_s5  ;;  %v2304_v55 = vld [vmem:[#allocation16] sm:$0xff] }
0x10ec   : > { %2449 = vperm.xlu0 %4533, %v2305_v35   ;;  %2455 = vperm.xlu1 %4534, %v2306_v44  }
0x10f0   : > { %2465 = vrot.lane.b32.xlu0 %v2303_v36, %s5348_s7 }
0x114e   : > { %v2346_v46 = vpop.permute.xlu1 %2345 }
0x114f   : > { %v4131_v29 = vpack.c.bf16 %v2346_v46, %v2321_v45 }
0x1151   : > { %4132 = vmatpush3.bf16.msra.mxu0 %v4131_v29 }
0x1152   : > { %v4597_v53 = vpop.permute.xlu0 %4596  ;;  %4133 = vmatprep.subr.bf16.mxu0 %v5337_v59  ;;  %v2357_v25 = vpop.permute.xlu1 %2356 }
0x1153   : > { %v4599_v5 = vunpack.i.h.bf16 %v4597_v53  ;;  %v4598_v13 = vunpack.i.l.bf16 %v4597_v53 }
0x1155   : > { %v4134_v19 = vpack.c.bf16 %v4599_v5, %v4598_v13 }
0x1156   : > { %v2361_v47 = vpop.permute.xlu0 %2360  ;;  %v2365_v2 = vpop.permute.xlu1 %2364 }
0x1157   : > { %4135 = vmatpush3.bf16.msra.mxu0 %v4134_v19  ;;  %v4137_v30 = vpack.c.bf16 %v2361_v47, %v2357_v25 }
0x1158   : > { %4136 = vmatprep.subr.bf16.mxu0 %v5337_v59 }
0x115a   : > { %v2368_v31 = vpop.permute.xlu0 %2367  ;;  %v2372_v34 = vpop.permute.xlu1 %2371 }
0x115b   : > { %4138 = vmatpush3.bf16.msra.mxu0 %v4137_v30  ;;  %v4140_v36 = vpack.c.bf16 %v2368_v31, %v2365_v2 }
0x115c   : > { %4139 = vmatprep.subr.bf16.mxu0 %v5337_v59 }
0x115f   : > { %4141 = vmatpush3.bf16.msra.mxu0 %v4140_v36 }
0x1160   : > { %4006 = vmatprep.subr.mxu0 %v5318_v1 }
0x1163   : > { %4007 = vmatpush3.msra.mxu0 %v2372_v34 }
0x1164   : > { %4009 = vmatmul.mubr.msk.f32.vlgmr.msra.gmra.mrb[4].mxu0 %vm1428_vm5, %v2304_v55  ;;  %4011 = vmatprep.subr.mxu0 %v5318_v1 }
0x1165   : > { %4013 = vmatprep.mubr.msk.f32.mxu0 %vm5340_vm6, %v5318_v1 }
0x116b   : > { %v2450_v35 = vpop.permute.xlu0 %2449  ;;  %v2456_v29 = vpop.permute.xlu1 %2455 }
0x116f   : > { %v2466_v13 = vpop.permute.xlu0 %2465 }
0x1170   : > { %v2471_v19 = vsel %vm2156_vm1, 0.0, %v2466_v13 }
0x1171   : > { %v2473_v25 = vsel %vm2158_vm0, %v2471_v19, 0.0 }
0x1172   : > { %v2477_v2 = vmul.f32 %v6295_v40, %v2473_v25  ;;  %v2475_v36 = vmul.f32 %v6279_v23, %v2473_v25  ;;  %v2483_v19 = vmul.f32 %v2473_v25, %v6304_v18 }
0x1237   : > { %v2443_v44 = vpop.f32.mrb[4].mxu0 }
0x1238   : > { %v2452_v45 = vmul.f32 %v2450_v35, %v2443_v44  ;;  %v4010_v46 = vpop.f32.mrb[5].mxu0 }
0x123a   : > { %v2458_v53 = vadd.f32 %v2456_v29, %v2452_v45  ;;  %v2479_v29 = vmul.f32 %v6293_v37, %v2473_v25 }
0x123c   : > { %v2459_v5 = vmax.f32 %v2458_v53, 0.0 }
0x123e   : > { %2467 = vrot.lane.b32.xlu1 %v2459_v5, %s5348_s7 }
0x12b0   : > { %v2468_v47 = vpop.permute.xlu1 %2467 }
0x12b1   : > { %v2472_v30 = vsel %vm2156_vm1, 0.0, %v2468_v47 }
0x12b2   : > { %v2474_v31 = vsel %vm2158_vm0, %v2472_v30, 0.0  ;;  %v2485_v30 = vmul.f32 %v2473_v25, %v6310_v27 }
0x12b3   : > { %v4600_v55 = vpack.i.bf16 %v2474_v31, %v2473_v25  ;;  %v2478_v34 = vmul.f32 %v6295_v40, %v2474_v31  ;;  %v2476_v35 = vmul.f32 %v6279_v23, %v2474_v31  ;;  %v2480_v44 = vmul.f32 %v6293_v37, %v2474_v31 }
0x12b4   : > { %v2482_v5 = vmul.f32 %v2474_v31, %v6302_v60  ;;  %v2481_v23 = vmul.f32 %v2473_v25, %v6302_v60  ;;  %v2484_v40 = vmul.f32 %v2474_v31, %v6304_v18  ;;  %v2486_v47 = vmul.f32 %v2474_v31, %v6310_v27  ;;  %v2462_v60 = vld [vmem:[%s6746_s14] sm:$0xff]  ;;  %v6391_v31 = vld [vmem:[%s6745_s13 + $0x8] sm:$0xff] }
0x12b5   : > { %4601 = vrot.lane.b32.xlu0 %v4600_v55, %s5326_s9  ;;  %v4605_v45 = vpack.i.bf16 %v2478_v34, %v2477_v2  ;;  %v4143_v46 = vpack.c.bf16 %v2476_v35, %v2475_v36  ;;  %v4610_v53 = vpack.i.bf16 %v2480_v44, %v2479_v29  ;;  %v2463_v18 = vld [vmem:[%s6747_s15] sm:$0xff]  ;;  %3797 = vmatprep.mubr.msk.f32.mxu1 %vm1039_vm7, %v6391_v31 }
0x12b6   : > { %v4620_v13 = vpack.i.bf16 %v2482_v5, %v2481_v23  ;;  %v4625_v37 = vpack.i.bf16 %v2484_v40, %v2483_v19  ;;  %v4635_v2 = vpack.i.bf16 %v2486_v47, %v2485_v30 }
0x12b7   : > { %4606 = vrot.lane.b32.xlu1 %v4605_v45, %s5327_s3  ;;  %4144 = vmatpush1.bf16.msra.mxu1 %v4143_v46 }
0x12b8   : > { %4145 = vmatprep.subr.bf16.mxu1 %v5337_v59 }
0x12b9   : > { %4611 = vrot.lane.b32.xlu0 %v4610_v53, %s5327_s3 }
0x12bb   : > { %4616 = vrot.lane.b32.xlu1 %v4600_v55, %s5349_s4  ;;  %s3808_s4 = sshll.u32 %s6889_s30, 4 }
0x12bd   : > { %4621 = vrot.lane.b32.xlu0 %v4620_v13, %s5345_s1 }
0x12bf   : > { %4626 = vrot.lane.b32.xlu1 %v4625_v37, %s5345_s1 }
0x12c1   : > { %4631 = vrot.lane.b32.xlu0 %v4600_v55, %s5346_s17 }
0x12c3   : > { %4636 = vrot.lane.b32.xlu1 %v4635_v2, %s5347_s8 }
0x12c5   : > { %2622 = vperm.xlu0 %4533, %v2462_v60  }
0x12c7   : > { %2628 = vperm.xlu1 %4534, %v2463_v18  }
0x12cb   : > { %2715 = vrot.lane.b32.xlu1 %v2065_v0, %s5343_s27 }
0x1327   : > { %v4602_v27 = vpop.permute.xlu0 %4601 }
0x1328   : > { %v4604_v25 = vunpack.i.h.bf16 %v4602_v27  ;;  %v4603_v36 = vunpack.i.l.bf16 %v4602_v27 }
0x1329   : > { %v4607_v55 = vpop.permute.xlu1 %4606 }
0x132a   : > { %v4146_v34 = vpack.c.bf16 %v4604_v25, %v4603_v36  ;;  %v4609_v35 = vunpack.i.h.bf16 %v4607_v55  ;;  %v4608_v44 = vunpack.i.l.bf16 %v4607_v55 }
0x132b   : > { %v4612_v45 = vpop.permute.xlu0 %4611 }
0x132c   : > { %4147 = vmatpush1.bf16.msra.mxu1 %v4146_v34  ;;  %v4149_v46 = vpack.c.bf16 %v4609_v35, %v4608_v44  ;;  %v4614_v29 = vunpack.i.h.bf16 %v4612_v45  ;;  %v4613_v53 = vunpack.i.l.bf16 %v4612_v45 }
0x132d   : > { %4148 = vmatprep.subr.bf16.mxu1 %v5337_v59  ;;  %v4617_v5 = vpop.permute.xlu1 %4616 }
0x132e   : > { %v4152_v52 = vpack.c.bf16 %v4614_v29, %v4613_v53  ;;  %v4619_v0 = vunpack.i.h.bf16 %v4617_v5  ;;  %v4618_v23 = vunpack.i.l.bf16 %v4617_v5  ;;  %v2633_v29 = vld [vmem:[#allocation22] sm:$0xf] }
0x132f   : > { %v4622_v40 = vpop.permute.xlu0 %4621  ;;  %4012 = vmatpush3.msk.msra.mxu0 %vm1195_vm12, %v2633_v29  ;;  %vm6866_vm12 = vcmask 908288  }
0x1330   : > { %4150 = vmatpush1.bf16.msra.mxu1 %v4149_v46  ;;  %v4155_v13 = vpack.c.bf16 %v4619_v0, %v4618_v23  ;;  %v4624_v19 = vunpack.i.h.bf16 %v4622_v40  ;;  %v4623_v37 = vunpack.i.l.bf16 %v4622_v40  ;;  %v6408_v46 = vld [vmem:[%s6745_s13] sm:$0xff]  ;;  %4169 = vmatprep.subr.bf16.mxu0 %v5337_v59  ;;  %vm6868_vm15 = vmmov %vm6866_vm12 }
0x1331   : > { %4151 = vmatprep.subr.bf16.mxu1 %v5337_v59  ;;  %v4627_v47 = vpop.permute.xlu1 %4626  ;;  %vm6869_vm5 = vmmov %vm6866_vm12 }
0x1332   : > { %v4158_v30 = vpack.c.bf16 %v4624_v19, %v4623_v37  ;;  %v4629_v2 = vunpack.i.h.bf16 %v4627_v47  ;;  %v4628_v60 = vunpack.i.l.bf16 %v4627_v47 }
0x1333   : > { %v4632_v18 = vpop.permute.xlu0 %4631 }
0x1334   : > { %4153 = vmatpush1.bf16.msra.mxu1 %v4152_v52  ;;  %v4161_v27 = vpack.c.bf16 %v4629_v2, %v4628_v60  ;;  %v4634_v25 = vunpack.i.h.bf16 %v4632_v18  ;;  %v4633_v36 = vunpack.i.l.bf16 %v4632_v18 }
0x1335   : > { %4154 = vmatprep.subr.bf16.mxu1 %v5337_v59  ;;  %v4637_v55 = vpop.permute.xlu1 %4636 }
0x1336   : > { %v4164_v34 = vpack.c.bf16 %v4634_v25, %v4633_v36  ;;  %v4639_v35 = vunpack.i.h.bf16 %v4637_v55  ;;  %v4638_v44 = vunpack.i.l.bf16 %v4637_v55 }
0x1338   : > { %4156 = vmatpush1.bf16.msra.mxu1 %v4155_v13  ;;  %v4167_v45 = vpack.c.bf16 %v4639_v35, %v4638_v44 }
0x1339   : > { %4157 = vmatprep.subr.bf16.mxu1 %v5337_v59 }
0x133c   : > { %4159 = vmatpush1.bf16.msra.mxu1 %v4158_v30 }
0x133d   : > { %4160 = vmatprep.subr.bf16.mxu1 %v5337_v59 }
0x1340   : > { %4162 = vmatpush1.bf16.msra.mxu1 %v4161_v27 }
0x1341   : > { %4163 = vmatprep.subr.bf16.mxu1 %v5337_v59 }
0x1344   : > { %4165 = vmatpush1.bf16.msra.mxu1 %v4164_v34  ;;  %v6416_v53 = vpop.permute.xlu0 %2622 }
0x1345   : > { %4166 = vmatprep.subr.bf16.mxu1 %v5337_v59 }
0x1346   : > { %v6419_v23 = vpop.permute.xlu1 %2628 }
0x1348   : > { %4168 = vmatpush1.bf16.msra.mxu1 %v4167_v45 }
0x1349   : > { %4196 = vmatprep.subr.bf16.mxu1 %v5337_v59 }
0x134a   : > { %v2716_v47 = vpop.permute.xlu1 %2715 }
0x134b   : > { %2615 = vmatmul.mubr.f32.vlgmr.msra.gmra.mrb[12].mxu1 %v6408_v46  ;;  %v2720_v30 = vsel %vm1918_vm2, 0.0, %v2716_v47 }
0x134c   : > { %4020 = vmatprep.mubr.msk.f32.mxu1 %vm5340_vm6, %v5318_v1  ;;  %v2722_v2 = vsel %vm1920_vm14, %v2720_v30, 0.0 }
0x134d   : > { %v2726_v25 = vmul.f32 %v2722_v2, %v6232_v43  ;;  %v2724_v36 = vmul.f32 %v6226_v12, %v2722_v2 }
0x141e   : > { %v2616_v5 = vpop.f32.mrb[12].mxu1 }
0x141f   : > { %v2625_v52 = vmul.f32 %v6416_v53, %v2616_v5  ;;  %v2618_v0 = vpop.f32.mrb[13].mxu1  ;;  %v2728_v5 = vmul.f32 %v2722_v2, %v6238_v51 }
0x1421   : > { %v2631_v40 = vadd.f32 %v6419_v23, %v2625_v52 }
0x1423   : > { %v2632_v13 = vmax.f32 %v2631_v40, 0.0 }
0x1425   : > { %4014 = vmatmul.mubr.msk.f32.vlgmr.msra.gmra.mrb[6].mxu0 %vm2634_vm13, %v2632_v13  ;;  %v2732_v13 = vmul.f32 %v2722_v2, %v6245_v57  ;;  %vm6877_vm13 = vcmask 777216  }
0x1426   : > { %3800 = vmatprep.mubr.msk.f32.mxu0 %vm1039_vm7, %v6391_v31 }
0x14f8   : > { %v2707_v19 = vpop.f32.mrb[6].mxu0 }
0x14f9   : > { %2713 = vrot.lane.b32.xlu0 %v2707_v19, %s5343_s27  ;;  %v4015_v37 = vpop.f32.mrb[7].mxu0  ;;  %s6854_s27 = smov 110  }
0x14fa   : > { %v2734_v37 = vmul.f32 %v2722_v2, %v6251_v63 }
0x156b   : > { %v2714_v60 = vpop.permute.xlu0 %2713 }
0x156c   : > { %v2719_v18 = vsel %vm1918_vm2, 0.0, %v2714_v60  ;;  %vm6874_vm2 = vcmask 785408  }
0x156d   : > { %v2721_v27 = vsel %vm1920_vm14, %v2719_v18, 0.0  ;;  %vm6867_vm14 = vmmov %vm6866_vm12 }
0x156e   : > { %v4640_v55 = vpack.i.bf16 %v2722_v2, %v2721_v27  ;;  %v2725_v34 = vmul.f32 %v2721_v27, %v6232_v43  ;;  %v2723_v35 = vmul.f32 %v6226_v12, %v2721_v27  ;;  %v2727_v44 = vmul.f32 %v2721_v27, %v6238_v51  ;;  %vm6875_vm1 = vmmov %vm6874_vm2 }
0x156f   : > { %v2729_v0 = vmul.f32 %v2721_v27, %v6242_v56  ;;  %v2730_v12 = vmul.f32 %v2722_v2, %v6242_v56  ;;  %v2731_v43 = vmul.f32 %v2721_v27, %v6245_v57  ;;  %v2733_v19 = vmul.f32 %v2721_v27, %v6251_v63  ;;  %vm6876_vm0 = vmmov %vm6875_vm1 }
0x1570   : > { %4641 = vrot.lane.b32.xlu0 %v4640_v55, %s5326_s9  ;;  %v4645_v45 = vpack.i.bf16 %v2726_v25, %v2725_v34  ;;  %v4170_v29 = vpack.c.bf16 %v2724_v36, %v2723_v35  ;;  %v4650_v52 = vpack.i.bf16 %v2728_v5, %v2727_v44 }
0x1571   : > { %v4660_v40 = vpack.i.bf16 %v2730_v12, %v2729_v0  ;;  %v4665_v51 = vpack.i.bf16 %v2732_v13, %v2731_v43  ;;  %v4675_v47 = vpack.i.bf16 %v2734_v37, %v2733_v19 }
0x1572   : > { %4646 = vrot.lane.b32.xlu1 %v4645_v45, %s5327_s3  ;;  %4171 = vmatpush1.bf16.msra.mxu0 %v4170_v29 }
0x1573   : > { %4172 = vmatprep.subr.bf16.mxu0 %v5337_v59 }
0x1574   : > { %4651 = vrot.lane.b32.xlu0 %v4650_v52, %s5345_s1  ;;  %s6861_s1 = sld [smem:[#allocation46_spill]] }
0x1576   : > { %4656 = vrot.lane.b32.xlu1 %v4640_v55, %s5346_s17  ;;  %s6853_s17 = smov 111  }
0x1578   : > { %4661 = vrot.lane.b32.xlu0 %v4660_v40, %s5347_s8  ;;  %s6852_s8 = smov 112  }
0x157a   : > { %4666 = vrot.lane.b32.xlu1 %v4665_v51, %s5338_s0 }
0x157c   : > { %4671 = vrot.lane.b32.xlu0 %v4640_v55, %s5339_s28 }
0x157e   : > { %4676 = vrot.lane.b32.xlu1 %v4675_v47, %s5341_s2 }
0x1582   : > { %2947 = vrot.lane.b32.xlu1 %v1820_v17, %s5335_s10 }
0x15e2   : > { %v4642_v56 = vpop.permute.xlu0 %4641 }
0x15e3   : > { %v4644_v57 = vunpack.i.h.bf16 %v4642_v56  ;;  %v4643_v30 = vunpack.i.l.bf16 %v4642_v56 }
0x15e4   : > { %v4647_v60 = vpop.permute.xlu1 %4646 }
0x15e5   : > { %v4173_v18 = vpack.c.bf16 %v4644_v57, %v4643_v30  ;;  %v4649_v25 = vunpack.i.h.bf16 %v4647_v60  ;;  %v4648_v27 = vunpack.i.l.bf16 %v4647_v60  ;;  %v2868_v60 = vld [vmem:[#allocation24] sm:$0xff] }
0x15e6   : > { %v4652_v36 = vpop.permute.xlu0 %4651 }
0x15e7   : > { %4174 = vmatpush1.bf16.msra.mxu0 %v4173_v18  ;;  %v4176_v63 = vpack.c.bf16 %v4649_v25, %v4648_v27  ;;  %v4654_v2 = vunpack.i.h.bf16 %v4652_v36  ;;  %v4653_v55 = vunpack.i.l.bf16 %v4652_v36  ;;  %v2869_v18 = vld [vmem:[#allocation24 + $0x8] sm:$0xff] }
0x15e8   : > { %4175 = vmatprep.subr.bf16.mxu0 %v5337_v59  ;;  %v4657_v34 = vpop.permute.xlu1 %4656  ;;  %v4197_v25 = vpack.c.bf16 %v2869_v18, %v2868_v60  ;;  %v3100_v18 = vld [vmem:[%s6756_s24] sm:$0xff] }
0x15e9   : > { %v4179_v11 = vpack.c.bf16 %v4654_v2, %v4653_v55  ;;  %v4659_v17 = vunpack.i.h.bf16 %v4657_v34  ;;  %v4658_v35 = vunpack.i.l.bf16 %v4657_v34 }
0x15ea   : > { %v4662_v44 = vpop.permute.xlu0 %4661  ;;  %4198 = vmatpush3.bf16.msra.mxu1 %v4197_v25 }
0x15eb   : > { %4177 = vmatpush1.bf16.msra.mxu0 %v4176_v63  ;;  %v4182_v45 = vpack.c.bf16 %v4659_v17, %v4658_v35  ;;  %v4664_v29 = vunpack.i.h.bf16 %v4662_v44  ;;  %v4663_v5 = vunpack.i.l.bf16 %v4662_v44  ;;  %4199 = vmatprep.subr.bf16.mxu1 %v5337_v59 }
0x15ec   : > { %4178 = vmatprep.subr.bf16.mxu0 %v5337_v59  ;;  %v4667_v52 = vpop.permute.xlu1 %4666 }
0x15ed   : > { %v4185_v0 = vpack.c.bf16 %v4664_v29, %v4663_v5  ;;  %v4669_v12 = vunpack.i.h.bf16 %v4667_v52  ;;  %v4668_v43 = vunpack.i.l.bf16 %v4667_v52 }
0x15ee   : > { %v4672_v40 = vpop.permute.xlu0 %4671 }
0x15ef   : > { %4180 = vmatpush1.bf16.msra.mxu0 %v4179_v11  ;;  %v4188_v13 = vpack.c.bf16 %v4669_v12, %v4668_v43  ;;  %v4674_v51 = vunpack.i.h.bf16 %v4672_v40  ;;  %v4673_v19 = vunpack.i.l.bf16 %v4672_v40 }
0x15f0   : > { %4181 = vmatprep.subr.bf16.mxu0 %v5337_v59  ;;  %v4677_v37 = vpop.permute.xlu1 %4676 }
0x15f1   : > { %v4191_v47 = vpack.c.bf16 %v4674_v51, %v4673_v19  ;;  %v4679_v56 = vunpack.i.h.bf16 %v4677_v37  ;;  %v4678_v57 = vunpack.i.l.bf16 %v4677_v37 }
0x15f3   : > { %4183 = vmatpush1.bf16.msra.mxu0 %v4182_v45  ;;  %v4194_v30 = vpack.c.bf16 %v4679_v56, %v4678_v57 }
0x15f4   : > { %4184 = vmatprep.subr.bf16.mxu0 %v5337_v59  ;;  %v2948_v11 = vpop.permute.xlu1 %2947 }
0x15f5   : > { %v2952_v17 = vsel %vm1660_vm9, 0.0, %v2948_v11  ;;  %v3111_v11 = vld [vmem:[%s6756_s24 + $0x58] sm:$0xff] }
0x15f6   : > { %v2954_v35 = vsel %vm1662_vm3, %v2952_v17, 0.0 }
0x15f7   : > { %4186 = vmatpush1.bf16.msra.mxu0 %v4185_v0  ;;  %v2958_v5 = vmul.f32 %v2954_v35, %v6157_v54  ;;  %v2956_v52 = vmul.f32 %v6149_v58, %v2954_v35  ;;  %v2960_v51 = vmul.f32 %v2954_v35, %v6163_v4  ;;  %v2964_v56 = vmul.f32 %v2954_v35, %v6170_v10 }
0x15f8   : > { %4187 = vmatprep.subr.bf16.mxu0 %v5337_v59 }
0x15fb   : > { %4189 = vmatpush1.bf16.msra.mxu0 %v4188_v13 }
0x15fc   : > { %4190 = vmatprep.subr.bf16.mxu0 %v5337_v59 }
0x15ff   : > { %4192 = vmatpush1.bf16.msra.mxu0 %v4191_v47 }
0x1600   : > { %4193 = vmatprep.subr.bf16.mxu0 %v5337_v59 }
0x1603   : > { %4195 = vmatpush1.bf16.msra.mxu0 %v4194_v30  ;;  %v2966_v30 = vmul.f32 %v2954_v35, %v6180_v16 }
0x1606   : > { %2860 = vmatmul.mubr.f32.vlgmr.msra.gmra.mrb[8].mxu0 %v6408_v46 }
0x1607   : > { %3183 = vmatprep.mubr.f32.mxu0 %v5318_v1 }
0x16d9   : > { %v2861_v27 = vpop.f32.mrb[8].mxu0 }
0x16da   : > { %v2865_v36 = vmul.f32 %v2861_v27, %v6416_v53  ;;  %v2863_v63 = vpop.f32.mrb[9].mxu0  ;;  %v3105_v27 = vld [vmem:[%s6756_s24 + $0x28] sm:$0xff] }
0x16dc   : > { %v2866_v2 = vadd.f32 %v2865_v36, %v6419_v23  ;;  %v3107_v36 = vld [vmem:[%s6756_s24 + $0x38] sm:$0xff] }
0x16de   : > { %v2867_v55 = vmax.f32 %v2866_v2, 0.0  ;;  %v4230_v2 = vpack.c.bf16 %v3107_v36, %v3105_v27 }
0x16e0   : > { %4021 = vmatmul.mubr.msk.f32.vlgmr.msra.gmra.mrb[14].mxu1 %vm1039_vm7, %v2867_v55  ;;  %v3104_v55 = vld [vmem:[%s6756_s24 + $0x20] sm:$0xff] }
0x16e1   : > { %3802 = vmatprep.mubr.msk.f32.mxu1 %vm1039_vm7, %v6391_v31 }
0x17b3   : > { %v2939_v34 = vpop.f32.mrb[14].mxu1 }
0x17b4   : > { %2945 = vrot.lane.b32.xlu0 %v2939_v34, %s5335_s10  ;;  %v4022_v1 = vpop.f32.mrb[15].mxu1  ;;  %v3106_v34 = vld [vmem:[%s6756_s24 + $0x30] sm:$0xff]  ;;  %s6860_s10 = sld [smem:[#allocation47_spill]] }
0x17b5   : > { %v3109_v1 = vld [vmem:[%s6756_s24 + $0x48] sm:$0xff]  ;;  %v4232_v17 = vpack.c.bf16 %v3106_v34, %v3104_v55  ;;  %v3108_v34 = vld [vmem:[%s6756_s24 + $0x40] sm:$0xff] }
0x1826   : > { %v2946_v44 = vpop.permute.xlu0 %2945 }
0x1827   : > { %v2951_v45 = vsel %vm1660_vm9, 0.0, %v2946_v44  ;;  %vm6870_vm9 = vcmask 900096  }
0x1828   : > { %v2953_v29 = vsel %vm1662_vm3, %v2951_v45, 0.0  ;;  %vm6871_vm3 = vmmov %vm6870_vm9 }
0x1829   : > { %v4680_v0 = vpack.i.bf16 %v2954_v35, %v2953_v29  ;;  %v2957_v31 = vmul.f32 %v2953_v29, %v6157_v54  ;;  %v2955_v12 = vmul.f32 %v6149_v58, %v2953_v29  ;;  %v2959_v43 = vmul.f32 %v2953_v29, %v6163_v4  ;;  %vm6872_vm6 = vmmov %vm6871_vm3 }
0x182a   : > { %v2961_v37 = vmul.f32 %v2953_v29, %v6167_v8  ;;  %v2962_v58 = vmul.f32 %v2954_v35, %v6167_v8  ;;  %v2963_v54 = vmul.f32 %v2953_v29, %v6170_v10  ;;  %v2965_v57 = vmul.f32 %v2953_v29, %v6180_v16  ;;  %v3101_v8 = vld [vmem:[%s6756_s24 + $0x8] sm:$0xff]  ;;  %v3103_v10 = vld [vmem:[%s6756_s24 + $0x18] sm:$0xff]  ;;  %v3102_v16 = vld [vmem:[%s6756_s24 + $0x10] sm:$0xff] }
0x182b   : > { %4681 = vrot.lane.b32.xlu0 %v4680_v0, %s5326_s9  ;;  %v4685_v40 = vpack.i.bf16 %v2958_v5, %v2957_v31  ;;  %v4200_v13 = vpack.c.bf16 %v2956_v52, %v2955_v12  ;;  %v4690_v19 = vpack.i.bf16 %v2960_v51, %v2959_v43  ;;  %v4226_v25 = vpack.c.bf16 %v3103_v10, %v3101_v8 }
0x182c   : > { %v4700_v47 = vpack.i.bf16 %v2962_v58, %v2961_v37  ;;  %v4705_v4 = vpack.i.bf16 %v2964_v56, %v2963_v54  ;;  %v4715_v60 = vpack.i.bf16 %v2966_v30, %v2965_v57  ;;  %v4228_v63 = vpack.c.bf16 %v3102_v16, %v3100_v18 }
0x182d   : > { %4686 = vrot.lane.b32.xlu1 %v4685_v40, %s5327_s3  ;;  %4201 = vmatpush1.bf16.msra.mxu1 %v4200_v13  ;;  %v4234_v35 = vpack.c.bf16 %v3111_v11, %v3109_v1  ;;  %v3110_v1 = vld [vmem:[%s6756_s24 + $0x50] sm:$0xff] }
0x182e   : > { %4202 = vmatprep.subr.bf16.mxu1 %v5337_v59  ;;  %4227 = vmatprep.subr.bf16.mxu0 %v4226_v25  ;;  %v4236_v11 = vpack.c.bf16 %v3110_v1, %v3108_v34 }
0x182f   : > { %4691 = vrot.lane.b32.xlu0 %v4690_v19, %s5338_s0  ;;  %4229 = vmatpush1.bf16.msra.mxu0 %v4228_v63 }
0x1830   : > { %4231 = vmatprep.subr.bf16.mxu0 %v4230_v2 }
0x1831   : > { %4696 = vrot.lane.b32.xlu1 %v4680_v0, %s5339_s28 }
0x1833   : > { %4701 = vrot.lane.b32.xlu0 %v4700_v47, %s5341_s2  ;;  %4233 = vmatpush1.bf16.msra.mxu0 %v4232_v17  ;;  %v3113_v17 = vld [vmem:[%s6756_s24 + $0x68] sm:$0xff] }
0x1834   : > { %4235 = vmatprep.subr.bf16.mxu0 %v4234_v35 }
0x1835   : > { %4706 = vrot.lane.b32.xlu1 %v4705_v4, %s6852_s8 }
0x1837   : > { %4711 = vrot.lane.b32.xlu0 %v4680_v0, %s6853_s17  ;;  %4237 = vmatpush1.bf16.msra.mxu0 %v4236_v11 }
0x1839   : > { %4716 = vrot.lane.b32.xlu1 %v4715_v60, %s6854_s27 }
0x189d   : > { %v4682_v44 = vpop.permute.xlu0 %4681 }
0x189e   : > { %v4684_v45 = vunpack.i.h.bf16 %v4682_v44  ;;  %v4683_v29 = vunpack.i.l.bf16 %v4682_v44  ;;  %v3114_v44 = vld [vmem:[%s6756_s24 + $0x70] sm:$0xff] }
0x189f   : > { %v4687_v5 = vpop.permute.xlu1 %4686 }
0x18a0   : > { %v4203_v52 = vpack.c.bf16 %v4684_v45, %v4683_v29  ;;  %v4689_v0 = vunpack.i.h.bf16 %v4687_v5  ;;  %v4688_v31 = vunpack.i.l.bf16 %v4687_v5 }
0x18a1   : > { %v4692_v12 = vpop.permute.xlu0 %4691 }
0x18a2   : > { %4204 = vmatpush1.bf16.msra.mxu1 %v4203_v52  ;;  %v4206_v43 = vpack.c.bf16 %v4689_v0, %v4688_v31  ;;  %v4694_v40 = vunpack.i.h.bf16 %v4692_v12  ;;  %v4693_v13 = vunpack.i.l.bf16 %v4692_v12 }
0x18a3   : > { %4205 = vmatprep.subr.bf16.mxu1 %v5337_v59  ;;  %v4697_v51 = vpop.permute.xlu1 %4696 }
0x18a4   : > { %v4209_v19 = vpack.c.bf16 %v4694_v40, %v4693_v13  ;;  %v4699_v37 = vunpack.i.h.bf16 %v4697_v51  ;;  %v4698_v58 = vunpack.i.l.bf16 %v4697_v51 }
0x18a5   : > { %v4702_v54 = vpop.permute.xlu0 %4701 }
0x18a6   : > { %4207 = vmatpush1.bf16.msra.mxu1 %v4206_v43  ;;  %v4212_v47 = vpack.c.bf16 %v4699_v37, %v4698_v58  ;;  %v4704_v56 = vunpack.i.h.bf16 %v4702_v54  ;;  %v4703_v4 = vunpack.i.l.bf16 %v4702_v54 }
0x18a7   : > { %4208 = vmatprep.subr.bf16.mxu1 %v5337_v59  ;;  %v4707_v57 = vpop.permute.xlu1 %4706 }
0x18a8   : > { %v4215_v30 = vpack.c.bf16 %v4704_v56, %v4703_v4  ;;  %v4709_v60 = vunpack.i.h.bf16 %v4707_v57  ;;  %v4708_v8 = vunpack.i.l.bf16 %v4707_v57 }
0x18a9   : > { %v4712_v10 = vpop.permute.xlu0 %4711 }
0x18aa   : > { %4210 = vmatpush1.bf16.msra.mxu1 %v4209_v19  ;;  %v4218_v18 = vpack.c.bf16 %v4709_v60, %v4708_v8  ;;  %v4714_v25 = vunpack.i.h.bf16 %v4712_v10  ;;  %v4713_v16 = vunpack.i.l.bf16 %v4712_v10 }
0x18ab   : > { %4211 = vmatprep.subr.bf16.mxu1 %v5337_v59  ;;  %v4717_v27 = vpop.permute.xlu1 %4716 }
0x18ac   : > { %v4221_v36 = vpack.c.bf16 %v4714_v25, %v4713_v16  ;;  %v4719_v63 = vunpack.i.h.bf16 %v4717_v27  ;;  %v4718_v2 = vunpack.i.l.bf16 %v4717_v27 }
0x18ae   : > { %4213 = vmatpush1.bf16.msra.mxu1 %v4212_v47  ;;  %v4224_v55 = vpack.c.bf16 %v4719_v63, %v4718_v2 }
0x18af   : > { %4214 = vmatprep.subr.bf16.mxu1 %v5337_v59 }
0x18b2   : > { %4216 = vmatpush1.bf16.msra.mxu1 %v4215_v30 }
0x18b3   : > { %4217 = vmatprep.subr.bf16.mxu1 %v5337_v59 }
0x18b6   : > { %4219 = vmatpush1.bf16.msra.mxu1 %v4218_v18 }
0x18b7   : > { %4220 = vmatprep.subr.bf16.mxu1 %v5337_v59 }
0x18ba   : > { %4222 = vmatpush1.bf16.msra.mxu1 %v4221_v36 }
0x18bb   : > { %4223 = vmatprep.subr.bf16.mxu1 %v5337_v59  ;;  %v3115_v59 = vld [vmem:[%s6756_s24 + $0x78] sm:$0xff] }
0x18bc   : > { %v4238_v35 = vpack.c.bf16 %v3115_v59, %v3113_v17 }
0x18be   : > { %4225 = vmatpush1.bf16.msra.mxu1 %v4224_v55  ;;  %4239 = vmatprep.subr.bf16.mxu0 %v4238_v35 }
0x18c1   : > { %3092 = vmatmul.mubr.f32.vlgmr.msra.gmra.mrb[16].mxu1 %v6408_v46  ;;  %v3112_v46 = vld [vmem:[%s6756_s24 + $0x60] sm:$0xff] }
0x18c2   : > { %v4240_v45 = vpack.c.bf16 %v3114_v44, %v3112_v46 }
0x18c4   : > { %4241 = vmatpush1.bf16.msra.mxu0 %v4240_v45 }
0x1994   : > { %v3093_v29 = vpop.f32.mrb[16].mxu1 }
0x1995   : > { %v3097_v5 = vmul.f32 %v3093_v29, %v6416_v53  ;;  %v3095_v52 = vpop.f32.mrb[17].mxu1 }
0x1997   : > { %v3098_v0 = vadd.f32 %v3097_v5, %v6419_v23 }
0x1999   : > { %v3099_v31 = vmax.f32 %v3098_v0, 0.0 }
0x199b   : > { %3803 = vmatmul.mubr.msk.f32.vlgmr.msra.gmra.mrb[10].mxu0 %vm1829_vm8, %v3099_v31  ;;  %vm6873_vm8 = vmmov %vm6871_vm3 }
0x1a6e   : > { %v3185_v12 = vpop.f32.mrb[10].mxu0 }
0x1a6f   : > { %3196 = vrot.lane.b32.xlu0 %v3185_v12, %s6855_s6  ;;  %v3187_v43 = vpop.f32.mrb[11].mxu0 }
0x1a70   : > { %3198 = vrot.lane.b32.xlu1 %v3187_v43, %s6855_s6 }
0x1a73   : > { %3200 = vrot.lane.b32.xlu0 %v6125_v6, %s6855_s6 }
0x1a74   : > { %3202 = vrot.lane.b32.xlu1 %v6127_v14, %s6855_s6 }
0x1ae1   : > { %v3197_v40 = vpop.permute.xlu0 %3196 }
0x1ae2   : > { %v3199_v53 = vpop.permute.xlu1 %3198  ;;  %v6563_v51 = vsel %vm971_vm4, 0.0, %v3197_v40 }
0x1ae3   : > { %v6560_v13 = vsel %vm971_vm4, %v3197_v40, %v3199_v53  ;;  %v3216_v30 = vmul.f32 %v5904_v7, %v6563_v51  ;;  %v3220_v63 = vmul.f32 %v5929_v21, %v6563_v51  ;;  %v3226_v17 = vmul.f32 %v5931_v22, %v6563_v51 }
0x1ae4   : > { %v3217_v14 = vmul.f32 %v5908_v9, %v6560_v13  ;;  %v3221_v55 = vmul.f32 %v6560_v13, %v5943_v26  ;;  %v3227_v35 = vmul.f32 %v6560_v13, %v5974_v42  ;;  %v3238_v5 = vmul.f32 %v5953_v33, %v6563_v51 }
0x1ae5   : > { %v3201_v23 = vpop.permute.xlu0 %3200  ;;  %v3239_v0 = vmul.f32 %v6560_v13, %v5969_v41 }
0x1ae6   : > { %v6566_v19 = vsel %vm971_vm4, 0.0, %v3201_v23  ;;  %v3203_v37 = vpop.permute.xlu1 %3202 }
0x1ae7   : > { %v6569_v58 = vsel %vm971_vm4, %v3201_v23, %v3203_v37  ;;  %v6572_v6 = vsel %vm971_vm4, %v3203_v37, 0.0  ;;  %v3218_v54 = vmul.f32 %v5904_v7, %v6566_v19  ;;  %v3223_v27 = vmul.f32 %v5929_v21, %v6566_v19  ;;  %v3191_v23 = vld [vmem:[%s6858_s16 + $0x8] sm:$0xff] }
0x1ae8   : > { %v6580_v47 = vpack.i.bf16 %v6572_v6, %v6569_v58  ;;  %v3224_v56 = vmul.f32 %v6569_v58, %v5943_v26  ;;  %v3225_v4 = vmul.f32 %v5927_v20, %v6572_v6  ;;  %v3219_v57 = vmul.f32 %v5908_v9, %v6569_v58  ;;  %3804 = vmatprep.mubr.msk.f32.mxu0 %vm1039_vm7, %v3191_v23 }
0x1ae9   : > { %v3230_v60 = vmul.f32 %v6569_v58, %v5974_v42  ;;  %v3231_v8 = vmul.f32 %v5947_v28, %v6572_v6  ;;  %v4244_v25 = vpack.c.bf16 %v3218_v54, %v3216_v30  ;;  %v3214_v9 = vsel %vm971_vm4, %v3199_v53, 0.0 }
0x1aea   : > { %4721 = vrot.lane.b32.xlu1 %v6580_v47, %s5326_s9  ;;  %v4725_v10 = vpack.i.bf16 %v3225_v4, %v3224_v56  ;;  %v4242_v18 = vpack.c.bf16 %v3219_v57, %v3217_v14  ;;  %v4750_v7 = vpack.i.bf16 %v3214_v9, %v6560_v13  ;;  %v4740_v36 = vpack.i.bf16 %v6566_v19, %v6563_v51 }
0x1aeb   : > { %v4730_v16 = vpack.i.bf16 %v3231_v8, %v3230_v60  ;;  %v4755_v2 = vpack.i.bf16 %v3223_v27, %v3220_v63  ;;  %v3222_v34 = vmul.f32 %v5927_v20, %v3214_v9  ;;  %v3229_v1 = vmul.f32 %v5931_v22, %v6566_v19 }
0x1aec   : > { %4726 = vrot.lane.b32.xlu0 %v4725_v10, %s5327_s3  ;;  %4243 = vmatprep.subr.bf16.mxu0 %v4242_v18  ;;  %v3235_v59 = vmul.f32 %v5962_v39, %v6566_v19  ;;  %v3232_v20 = vmul.f32 %v5962_v39, %v6563_v51  ;;  %v3236_v26 = vmul.f32 %v6569_v58, %v5987_v49  ;;  %vm6862_vm4 = vcmask 916480  }
0x1aed   : > { %4245 = vmatpush1.bf16.msra.mxu0 %v4244_v25  ;;  %v4765_v11 = vpack.i.bf16 %v3222_v34, %v3221_v55  ;;  %v4760_v21 = vpack.i.bf16 %v3229_v1, %v3226_v17  ;;  %v3237_v46 = vmul.f32 %v5960_v38, %v6572_v6  ;;  %v3228_v44 = vmul.f32 %v5947_v28, %v3214_v9  ;;  %vm6863_vm7 = vmmov %vm6862_vm4 }
0x1aee   : > { %4731 = vrot.lane.b32.xlu1 %v4730_v16, %s6852_s8  ;;  %v4780_v22 = vpack.i.bf16 %v3235_v59, %v3232_v20  ;;  %v3241_v39 = vmul.f32 %v5953_v33, %v6566_v19  ;;  %v3242_v52 = vmul.f32 %v6569_v58, %v5969_v41  ;;  %v3243_v42 = vmul.f32 %v5951_v32, %v6572_v6 }
0x1aef   : > { %v4775_v45 = vpack.i.bf16 %v3237_v46, %v3236_v26  ;;  %v4785_v29 = vpack.i.bf16 %v3228_v44, %v3227_v35  ;;  %v3240_v31 = vmul.f32 %v5951_v32, %v3214_v9  ;;  %v3233_v33 = vmul.f32 %v6560_v13, %v5987_v49 }
0x1af0   : > { %4736 = vrot.lane.b32.xlu0 %v6580_v47, %s6853_s17  ;;  %v4795_v28 = vpack.i.bf16 %v3241_v39, %v3238_v5  ;;  %v4790_v12 = vpack.i.bf16 %v3243_v42, %v3242_v52  ;;  %v3234_v43 = vmul.f32 %v5960_v38, %v3214_v9  ;;  %v3245_v41 = vmul.f32 %v6560_v13, %v6010_v3 }
0x1af1   : > { %v4810_v40 = vpack.i.bf16 %v3240_v31, %v3239_v0  ;;  %v3246_v32 = vmul.f32 %v5999_v61, %v3214_v9  ;;  %v3247_v38 = vmul.f32 %v6001_v62, %v6566_v19  ;;  %v3244_v13 = vmul.f32 %v6001_v62, %v6563_v51  ;;  %v3192_v62 = vld [vmem:[%s6861_s1] sm:$0xff] }
0x1af2   : > { %4751 = vrot.lane.b32.xlu1 %v4750_v7, %s6853_s17  ;;  %v4800_v53 = vpack.i.bf16 %v3234_v43, %v3233_v33  ;;  %v3248_v37 = vmul.f32 %v6569_v58, %v6010_v3  ;;  %v3249_v14 = vmul.f32 %v5999_v61, %v6572_v6 }
0x1af3   : > { %v4830_v49 = vpack.i.bf16 %v3246_v32, %v3245_v41  ;;  %v4835_v19 = vpack.i.bf16 %v3247_v38, %v3244_v13 }
0x1af4   : > { %4741 = vrot.lane.b32.xlu0 %v4740_v36, %s5326_s9  ;;  %v4825_v54 = vpack.i.bf16 %v3249_v14, %v3248_v37 }
0x1af6   : > { %4756 = vrot.lane.b32.xlu1 %v4755_v2, %s5327_s3 }
0x1af8   : > { %4746 = vrot.lane.b32.xlu0 %v4750_v7, %s5326_s9  ;;  %s6856_s9 = smov 96  }
0x1afa   : > { %4766 = vrot.lane.b32.xlu1 %v4765_v11, %s5327_s3  ;;  %s6857_s3 = smov 95  }
0x1afc   : > { %4761 = vrot.lane.b32.xlu0 %v4760_v21, %s6852_s8 }
0x1afe   : > { %4771 = vrot.lane.b32.xlu1 %v4740_v36, %s6853_s17 }
0x1b00   : > { %4781 = vrot.lane.b32.xlu0 %v4780_v22, %s6854_s27 }
0x1b02   : > { %4776 = vrot.lane.b32.xlu1 %v4775_v45, %s6854_s27 }
0x1b04   : > { %4786 = vrot.lane.b32.xlu0 %v4785_v29, %s6852_s8 }
0x1b06   : > { %4796 = vrot.lane.b32.xlu1 %v4795_v28, %s6856_s9 }
0x1b08   : > { %4791 = vrot.lane.b32.xlu0 %v4790_v12, %s6856_s9 }
0x1b0a   : > { %4811 = vrot.lane.b32.xlu1 %v4810_v40, %s6856_s9  ;;  %s6886_s9 = sld [smem:[#allocation48_spill]] }
0x1b0c   : > { %4801 = vrot.lane.b32.xlu0 %v4800_v53, %s6854_s27 }
0x1b0e   : > { %4816 = vrot.lane.b32.xlu1 %v6580_v47, %s6857_s3  ;;  %v3193_v47 = vld [vmem:[%s6860_s10] sm:$0xff] }
0x1b10   : > { %4806 = vrot.lane.b32.xlu0 %v4750_v7, %s6857_s3 }
0x1b12   : > { %4831 = vrot.lane.b32.xlu1 %v4830_v49, %s6859_s18 }
0x1b14   : > { %4821 = vrot.lane.b32.xlu0 %v4740_v36, %s6857_s3  ;;  %s960_s3 = scalar_lea.vmem %s6886_s9, %s3808_s4 }
0x1b16   : > { %4836 = vrot.lane.b32.xlu1 %v4835_v19, %s6859_s18 }
0x1b18   : > { %4826 = vrot.lane.b32.xlu0 %v4825_v54, %s6859_s18 }
0x1b1a   : > { %3527 = vperm.xlu1 %4534, %v3193_v47  }
0x1b1c   : > { %3520 = vperm.xlu0 %4533, %v3192_v62  }
0x1b5c   : > { %v4722_v61 = vpop.permute.xlu1 %4721 }
0x1b5d   : > { %v4724_v4 = vunpack.i.h.bf16 %v4722_v61  ;;  %v4723_v57 = vunpack.i.l.bf16 %v4722_v61 }
0x1b5e   : > { %v4727_v3 = vpop.permute.xlu0 %4726 }
0x1b5f   : > { %v4729_v8 = vunpack.i.h.bf16 %v4727_v3  ;;  %v4728_v18 = vunpack.i.l.bf16 %v4727_v3  ;;  %v3269_v36 = vsel %vm1094_vm10, %v4723_v57, %v4724_v4 }
0x1b60   : > { %v4732_v51 = vpop.permute.xlu1 %4731 }
0x1b61   : > { %v3295_v26 = vsel %vm1108_vm11, %v4728_v18, %v4729_v8  ;;  %v4734_v29 = vunpack.i.h.bf16 %v4732_v51  ;;  %v4733_v5 = vunpack.i.l.bf16 %v4732_v51 }
0x1b62   : > { %v6682_v58 = vpop.permute.xlu0 %4736 }
0x1b63   : > { %v4739_v31 = vunpack.i.h.bf16 %v6682_v58  ;;  %v4738_v33 = vunpack.i.l.bf16 %v6682_v58  ;;  %v3321_v38 = vsel %vm6862_vm4, %v4733_v5, %v4734_v29 }
0x1b64   : > { %v4752_v6 = vpop.permute.xlu1 %4751 }
0x1b65   : > { %v4754_v42 = vunpack.i.h.bf16 %v4752_v6  ;;  %v4753_v28 = vunpack.i.l.bf16 %v4752_v6  ;;  %v3341_v62 = vsel %vm6867_vm14, %v4738_v33, %v4739_v31 }
0x1b66   : > { %v4742_v56 = vpop.permute.xlu0 %4741 }
0x1b67   : > { %v4744_v30 = vunpack.i.h.bf16 %v4742_v56  ;;  %v4743_v25 = vunpack.i.l.bf16 %v4742_v56  ;;  %v3339_v14 = vsel %vm6866_vm12, %v4753_v28, %v4754_v42  ;;  %vm6882_vm12 = vcmask 769024  }
0x1b68   : > { %v4757_v60 = vpop.permute.xlu1 %4756  ;;  %v4258_v6 = vpack.c.bf16 %v3341_v62, %v3339_v14  ;;  %vm6883_vm14 = vmmov %vm6882_vm12 }
0x1b69   : > { %v3268_v7 = vsel %vm1094_vm10, %v4744_v30, %v4723_v57  ;;  %v4759_v1 = vunpack.i.h.bf16 %v4757_v60  ;;  %v4758_v11 = vunpack.i.l.bf16 %v4757_v60 }
0x1b6a   : > { %v4747_v10 = vpop.permute.xlu0 %4746 }
0x1b6b   : > { %v4749_v16 = vunpack.i.h.bf16 %v4747_v10  ;;  %v4748_v9 = vunpack.i.l.bf16 %v4747_v10  ;;  %v3294_v44 = vsel %vm1108_vm11, %v4759_v1, %v4728_v18 }
0x1b6c   : > { %v4767_v27 = vpop.permute.xlu1 %4766 }
0x1b6d   : > { %v3266_v63 = vsel %vm1094_vm10, %v4743_v25, %v4748_v9  ;;  %v4769_v2 = vunpack.i.h.bf16 %v4767_v27  ;;  %v4768_v55 = vunpack.i.l.bf16 %v4767_v27  ;;  %v3267_v34 = vsel %vm1094_vm10, %v4748_v9, %v4749_v16  ;;  %vm6864_vm10 = vmmov %vm6862_vm4 }
0x1b6e   : > { %v4248_v17 = vpack.c.bf16 %v3268_v7, %v3266_v63  ;;  %v4762_v21 = vpop.permute.xlu0 %4761  ;;  %v4246_v59 = vpack.c.bf16 %v3269_v36, %v3267_v34 }
0x1b6f   : > { %v3293_v20 = vsel %vm1108_vm11, %v4768_v55, %v4769_v2  ;;  %v3292_v46 = vsel %vm1108_vm11, %v4758_v11, %v4768_v55  ;;  %v4764_v0 = vunpack.i.h.bf16 %v4762_v21  ;;  %v4763_v43 = vunpack.i.l.bf16 %v4762_v21  ;;  %vm6865_vm11 = vmmov %vm6862_vm4 }
0x1b70   : > { %v4772_v22 = vpop.permute.xlu1 %4771  ;;  %4247 = vmatprep.subr.bf16.mxu0 %v4246_v59  ;;  %v4250_v35 = vpack.c.bf16 %v3295_v26, %v3293_v20  ;;  %v4252_v39 = vpack.c.bf16 %v3294_v44, %v3292_v46  ;;  %vm6878_vm4 = vmmov %vm6876_vm0 }
0x1b71   : > { %4249 = vmatpush1.bf16.msra.mxu0 %v4248_v17  ;;  %v4774_v41 = vunpack.i.h.bf16 %v4772_v22  ;;  %v4773_v32 = vunpack.i.l.bf16 %v4772_v22  ;;  %v3320_v23 = vsel %vm6863_vm7, %v4764_v0, %v4733_v5  ;;  %vm6879_vm7 = vmmov %vm6877_vm13 }
0x1b72   : > { %v4782_v45 = vpop.permute.xlu0 %4781  ;;  %4251 = vmatprep.subr.bf16.mxu0 %v4250_v35 }
0x1b73   : > { %v3338_v61 = vsel %vm6868_vm15, %v4773_v32, %v4753_v28  ;;  %v3340_v3 = vsel %vm6869_vm5, %v4774_v41, %v4738_v33  ;;  %v4784_v30 = vunpack.i.h.bf16 %v4782_v45  ;;  %v4783_v25 = vunpack.i.l.bf16 %v4782_v45  ;;  %vm6884_vm15 = vmmov %vm6882_vm12 }
0x1b74   : > { %v4777_v52 = vpop.permute.xlu1 %4776  ;;  %v4260_v18 = vpack.c.bf16 %v3340_v3, %v3338_v61  ;;  %vm6885_vm5 = vmmov %vm6882_vm12  ;;  %v3190_v61 = vld [vmem:[%s6858_s16] sm:$0xff] }
0x1b75   : > { %4253 = vmatpush1.bf16.msra.mxu0 %v4252_v39  ;;  %v4778_v51 = vunpack.i.l.bf16 %v4777_v52  ;;  %v4779_v56 = vunpack.i.h.bf16 %v4777_v52 }
0x1b76   : > { %v4787_v12 = vpop.permute.xlu0 %4786 }
0x1b77   : > { %v4789_v40 = vunpack.i.h.bf16 %v4787_v12  ;;  %v4788_v53 = vunpack.i.l.bf16 %v4787_v12  ;;  %v3366_v7 = vsel %vm6870_vm9, %v4784_v30, %v4778_v51  ;;  %v3367_v2 = vsel %vm6873_vm8, %v4778_v51, %v4779_v56 }
0x1b78   : > { %v4797_v49 = vpop.permute.xlu1 %4796 }
0x1b79   : > { %v3318_v13 = vsel %vm6864_vm10, %v4763_v43, %v4788_v53  ;;  %v3319_v37 = vsel %vm6865_vm11, %v4788_v53, %v4789_v40  ;;  %v4798_v34 = vunpack.i.l.bf16 %v4797_v49  ;;  %v4799_v22 = vunpack.i.h.bf16 %v4797_v49  ;;  %vm6880_vm10 = vmmov %vm6879_vm7 }
0x1b7a   : > { %v4256_v19 = vpack.c.bf16 %v3320_v23, %v3318_v13  ;;  %v4792_v54 = vpop.permute.xlu0 %4791  ;;  %v4254_v47 = vpack.c.bf16 %v3321_v38, %v3319_v37  ;;  %vm6881_vm11 = vmmov %vm6879_vm7 }
0x1b7b   : > { %v4794_v60 = vunpack.i.h.bf16 %v4792_v54  ;;  %v4793_v8 = vunpack.i.l.bf16 %v4792_v54 }
0x1b7c   : > { %v4812_v58 = vpop.permute.xlu1 %4811  ;;  %4255 = vmatprep.subr.bf16.mxu0 %v4254_v47 }
0x1b7d   : > { %v4814_v4 = vunpack.i.h.bf16 %v4812_v58  ;;  %v4813_v57 = vunpack.i.l.bf16 %v4812_v58  ;;  %4257 = vmatpush1.bf16.msra.mxu0 %v4256_v19  ;;  %v3393_v21 = vsel %vm6875_vm1, %v4793_v8, %v4794_v60  ;;  %v3392_v29 = vsel %vm6878_vm4, %v4799_v22, %v4793_v8 }
0x1b7e   : > { %v4802_v10 = vpop.permute.xlu0 %4801  ;;  %4259 = vmatprep.subr.bf16.mxu0 %v4258_v6 }
0x1b7f   : > { %v4804_v16 = vunpack.i.h.bf16 %v4802_v10  ;;  %v4803_v9 = vunpack.i.l.bf16 %v4802_v10  ;;  %v3391_v55 = vsel %vm6874_vm2, %v4813_v57, %v4814_v4  ;;  %v3390_v35 = vsel %vm6876_vm0, %v4798_v34, %v4813_v57 }
0x1b80   : > { %v4817_v27 = vpop.permute.xlu1 %4816  ;;  %v4266_v45 = vpack.c.bf16 %v3393_v21, %v3391_v55  ;;  %v4268_v52 = vpack.c.bf16 %v3392_v29, %v3390_v35 }
0x1b81   : > { %v3364_v36 = vsel %vm6871_vm3, %v4783_v25, %v4803_v9  ;;  %4261 = vmatpush1.bf16.msra.mxu0 %v4260_v18  ;;  %v3365_v63 = vsel %vm6872_vm6, %v4803_v9, %v4804_v16  ;;  %v4819_v59 = vunpack.i.h.bf16 %v4817_v27  ;;  %v4818_v20 = vunpack.i.l.bf16 %v4817_v27 }
0x1b82   : > { %v4264_v1 = vpack.c.bf16 %v3366_v7, %v3364_v36  ;;  %v4807_v11 = vpop.permute.xlu0 %4806  ;;  %v4262_v17 = vpack.c.bf16 %v3367_v2, %v3365_v63 }
0x1b83   : > { %v4809_v26 = vunpack.i.h.bf16 %v4807_v11  ;;  %v4808_v46 = vunpack.i.l.bf16 %v4807_v11  ;;  %v3413_v0 = vsel %vm6879_vm7, %v4818_v20, %v4819_v59 }
0x1b84   : > { %v4832_v44 = vpop.permute.xlu1 %4831  ;;  %4263 = vmatprep.subr.bf16.mxu0 %v4262_v17 }
0x1b85   : > { %4265 = vmatpush1.bf16.msra.mxu0 %v4264_v1  ;;  %v3411_v39 = vsel %vm6877_vm13, %v4808_v46, %v4809_v26  ;;  %v4834_v31 = vunpack.i.h.bf16 %v4832_v44  ;;  %v4833_v43 = vunpack.i.l.bf16 %v4832_v44 }
0x1b86   : > { %v4822_v5 = vpop.permute.xlu0 %4821  ;;  %4267 = vmatprep.subr.bf16.mxu0 %v4266_v45  ;;  %v4270_v33 = vpack.c.bf16 %v3413_v0, %v3411_v39 }
0x1b87   : > { %v4824_v42 = vunpack.i.h.bf16 %v4822_v5  ;;  %v4823_v28 = vunpack.i.l.bf16 %v4822_v5  ;;  %v3437_v19 = vsel %vm6884_vm15, %v4833_v43, %v4834_v31 }
0x1b88   : > { %v4837_v12 = vpop.permute.xlu1 %4836 }
0x1b89   : > { %v3412_v40 = vsel %vm6880_vm10, %v4824_v42, %v4818_v20  ;;  %v3410_v53 = vsel %vm6881_vm11, %v4823_v28, %v4808_v46  ;;  %v4838_v41 = vunpack.i.l.bf16 %v4837_v12  ;;  %4269 = vmatpush1.bf16.msra.mxu0 %v4268_v52  ;;  %v4839_v38 = vunpack.i.h.bf16 %v4837_v12 }
0x1b8a   : > { %v4272_v32 = vpack.c.bf16 %v3412_v40, %v3410_v53  ;;  %v4827_v49 = vpop.permute.xlu0 %4826  ;;  %4271 = vmatprep.subr.bf16.mxu0 %v4270_v33 }
0x1b8b   : > { %v4829_v23 = vunpack.i.h.bf16 %v4827_v49  ;;  %v4828_v13 = vunpack.i.l.bf16 %v4827_v49  ;;  %v3436_v37 = vsel %vm6882_vm12, %v4838_v41, %v4833_v43 }
0x1b8d   : > { %v3438_v14 = vsel %vm6883_vm14, %v4839_v38, %v4828_v13  ;;  %4273 = vmatpush1.bf16.msra.mxu0 %v4272_v32  ;;  %v3439_v54 = vsel %vm6885_vm5, %v4828_v13, %v4829_v23 }
0x1b8e   : > { %v4276_v47 = vpack.c.bf16 %v3438_v14, %v3436_v37  ;;  %v4274_v62 = vpack.c.bf16 %v3439_v54, %v3437_v19 }
0x1b90   : > { %4275 = vmatprep.subr.bf16.mxu0 %v4274_v62 }
0x1b91   : > { %4277 = vmatpush1.bf16.msra.mxu0 %v4276_v47 }
0x1b94   : > { %3512 = vmatmul.mubr.f32.vlgmr.msra.gmra.mrb[12].mxu0 %v3190_v61 }
0x1b99   : > { %v3528_v56 = vpop.permute.xlu1 %3527 }
0x1b9b   : > { %v3521_v3 = vpop.permute.xlu0 %3520 }
0x1c67   : > { %v3513_v51 = vpop.f32.mrb[12].mxu0 }
0x1c68   : > { %v3523_v58 = vmul.f32 %v3521_v3, %v3513_v51  ;;  %v3515_v6 = vpop.f32.mrb[13].mxu0 }
0x1c69   : > { %v3524_v4 = vmul.f32 %v3521_v3, %v3515_v6 }
0x1c6a   : > { %v3530_v57 = vadd.f32 %v3528_v56, %v3523_v58 }
0x1c6b   : > { %v3531_v30 = vadd.f32 %v3528_v56, %v3524_v4 }
0x1c6c   : > { %v3532_v60 = vmax.f32 %v3530_v57, 0.0 }
0x1c6d   : > { %v3533_v8 = vmax.f32 %v3531_v30, 0.0 }
0x1c6e   : > { %v3534_v10 = vadd.f32 %v3532_v60, %v1297_v48 }
0x1c6f   : > { %v3535_v18 = vadd.f32 %v3533_v8, %v1298_v50 }
0x1c70   : > { %3536 = vst [vmem:[%s960_s3] sm:$0xff] %v3534_v10 }
0x1c71   : > { %3537 = vst [vmem:[%s960_s3 + $0x8] sm:$0xff] %v3535_v18 }
0x1c72 PF: > { %s6887_s8 = sld [smem:[#allocation33_spill]] }
0x1c78   : > { %s43_s29 = sadd.s32 1, %s6887_s8  }
0x1c79   : > { %p40_p4 = scmp.ge.s32.totalorder %s43_s29, 4  }
0x1c7b   :  { %42 = sbr.rel (!%p40_p4) target bundleno = 24 (0x18), region = 211 }
0x1c82   :  { %3559 = vsyncpa [#allocation3], 1 }
0x1c83   :  { %3561 = vsyncpa [#allocation3 + $0x1], 1 }
0x1c84   :  { %3562 = vsyncpa [#allocation5], 1 }
0x1c85   :  { %3563 = vsyncpa [#allocation8], 1 }
0x1c86   :  { %3564 = vsyncpa [#allocation11], 1 }
0x1c87   :  { %3565 = vsyncpa [#allocation14], 1 }
0x1c88   :  { %3566 = vsyncpa [#allocation17], 1 }
0x1c89   :  { %3567 = vsyncpa [#allocation20], 1 }
0x1c8a   :  { %3568 = vsyncpa [#allocation23], 1 }

</bundles_post_ra>
